<compile_context>
chip_gen: v7x
topology: tpu7x:2x2x1
jax: 0.10.0
libtpu: 0.0.40
codegen_flags: <defaults>
</compile_context>

<pallas_src>
import functools

import jax
import jax.numpy as jnp
from jax.experimental import pallas as pl
from jax.experimental.pallas import tpu as pltpu

_VMEM = pl.BlockSpec(memory_space=pltpu.MemorySpace.VMEM)


# ----------------------------------------------------------------------------
# Fused decoder-layer kernel
# ----------------------------------------------------------------------------
def _decoder_layer_kernel(
    x_ref, mem_ref,
    sa_wq, sa_bq, sa_wk, sa_bk, sa_wv, sa_bv, sa_wo, sa_bo,
    ca_wq, ca_bq, ca_wk, ca_bk, ca_wv, ca_bv, ca_wo, ca_bo,
    w1_ref, b1_ref, w2_ref, b2_ref,
    g1_ref, be1_ref, g2_ref, be2_ref, g3_ref, be3_ref,
    out_ref, a1_ref, a2_ref,
    *, num_heads):
  B, T, E = x_ref.shape
  S = mem_ref.shape[1]
  H = num_heads
  Dh = E // H

  # Flatten to row-major (B*T, E) / (B*S, E); these reshapes only merge leading
  # dims (layout preserving).
  x2 = x_ref[...].reshape(B * T, E)
  m2 = mem_ref[...].reshape(B * S, E)

  def layer_norm(y, g, beta):
    mu = jnp.mean(y, axis=-1, keepdims=True)
    d = y - mu
    var = jnp.mean(d * d, axis=-1, keepdims=True)
    return d * jax.lax.rsqrt(var + 1e-5) * g + beta

  def mha(q_in, kv_in, kv_len, wq, bq, wk, bk, wv, bv, wo, bo, weights_ref):
    # q_in: (B*T, E); kv_in: (B*kv_len, E).  Per-head projection weights are
    # (H, E, Dh) (q-scaling already folded into wq/bq); per-head out-proj
    # slices are (H, Dh, E).  Heads are a statically unrolled loop so every
    # matmul is 2-D or leading-batch 3-D and every ref index is on the
    # leading axis.
    acc = None
    for hh in range(H):
      qh = (jnp.dot(q_in, wq[hh], preferred_element_type=jnp.float32)
            + bq[hh]).reshape(B, T, Dh)
      kh = (jnp.dot(kv_in, wk[hh], preferred_element_type=jnp.float32)
            + bk[hh]).reshape(B, kv_len, Dh)
      vh = (jnp.dot(kv_in, wv[hh], preferred_element_type=jnp.float32)
            + bv[hh]).reshape(B, kv_len, Dh)
      sc = jnp.einsum("btd,bsd->bts", qh, kh,
                      preferred_element_type=jnp.float32)       # (B, T, kv_len)
      mx = jnp.max(sc, axis=-1, keepdims=True)
      ex = jnp.exp(sc - mx)
      # approx=False keeps the 1e-5 tolerance on attention weights.
      p = ex * pl.reciprocal(jnp.sum(ex, axis=-1, keepdims=True), approx=False)
      weights_ref[hh] = p                                        # (B, T, kv_len)
      oh = jnp.einsum("bts,bsd->btd", p, vh,
                      preferred_element_type=jnp.float32)        # (B, T, Dh)
      contrib = jnp.dot(oh.reshape(B * T, Dh), wo[hh],
                        preferred_element_type=jnp.float32)      # (B*T, E)
      acc = contrib if acc is None else acc + contrib
    return acc + bo[...]

  # --- self-attention + residual + LayerNorm 1 ---
  sa_out = mha(x2, x2, T, sa_wq, sa_bq, sa_wk, sa_bk, sa_wv, sa_bv,
               sa_wo, sa_bo, a1_ref)
  y1 = layer_norm(x2 + sa_out, g1_ref[...], be1_ref[...])

  # --- cross-attention + residual + LayerNorm 2 ---
  ca_out = mha(y1, m2, S, ca_wq, ca_bq, ca_wk, ca_bk, ca_wv, ca_bv,
               ca_wo, ca_bo, a2_ref)
  y2 = layer_norm(y1 + ca_out, g2_ref[...], be2_ref[...])

  # --- position-wise FFN + residual + LayerNorm 3 ---
  hmid = jnp.maximum(
      jnp.dot(y2, w1_ref[...], preferred_element_type=jnp.float32)
      + b1_ref[...], 0.0)
  ffn = (jnp.dot(hmid, w2_ref[...], preferred_element_type=jnp.float32)
         + b2_ref[...])
  y3 = layer_norm(y2 + ffn, g3_ref[...], be3_ref[...])

  out_ref[...] = y3.reshape(B, T, E)


# ----------------------------------------------------------------------------
# Wrapper: weight pre-transposition / per-head packing + single pallas_call
# ----------------------------------------------------------------------------
def _prep_attn_params(p, e, h):
  """Pre-transpose + split per-head; fold q scaling.  Returns an 8-tuple."""
  dh = e // h
  scaling = float(dh) ** -0.5
  w_in = p["in_proj_weight"]          # (3E, E) -- torch F.linear layout (out, in)
  b_in = p["in_proj_bias"]            # (3E,)
  wq, wk, wv = w_in[:e] * scaling, w_in[e:2 * e], w_in[2 * e:]
  bq, bk, bv = b_in[:e] * scaling, b_in[e:2 * e], b_in[2 * e:]

  def per_head_in(w, b):
    # x @ w.T, then heads split the output dim as (h, dh) head-major.
    wt = jnp.transpose(w.T.reshape(e, h, dh), (1, 0, 2))   # (H, E, Dh)
    return wt, b.reshape(h, 1, dh)                         # (H, 1, Dh)

  wq_h, bq_h = per_head_in(wq, bq)
  wk_h, bk_h = per_head_in(wk, bk)
  wv_h, bv_h = per_head_in(wv, bv)

  # out = concat_h(attn_h) @ Wo.T + bo  ==  sum_h attn_h @ Wo.T[h*dh:(h+1)*dh]
  wo_h = p["out_proj_weight"].T.reshape(h, dh, e)          # (H, Dh, E)
  bo = p["out_proj_bias"].reshape(1, e)
  return (wq_h, bq_h, wk_h, bk_h, wv_h, bv_h, wo_h, bo)


def transformer_decoder_layer(tgt, src, params, num_heads):
  # Dropout is identity (eval mode); masks are None.
  t, b, e = tgt.shape
  s = src.shape[0]
  h = num_heads

  sa = _prep_attn_params(params["self_attn"], e, h)
  ca = _prep_attn_params(params["cross_attn"], e, h)

  w1t = params["ff_linear1"]["weight"].T                   # (E, PF)
  b1 = params["ff_linear1"]["bias"].reshape(1, -1)
  w2t = params["ff_linear2"]["weight"].T                   # (PF, E)
  b2 = params["ff_linear2"]["bias"].reshape(1, -1)
  g1 = params["ff_norm1"]["gamma"].reshape(1, e)
  be1 = params["ff_norm1"]["beta"].reshape(1, e)
  g2 = params["ff_norm2"]["gamma"].reshape(1, e)
  be2 = params["ff_norm2"]["beta"].reshape(1, e)
  g3 = params["ff_norm3"]["gamma"].reshape(1, e)
  be3 = params["ff_norm3"]["beta"].reshape(1, e)

  # Batch-first layout for the kernel (one tiny XLA transpose each way).
  x_bt = jnp.transpose(tgt, (1, 0, 2))                     # (B, T, E)
  m_bs = jnp.transpose(src, (1, 0, 2))                     # (B, S, E)

  inputs = (x_bt, m_bs) + sa + ca + (w1t, b1, w2t, b2,
                                     g1, be1, g2, be2, g3, be3)

  out_bt, a1_hb, a2_hb = pl.pallas_call(
      functools.partial(_decoder_layer_kernel, num_heads=h),
      out_shape=(
          jax.ShapeDtypeStruct((b, t, e), jnp.float32),
          jax.ShapeDtypeStruct((h, b, t, t), jnp.float32),
          jax.ShapeDtypeStruct((h, b, t, s), jnp.float32),
      ),
      in_specs=[_VMEM] * len(inputs),
      out_specs=(_VMEM, _VMEM, _VMEM),
  )(*inputs)

  out = jnp.transpose(out_bt, (1, 0, 2))                   # (T, B, E)
  tgt_align = jnp.transpose(a1_hb, (1, 0, 2, 3))           # (B, H, T, T)
  tgt_src_align = jnp.transpose(a2_hb, (1, 0, 2, 3))       # (B, H, T, S)
  return out, tgt_align, tgt_src_align


# ----------------------------------------------------------------------------
# Pure-JAX reference (for correctness check)
# ----------------------------------------------------------------------------
def _ref_mha(query, key, value, p, num_heads, is_self_attn):
  t, b, e = query.shape
  s = key.shape[0]
  h = num_heads
  dh = e // h
  scaling = float(dh) ** -0.5
  w_in, b_in = p["in_proj_weight"], p["in_proj_bias"]
  q2d = query.reshape(t * b, e)
  if is_self_attn:
    qkv = q2d @ w_in.T + b_in
    q, k, v = jnp.split(qkv, 3, axis=-1)
  else:
    q = q2d @ w_in[:e].T + b_in[:e]
    kv = key.reshape(s * b, e) @ w_in[e:].T + b_in[e:]
    k, v = jnp.split(kv, 2, axis=-1)
  q = (q * scaling).reshape(t, b * h, dh).transpose(1, 0, 2)
  k = k.reshape(s, b * h, dh).transpose(1, 0, 2)
  v = v.reshape(s, b * h, dh).transpose(1, 0, 2)
  sc = jnp.einsum("btd,bsd->bts", q, k)
  p_w = jax.nn.softmax(sc, axis=-1)
  o = jnp.einsum("bts,bsd->btd", p_w, v)
  o = o.transpose(1, 0, 2).reshape(t * b, e) @ p["out_proj_weight"].T + p["out_proj_bias"]
  return o.reshape(t, b, e), p_w.reshape(b, h, t, s)


def _ref_ln(x, g, bta):
  mu = jnp.mean(x, axis=-1, keepdims=True)
  var = jnp.mean((x - mu) ** 2, axis=-1, keepdims=True)
  return (x - mu) / jnp.sqrt(var + 1e-5) * g + bta


def ref_decoder_layer(tgt, src, params, num_heads):
  tgt2, a1 = _ref_mha(tgt, tgt, tgt, params["self_attn"], num_heads, True)
  tgt = _ref_ln(tgt + tgt2, params["ff_norm1"]["gamma"], params["ff_norm1"]["beta"])
  tgt2, a2 = _ref_mha(tgt, src, src, params["cross_attn"], num_heads, False)
  tgt = _ref_ln(tgt + tgt2, params["ff_norm2"]["gamma"], params["ff_norm2"]["beta"])
  h = jax.nn.relu(tgt @ params["ff_linear1"]["weight"].T + params["ff_linear1"]["bias"])
  tgt2 = h @ params["ff_linear2"]["weight"].T + params["ff_linear2"]["bias"]
  tgt = _ref_ln(tgt + tgt2, params["ff_norm3"]["gamma"], params["ff_norm3"]["beta"])
  return tgt, a1, a2


# ----------------------------------------------------------------------------
# Deterministic parameter init + main
# ----------------------------------------------------------------------------
def init_params(key, hid_dim, pf_dim):
  ks = jax.random.split(key, 16)
  n = lambda k, shape, s=0.1: s * jax.random.normal(k, shape, jnp.float32)

  def attn_params(k0, k1, k2, k3):
    return {
        "in_proj_weight": n(k0, (3 * hid_dim, hid_dim)),
        "in_proj_bias": n(k1, (3 * hid_dim,), 0.02),
        "out_proj_weight": n(k2, (hid_dim, hid_dim)),
        "out_proj_bias": n(k3, (hid_dim,), 0.02),
    }

  def ln_params(k0, k1):
    return {
        "gamma": 1.0 + n(k0, (hid_dim,), 0.05),
        "beta": n(k1, (hid_dim,), 0.05),
    }

  return {
      "self_attn": attn_params(ks[0], ks[1], ks[2], ks[3]),
      "cross_attn": attn_params(ks[4], ks[5], ks[6], ks[7]),
      "ff_linear1": {"weight": n(ks[8], (pf_dim, hid_dim)),
                     "bias": n(ks[9], (pf_dim,), 0.02)},
      "ff_linear2": {"weight": n(ks[10], (hid_dim, pf_dim)),
                     "bias": n(ks[11], (hid_dim,), 0.02)},
      "ff_norm1": ln_params(ks[12], ks[13]),
      "ff_norm2": ln_params(ks[14], ks[15]),
      "ff_norm3": ln_params(ks[14], ks[13]),
  }


if __name__ == "__main__":
  HID_DIM, N_HEADS, PF_DIM = 32, 4, 64
  TGT_LEN, SRC_LEN, BSZ = 8, 16, 2

  root = jax.random.PRNGKey(0)
  k_p, k_t, k_s = jax.random.split(root, 3)
  params = init_params(k_p, HID_DIM, PF_DIM)
  tgt = jax.random.normal(k_t, (TGT_LEN, BSZ, HID_DIM), jnp.float32)
  src = jax.random.normal(k_s, (SRC_LEN, BSZ, HID_DIM), jnp.float32)

  fwd = jax.jit(functools.partial(transformer_decoder_layer, num_heads=N_HEADS))
  out, tgt_align, tgt_src_align = fwd(tgt, src, params)
  jax.block_until_ready((out, tgt_align, tgt_src_align))

  # Correctness check against a pure-JAX reference.
  r_out, r_a1, r_a2 = ref_decoder_layer(tgt, src, params, N_HEADS)
  assert out.shape == (TGT_LEN, BSZ, HID_DIM)
  assert tgt_align.shape == (BSZ, N_HEADS, TGT_LEN, TGT_LEN)
  assert tgt_src_align.shape == (BSZ, N_HEADS, TGT_LEN, SRC_LEN)
  assert jnp.allclose(out, r_out, atol=1e-4, rtol=1e-4)
  assert jnp.allclose(tgt_align, r_a1, atol=1e-5, rtol=1e-4)
  assert jnp.allclose(tgt_src_align, r_a2, atol=1e-5, rtol=1e-4)

  print("KERNEL_OK")
</pallas_src>

<mosaic_0001>
module attributes {stable_mosaic.version = 11 : i64} {
  func.func @_decoder_layer_kernel(%arg0: memref<2x8x32xf32, #tpu.memory_space<vmem>>, %arg1: memref<2x16x32xf32, #tpu.memory_space<vmem>>, %arg2: memref<4x32x8xf32, #tpu.memory_space<vmem>>, %arg3: memref<4x1x8xf32, #tpu.memory_space<vmem>>, %arg4: memref<4x32x8xf32, #tpu.memory_space<vmem>>, %arg5: memref<4x1x8xf32, #tpu.memory_space<vmem>>, %arg6: memref<4x32x8xf32, #tpu.memory_space<vmem>>, %arg7: memref<4x1x8xf32, #tpu.memory_space<vmem>>, %arg8: memref<4x8x32xf32, #tpu.memory_space<vmem>>, %arg9: memref<1x32xf32, #tpu.memory_space<vmem>>, %arg10: memref<4x32x8xf32, #tpu.memory_space<vmem>>, %arg11: memref<4x1x8xf32, #tpu.memory_space<vmem>>, %arg12: memref<4x32x8xf32, #tpu.memory_space<vmem>>, %arg13: memref<4x1x8xf32, #tpu.memory_space<vmem>>, %arg14: memref<4x32x8xf32, #tpu.memory_space<vmem>>, %arg15: memref<4x1x8xf32, #tpu.memory_space<vmem>>, %arg16: memref<4x8x32xf32, #tpu.memory_space<vmem>>, %arg17: memref<1x32xf32, #tpu.memory_space<vmem>>, %arg18: memref<32x64xf32, #tpu.memory_space<vmem>>, %arg19: memref<1x64xf32, #tpu.memory_space<vmem>>, %arg20: memref<64x32xf32, #tpu.memory_space<vmem>>, %arg21: memref<1x32xf32, #tpu.memory_space<vmem>>, %arg22: memref<1x32xf32, #tpu.memory_space<vmem>>, %arg23: memref<1x32xf32, #tpu.memory_space<vmem>>, %arg24: memref<1x32xf32, #tpu.memory_space<vmem>>, %arg25: memref<1x32xf32, #tpu.memory_space<vmem>>, %arg26: memref<1x32xf32, #tpu.memory_space<vmem>>, %arg27: memref<1x32xf32, #tpu.memory_space<vmem>>, %arg28: memref<2x8x32xf32, #tpu.memory_space<vmem>>, %arg29: memref<4x2x8x8xf32, #tpu.memory_space<vmem>>, %arg30: memref<4x2x8x16xf32, #tpu.memory_space<vmem>>) attributes {dimension_semantics = [], scalar_prefetch = 0 : i64, scratch_operands = 0 : i64, tpu.core_type = #tpu.core_type<tc>} {
    %c0 = arith.constant 0 : index
    %c0_0 = arith.constant 0 : index
    %c0_1 = arith.constant 0 : index
    %0 = vector.load %arg0[%c0, %c0_0, %c0_1] : memref<2x8x32xf32, #tpu.memory_space<vmem>>, vector<2x8x32xf32>
    %1 = vector.shape_cast %0 : vector<2x8x32xf32> to vector<16x32xf32>
    %c0_2 = arith.constant 0 : index
    %c0_3 = arith.constant 0 : index
    %c0_4 = arith.constant 0 : index
    %2 = vector.load %arg1[%c0_2, %c0_3, %c0_4] : memref<2x16x32xf32, #tpu.memory_space<vmem>>, vector<2x16x32xf32>
    %3 = vector.shape_cast %2 : vector<2x16x32xf32> to vector<32x32xf32>
    %c0_5 = arith.constant 0 : index
    %c0_6 = arith.constant 0 : index
    %c0_7 = arith.constant 0 : index
    %4 = vector.load %arg2[%c0_5, %c0_6, %c0_7] : memref<4x32x8xf32, #tpu.memory_space<vmem>>, vector<1x32x8xf32>
    %5 = vector.shape_cast %4 : vector<1x32x8xf32> to vector<32x8xf32>
    %cst = arith.constant dense<0.000000e+00> : vector<16x8xf32>
    %6 = tpu.matmul %1, %5, %cst {dimension_numbers = #tpu.dot_dimension_numbers<[1], [0], [0], [1], [0, 0, 1, 1], [], []>} : vector<16x32xf32>, vector<32x8xf32>, vector<16x8xf32> -> vector<16x8xf32>
    %c0_8 = arith.constant 0 : index
    %c0_9 = arith.constant 0 : index
    %c0_10 = arith.constant 0 : index
    %7 = vector.load %arg3[%c0_8, %c0_9, %c0_10] : memref<4x1x8xf32, #tpu.memory_space<vmem>>, vector<1x1x8xf32>
    %8 = vector.shape_cast %7 : vector<1x1x8xf32> to vector<1x8xf32>
    %9 = vector.broadcast %8 : vector<1x8xf32> to vector<16x8xf32>
    %10 = arith.addf %6, %9 : vector<16x8xf32>
    %11 = vector.shape_cast %10 : vector<16x8xf32> to vector<2x8x8xf32>
    %c0_11 = arith.constant 0 : index
    %c0_12 = arith.constant 0 : index
    %c0_13 = arith.constant 0 : index
    %12 = vector.load %arg4[%c0_11, %c0_12, %c0_13] : memref<4x32x8xf32, #tpu.memory_space<vmem>>, vector<1x32x8xf32>
    %13 = vector.shape_cast %12 : vector<1x32x8xf32> to vector<32x8xf32>
    %cst_14 = arith.constant dense<0.000000e+00> : vector<16x8xf32>
    %14 = tpu.matmul %1, %13, %cst_14 {dimension_numbers = #tpu.dot_dimension_numbers<[1], [0], [0], [1], [0, 0, 1, 1], [], []>} : vector<16x32xf32>, vector<32x8xf32>, vector<16x8xf32> -> vector<16x8xf32>
    %c0_15 = arith.constant 0 : index
    %c0_16 = arith.constant 0 : index
    %c0_17 = arith.constant 0 : index
    %15 = vector.load %arg5[%c0_15, %c0_16, %c0_17] : memref<4x1x8xf32, #tpu.memory_space<vmem>>, vector<1x1x8xf32>
    %16 = vector.shape_cast %15 : vector<1x1x8xf32> to vector<1x8xf32>
    %17 = vector.broadcast %16 : vector<1x8xf32> to vector<16x8xf32>
    %18 = arith.addf %14, %17 : vector<16x8xf32>
    %19 = vector.shape_cast %18 : vector<16x8xf32> to vector<2x8x8xf32>
    %c0_18 = arith.constant 0 : index
    %c0_19 = arith.constant 0 : index
    %c0_20 = arith.constant 0 : index
    %20 = vector.load %arg6[%c0_18, %c0_19, %c0_20] : memref<4x32x8xf32, #tpu.memory_space<vmem>>, vector<1x32x8xf32>
    %21 = vector.shape_cast %20 : vector<1x32x8xf32> to vector<32x8xf32>
    %cst_21 = arith.constant dense<0.000000e+00> : vector<16x8xf32>
    %22 = tpu.matmul %1, %21, %cst_21 {dimension_numbers = #tpu.dot_dimension_numbers<[1], [0], [0], [1], [0, 0, 1, 1], [], []>} : vector<16x32xf32>, vector<32x8xf32>, vector<16x8xf32> -> vector<16x8xf32>
    %c0_22 = arith.constant 0 : index
    %c0_23 = arith.constant 0 : index
    %c0_24 = arith.constant 0 : index
    %23 = vector.load %arg7[%c0_22, %c0_23, %c0_24] : memref<4x1x8xf32, #tpu.memory_space<vmem>>, vector<1x1x8xf32>
    %24 = vector.shape_cast %23 : vector<1x1x8xf32> to vector<1x8xf32>
    %25 = vector.broadcast %24 : vector<1x8xf32> to vector<16x8xf32>
    %26 = arith.addf %22, %25 : vector<16x8xf32>
    %27 = vector.shape_cast %26 : vector<16x8xf32> to vector<2x8x8xf32>
    "tpu.trace_start"() <{level = 10 : i32, message = "btd,bsd->bts"}> : () -> ()
    %cst_25 = arith.constant dense<0.000000e+00> : vector<2x8x8xf32>
    %28 = tpu.matmul %11, %19, %cst_25 {dimension_numbers = #tpu.dot_dimension_numbers<[2], [2], [1], [1], [0, 0, 0, 1, 1, 1], [0], [0]>} : vector<2x8x8xf32>, vector<2x8x8xf32>, vector<2x8x8xf32> -> vector<2x8x8xf32>
    "tpu.trace_stop"() : () -> ()
    %cst_26 = arith.constant dense<0xFF800000> : vector<2x8xf32>
    %29 = vector.multi_reduction <maximumf>, %28, %cst_26 [2] : vector<2x8x8xf32> to vector<2x8xf32>
    %30 = vector.shape_cast %29 : vector<2x8xf32> to vector<2x8x1xf32>
    %31 = vector.broadcast %30 : vector<2x8x1xf32> to vector<2x8x8xf32>
    %32 = arith.subf %28, %31 : vector<2x8x8xf32>
    %33 = math.exp %32 : vector<2x8x8xf32>
    %cst_27 = arith.constant dense<0.000000e+00> : vector<2x8xf32>
    %34 = vector.multi_reduction <add>, %33, %cst_27 [2] : vector<2x8x8xf32> to vector<2x8xf32>
    %35 = vector.shape_cast %34 : vector<2x8xf32> to vector<2x8x1xf32>
    %36 = tpu.reciprocal %35 : vector<2x8x1xf32> -> vector<2x8x1xf32>
    %37 = vector.broadcast %36 : vector<2x8x1xf32> to vector<2x8x8xf32>
    %38 = arith.mulf %33, %37 : vector<2x8x8xf32>
    %c0_28 = arith.constant 0 : index
    %c0_29 = arith.constant 0 : index
    %c0_30 = arith.constant 0 : index
    %c0_31 = arith.constant 0 : index
    %39 = vector.load %arg29[%c0_28, %c0_29, %c0_30, %c0_31] : memref<4x2x8x8xf32, #tpu.memory_space<vmem>>, vector<1x2x8x8xf32>
    %40 = vector.shape_cast %39 : vector<1x2x8x8xf32> to vector<2x8x8xf32>
    %41 = vector.shape_cast %38 : vector<2x8x8xf32> to vector<1x2x8x8xf32>
    tpu.vector_store %arg29[%c0_28, %c0_29, %c0_30, %c0_31], %41 {strides = array<i32>} : memref<4x2x8x8xf32, #tpu.memory_space<vmem>>, vector<1x2x8x8xf32>,
    "tpu.trace_start"() <{level = 10 : i32, message = "bts,bsd->btd"}> : () -> ()
    %cst_32 = arith.constant dense<0.000000e+00> : vector<2x8x8xf32>
    %42 = tpu.matmul %38, %27, %cst_32 {dimension_numbers = #tpu.dot_dimension_numbers<[2], [1], [1], [2], [0, 0, 0, 1, 1, 2], [0], [0]>} : vector<2x8x8xf32>, vector<2x8x8xf32>, vector<2x8x8xf32> -> vector<2x8x8xf32>
    "tpu.trace_stop"() : () -> ()
    %43 = vector.shape_cast %42 : vector<2x8x8xf32> to vector<16x8xf32>
    %c0_33 = arith.constant 0 : index
    %c0_34 = arith.constant 0 : index
    %c0_35 = arith.constant 0 : index
    %44 = vector.load %arg8[%c0_33, %c0_34, %c0_35] : memref<4x8x32xf32, #tpu.memory_space<vmem>>, vector<1x8x32xf32>
    %45 = vector.shape_cast %44 : vector<1x8x32xf32> to vector<8x32xf32>
    %cst_36 = arith.constant dense<0.000000e+00> : vector<16x32xf32>
    %46 = tpu.matmul %43, %45, %cst_36 {dimension_numbers = #tpu.dot_dimension_numbers<[1], [0], [0], [1], [0, 0, 1, 1], [], []>} : vector<16x8xf32>, vector<8x32xf32>, vector<16x32xf32> -> vector<16x32xf32>
    %c1 = arith.constant 1 : index
    %c0_37 = arith.constant 0 : index
    %c0_38 = arith.constant 0 : index
    %47 = vector.load %arg2[%c1, %c0_37, %c0_38] : memref<4x32x8xf32, #tpu.memory_space<vmem>>, vector<1x32x8xf32>
    %48 = vector.shape_cast %47 : vector<1x32x8xf32> to vector<32x8xf32>
    %cst_39 = arith.constant dense<0.000000e+00> : vector<16x8xf32>
    %49 = tpu.matmul %1, %48, %cst_39 {dimension_numbers = #tpu.dot_dimension_numbers<[1], [0], [0], [1], [0, 0, 1, 1], [], []>} : vector<16x32xf32>, vector<32x8xf32>, vector<16x8xf32> -> vector<16x8xf32>
    %c1_40 = arith.constant 1 : index
    %c0_41 = arith.constant 0 : index
    %c0_42 = arith.constant 0 : index
    %50 = vector.load %arg3[%c1_40, %c0_41, %c0_42] : memref<4x1x8xf32, #tpu.memory_space<vmem>>, vector<1x1x8xf32>
    %51 = vector.shape_cast %50 : vector<1x1x8xf32> to vector<1x8xf32>
    %52 = vector.broadcast %51 : vector<1x8xf32> to vector<16x8xf32>
    %53 = arith.addf %49, %52 : vector<16x8xf32>
    %54 = vector.shape_cast %53 : vector<16x8xf32> to vector<2x8x8xf32>
    %c1_43 = arith.constant 1 : index
    %c0_44 = arith.constant 0 : index
    %c0_45 = arith.constant 0 : index
    %55 = vector.load %arg4[%c1_43, %c0_44, %c0_45] : memref<4x32x8xf32, #tpu.memory_space<vmem>>, vector<1x32x8xf32>
    %56 = vector.shape_cast %55 : vector<1x32x8xf32> to vector<32x8xf32>
    %cst_46 = arith.constant dense<0.000000e+00> : vector<16x8xf32>
    %57 = tpu.matmul %1, %56, %cst_46 {dimension_numbers = #tpu.dot_dimension_numbers<[1], [0], [0], [1], [0, 0, 1, 1], [], []>} : vector<16x32xf32>, vector<32x8xf32>, vector<16x8xf32> -> vector<16x8xf32>
    %c1_47 = arith.constant 1 : index
    %c0_48 = arith.constant 0 : index
    %c0_49 = arith.constant 0 : index
    %58 = vector.load %arg5[%c1_47, %c0_48, %c0_49] : memref<4x1x8xf32, #tpu.memory_space<vmem>>, vector<1x1x8xf32>
    %59 = vector.shape_cast %58 : vector<1x1x8xf32> to vector<1x8xf32>
    %60 = vector.broadcast %59 : vector<1x8xf32> to vector<16x8xf32>
    %61 = arith.addf %57, %60 : vector<16x8xf32>
    %62 = vector.shape_cast %61 : vector<16x8xf32> to vector<2x8x8xf32>
    %c1_50 = arith.constant 1 : index
    %c0_51 = arith.constant 0 : index
    %c0_52 = arith.constant 0 : index
    %63 = vector.load %arg6[%c1_50, %c0_51, %c0_52] : memref<4x32x8xf32, #tpu.memory_space<vmem>>, vector<1x32x8xf32>
    %64 = vector.shape_cast %63 : vector<1x32x8xf32> to vector<32x8xf32>
    %cst_53 = arith.constant dense<0.000000e+00> : vector<16x8xf32>
    %65 = tpu.matmul %1, %64, %cst_53 {dimension_numbers = #tpu.dot_dimension_numbers<[1], [0], [0], [1], [0, 0, 1, 1], [], []>} : vector<16x32xf32>, vector<32x8xf32>, vector<16x8xf32> -> vector<16x8xf32>
    %c1_54 = arith.constant 1 : index
    %c0_55 = arith.constant 0 : index
    %c0_56 = arith.constant 0 : index
    %66 = vector.load %arg7[%c1_54, %c0_55, %c0_56] : memref<4x1x8xf32, #tpu.memory_space<vmem>>, vector<1x1x8xf32>
    %67 = vector.shape_cast %66 : vector<1x1x8xf32> to vector<1x8xf32>
    %68 = vector.broadcast %67 : vector<1x8xf32> to vector<16x8xf32>
    %69 = arith.addf %65, %68 : vector<16x8xf32>
    %70 = vector.shape_cast %69 : vector<16x8xf32> to vector<2x8x8xf32>
    "tpu.trace_start"() <{level = 10 : i32, message = "btd,bsd->bts"}> : () -> ()
    %cst_57 = arith.constant dense<0.000000e+00> : vector<2x8x8xf32>
    %71 = tpu.matmul %54, %62, %cst_57 {dimension_numbers = #tpu.dot_dimension_numbers<[2], [2], [1], [1], [0, 0, 0, 1, 1, 1], [0], [0]>} : vector<2x8x8xf32>, vector<2x8x8xf32>, vector<2x8x8xf32> -> vector<2x8x8xf32>
    "tpu.trace_stop"() : () -> ()
    %cst_58 = arith.constant dense<0xFF800000> : vector<2x8xf32>
    %72 = vector.multi_reduction <maximumf>, %71, %cst_58 [2] : vector<2x8x8xf32> to vector<2x8xf32>
    %73 = vector.shape_cast %72 : vector<2x8xf32> to vector<2x8x1xf32>
    %74 = vector.broadcast %73 : vector<2x8x1xf32> to vector<2x8x8xf32>
    %75 = arith.subf %71, %74 : vector<2x8x8xf32>
    %76 = math.exp %75 : vector<2x8x8xf32>
    %cst_59 = arith.constant dense<0.000000e+00> : vector<2x8xf32>
    %77 = vector.multi_reduction <add>, %76, %cst_59 [2] : vector<2x8x8xf32> to vector<2x8xf32>
    %78 = vector.shape_cast %77 : vector<2x8xf32> to vector<2x8x1xf32>
    %79 = tpu.reciprocal %78 : vector<2x8x1xf32> -> vector<2x8x1xf32>
    %80 = vector.broadcast %79 : vector<2x8x1xf32> to vector<2x8x8xf32>
    %81 = arith.mulf %76, %80 : vector<2x8x8xf32>
    %c1_60 = arith.constant 1 : index
    %c0_61 = arith.constant 0 : index
    %c0_62 = arith.constant 0 : index
    %c0_63 = arith.constant 0 : index
    %82 = vector.load %arg29[%c1_60, %c0_61, %c0_62, %c0_63] : memref<4x2x8x8xf32, #tpu.memory_space<vmem>>, vector<1x2x8x8xf32>
    %83 = vector.shape_cast %82 : vector<1x2x8x8xf32> to vector<2x8x8xf32>
    %84 = vector.shape_cast %81 : vector<2x8x8xf32> to vector<1x2x8x8xf32>
    tpu.vector_store %arg29[%c1_60, %c0_61, %c0_62, %c0_63], %84 {strides = array<i32>} : memref<4x2x8x8xf32, #tpu.memory_space<vmem>>, vector<1x2x8x8xf32>,
    "tpu.trace_start"() <{level = 10 : i32, message = "bts,bsd->btd"}> : () -> ()
    %cst_64 = arith.constant dense<0.000000e+00> : vector<2x8x8xf32>
    %85 = tpu.matmul %81, %70, %cst_64 {dimension_numbers = #tpu.dot_dimension_numbers<[2], [1], [1], [2], [0, 0, 0, 1, 1, 2], [0], [0]>} : vector<2x8x8xf32>, vector<2x8x8xf32>, vector<2x8x8xf32> -> vector<2x8x8xf32>
    "tpu.trace_stop"() : () -> ()
    %86 = vector.shape_cast %85 : vector<2x8x8xf32> to vector<16x8xf32>
    %c1_65 = arith.constant 1 : index
    %c0_66 = arith.constant 0 : index
    %c0_67 = arith.constant 0 : index
    %87 = vector.load %arg8[%c1_65, %c0_66, %c0_67] : memref<4x8x32xf32, #tpu.memory_space<vmem>>, vector<1x8x32xf32>
    %88 = vector.shape_cast %87 : vector<1x8x32xf32> to vector<8x32xf32>
    %cst_68 = arith.constant dense<0.000000e+00> : vector<16x32xf32>
    %89 = tpu.matmul %86, %88, %cst_68 {dimension_numbers = #tpu.dot_dimension_numbers<[1], [0], [0], [1], [0, 0, 1, 1], [], []>} : vector<16x8xf32>, vector<8x32xf32>, vector<16x32xf32> -> vector<16x32xf32>
    %90 = arith.addf %46, %89 : vector<16x32xf32>
    %c2 = arith.constant 2 : index
    %c0_69 = arith.constant 0 : index
    %c0_70 = arith.constant 0 : index
    %91 = vector.load %arg2[%c2, %c0_69, %c0_70] : memref<4x32x8xf32, #tpu.memory_space<vmem>>, vector<1x32x8xf32>
    %92 = vector.shape_cast %91 : vector<1x32x8xf32> to vector<32x8xf32>
    %cst_71 = arith.constant dense<0.000000e+00> : vector<16x8xf32>
    %93 = tpu.matmul %1, %92, %cst_71 {dimension_numbers = #tpu.dot_dimension_numbers<[1], [0], [0], [1], [0, 0, 1, 1], [], []>} : vector<16x32xf32>, vector<32x8xf32>, vector<16x8xf32> -> vector<16x8xf32>
    %c2_72 = arith.constant 2 : index
    %c0_73 = arith.constant 0 : index
    %c0_74 = arith.constant 0 : index
    %94 = vector.load %arg3[%c2_72, %c0_73, %c0_74] : memref<4x1x8xf32, #tpu.memory_space<vmem>>, vector<1x1x8xf32>
    %95 = vector.shape_cast %94 : vector<1x1x8xf32> to vector<1x8xf32>
    %96 = vector.broadcast %95 : vector<1x8xf32> to vector<16x8xf32>
    %97 = arith.addf %93, %96 : vector<16x8xf32>
    %98 = vector.shape_cast %97 : vector<16x8xf32> to vector<2x8x8xf32>
    %c2_75 = arith.constant 2 : index
    %c0_76 = arith.constant 0 : index
    %c0_77 = arith.constant 0 : index
    %99 = vector.load %arg4[%c2_75, %c0_76, %c0_77] : memref<4x32x8xf32, #tpu.memory_space<vmem>>, vector<1x32x8xf32>
    %100 = vector.shape_cast %99 : vector<1x32x8xf32> to vector<32x8xf32>
    %cst_78 = arith.constant dense<0.000000e+00> : vector<16x8xf32>
    %101 = tpu.matmul %1, %100, %cst_78 {dimension_numbers = #tpu.dot_dimension_numbers<[1], [0], [0], [1], [0, 0, 1, 1], [], []>} : vector<16x32xf32>, vector<32x8xf32>, vector<16x8xf32> -> vector<16x8xf32>
    %c2_79 = arith.constant 2 : index
    %c0_80 = arith.constant 0 : index
    %c0_81 = arith.constant 0 : index
    %102 = vector.load %arg5[%c2_79, %c0_80, %c0_81] : memref<4x1x8xf32, #tpu.memory_space<vmem>>, vector<1x1x8xf32>
    %103 = vector.shape_cast %102 : vector<1x1x8xf32> to vector<1x8xf32>
    %104 = vector.broadcast %103 : vector<1x8xf32> to vector<16x8xf32>
    %105 = arith.addf %101, %104 : vector<16x8xf32>
    %106 = vector.shape_cast %105 : vector<16x8xf32> to vector<2x8x8xf32>
    %c2_82 = arith.constant 2 : index
    %c0_83 = arith.constant 0 : index
    %c0_84 = arith.constant 0 : index
    %107 = vector.load %arg6[%c2_82, %c0_83, %c0_84] : memref<4x32x8xf32, #tpu.memory_space<vmem>>, vector<1x32x8xf32>
    %108 = vector.shape_cast %107 : vector<1x32x8xf32> to vector<32x8xf32>
    %cst_85 = arith.constant dense<0.000000e+00> : vector<16x8xf32>
    %109 = tpu.matmul %1, %108, %cst_85 {dimension_numbers = #tpu.dot_dimension_numbers<[1], [0], [0], [1], [0, 0, 1, 1], [], []>} : vector<16x32xf32>, vector<32x8xf32>, vector<16x8xf32> -> vector<16x8xf32>
    %c2_86 = arith.constant 2 : index
    %c0_87 = arith.constant 0 : index
    %c0_88 = arith.constant 0 : index
    %110 = vector.load %arg7[%c2_86, %c0_87, %c0_88] : memref<4x1x8xf32, #tpu.memory_space<vmem>>, vector<1x1x8xf32>
    %111 = vector.shape_cast %110 : vector<1x1x8xf32> to vector<1x8xf32>
    %112 = vector.broadcast %111 : vector<1x8xf32> to vector<16x8xf32>
    %113 = arith.addf %109, %112 : vector<16x8xf32>
    %114 = vector.shape_cast %113 : vector<16x8xf32> to vector<2x8x8xf32>
    "tpu.trace_start"() <{level = 10 : i32, message = "btd,bsd->bts"}> : () -> ()
    %cst_89 = arith.constant dense<0.000000e+00> : vector<2x8x8xf32>
    %115 = tpu.matmul %98, %106, %cst_89 {dimension_numbers = #tpu.dot_dimension_numbers<[2], [2], [1], [1], [0, 0, 0, 1, 1, 1], [0], [0]>} : vector<2x8x8xf32>, vector<2x8x8xf32>, vector<2x8x8xf32> -> vector<2x8x8xf32>
    "tpu.trace_stop"() : () -> ()
    %cst_90 = arith.constant dense<0xFF800000> : vector<2x8xf32>
    %116 = vector.multi_reduction <maximumf>, %115, %cst_90 [2] : vector<2x8x8xf32> to vector<2x8xf32>
    %117 = vector.shape_cast %116 : vector<2x8xf32> to vector<2x8x1xf32>
    %118 = vector.broadcast %117 : vector<2x8x1xf32> to vector<2x8x8xf32>
    %119 = arith.subf %115, %118 : vector<2x8x8xf32>
    %120 = math.exp %119 : vector<2x8x8xf32>
    %cst_91 = arith.constant dense<0.000000e+00> : vector<2x8xf32>
    %121 = vector.multi_reduction <add>, %120, %cst_91 [2] : vector<2x8x8xf32> to vector<2x8xf32>
    %122 = vector.shape_cast %121 : vector<2x8xf32> to vector<2x8x1xf32>
    %123 = tpu.reciprocal %122 : vector<2x8x1xf32> -> vector<2x8x1xf32>
    %124 = vector.broadcast %123 : vector<2x8x1xf32> to vector<2x8x8xf32>
    %125 = arith.mulf %120, %124 : vector<2x8x8xf32>
    %c2_92 = arith.constant 2 : index
    %c0_93 = arith.constant 0 : index
    %c0_94 = arith.constant 0 : index
    %c0_95 = arith.constant 0 : index
    %126 = vector.load %arg29[%c2_92, %c0_93, %c0_94, %c0_95] : memref<4x2x8x8xf32, #tpu.memory_space<vmem>>, vector<1x2x8x8xf32>
    %127 = vector.shape_cast %126 : vector<1x2x8x8xf32> to vector<2x8x8xf32>
    %128 = vector.shape_cast %125 : vector<2x8x8xf32> to vector<1x2x8x8xf32>
    tpu.vector_store %arg29[%c2_92, %c0_93, %c0_94, %c0_95], %128 {strides = array<i32>} : memref<4x2x8x8xf32, #tpu.memory_space<vmem>>, vector<1x2x8x8xf32>,
    "tpu.trace_start"() <{level = 10 : i32, message = "bts,bsd->btd"}> : () -> ()
    %cst_96 = arith.constant dense<0.000000e+00> : vector<2x8x8xf32>
    %129 = tpu.matmul %125, %114, %cst_96 {dimension_numbers = #tpu.dot_dimension_numbers<[2], [1], [1], [2], [0, 0, 0, 1, 1, 2], [0], [0]>} : vector<2x8x8xf32>, vector<2x8x8xf32>, vector<2x8x8xf32> -> vector<2x8x8xf32>
    "tpu.trace_stop"() : () -> ()
    %130 = vector.shape_cast %129 : vector<2x8x8xf32> to vector<16x8xf32>
    %c2_97 = arith.constant 2 : index
    %c0_98 = arith.constant 0 : index
    %c0_99 = arith.constant 0 : index
    %131 = vector.load %arg8[%c2_97, %c0_98, %c0_99] : memref<4x8x32xf32, #tpu.memory_space<vmem>>, vector<1x8x32xf32>
    %132 = vector.shape_cast %131 : vector<1x8x32xf32> to vector<8x32xf32>
    %cst_100 = arith.constant dense<0.000000e+00> : vector<16x32xf32>
    %133 = tpu.matmul %130, %132, %cst_100 {dimension_numbers = #tpu.dot_dimension_numbers<[1], [0], [0], [1], [0, 0, 1, 1], [], []>} : vector<16x8xf32>, vector<8x32xf32>, vector<16x32xf32> -> vector<16x32xf32>
    %134 = arith.addf %90, %133 : vector<16x32xf32>
    %c3 = arith.constant 3 : index
    %c0_101 = arith.constant 0 : index
    %c0_102 = arith.constant 0 : index
    %135 = vector.load %arg2[%c3, %c0_101, %c0_102] : memref<4x32x8xf32, #tpu.memory_space<vmem>>, vector<1x32x8xf32>
    %136 = vector.shape_cast %135 : vector<1x32x8xf32> to vector<32x8xf32>
    %cst_103 = arith.constant dense<0.000000e+00> : vector<16x8xf32>
    %137 = tpu.matmul %1, %136, %cst_103 {dimension_numbers = #tpu.dot_dimension_numbers<[1], [0], [0], [1], [0, 0, 1, 1], [], []>} : vector<16x32xf32>, vector<32x8xf32>, vector<16x8xf32> -> vector<16x8xf32>
    %c3_104 = arith.constant 3 : index
    %c0_105 = arith.constant 0 : index
    %c0_106 = arith.constant 0 : index
    %138 = vector.load %arg3[%c3_104, %c0_105, %c0_106] : memref<4x1x8xf32, #tpu.memory_space<vmem>>, vector<1x1x8xf32>
    %139 = vector.shape_cast %138 : vector<1x1x8xf32> to vector<1x8xf32>
    %140 = vector.broadcast %139 : vector<1x8xf32> to vector<16x8xf32>
    %141 = arith.addf %137, %140 : vector<16x8xf32>
    %142 = vector.shape_cast %141 : vector<16x8xf32> to vector<2x8x8xf32>
    %c3_107 = arith.constant 3 : index
    %c0_108 = arith.constant 0 : index
    %c0_109 = arith.constant 0 : index
    %143 = vector.load %arg4[%c3_107, %c0_108, %c0_109] : memref<4x32x8xf32, #tpu.memory_space<vmem>>, vector<1x32x8xf32>
    %144 = vector.shape_cast %143 : vector<1x32x8xf32> to vector<32x8xf32>
    %cst_110 = arith.constant dense<0.000000e+00> : vector<16x8xf32>
    %145 = tpu.matmul %1, %144, %cst_110 {dimension_numbers = #tpu.dot_dimension_numbers<[1], [0], [0], [1], [0, 0, 1, 1], [], []>} : vector<16x32xf32>, vector<32x8xf32>, vector<16x8xf32> -> vector<16x8xf32>
    %c3_111 = arith.constant 3 : index
    %c0_112 = arith.constant 0 : index
    %c0_113 = arith.constant 0 : index
    %146 = vector.load %arg5[%c3_111, %c0_112, %c0_113] : memref<4x1x8xf32, #tpu.memory_space<vmem>>, vector<1x1x8xf32>
    %147 = vector.shape_cast %146 : vector<1x1x8xf32> to vector<1x8xf32>
    %148 = vector.broadcast %147 : vector<1x8xf32> to vector<16x8xf32>
    %149 = arith.addf %145, %148 : vector<16x8xf32>
    %150 = vector.shape_cast %149 : vector<16x8xf32> to vector<2x8x8xf32>
    %c3_114 = arith.constant 3 : index
    %c0_115 = arith.constant 0 : index
    %c0_116 = arith.constant 0 : index
    %151 = vector.load %arg6[%c3_114, %c0_115, %c0_116] : memref<4x32x8xf32, #tpu.memory_space<vmem>>, vector<1x32x8xf32>
    %152 = vector.shape_cast %151 : vector<1x32x8xf32> to vector<32x8xf32>
    %cst_117 = arith.constant dense<0.000000e+00> : vector<16x8xf32>
    %153 = tpu.matmul %1, %152, %cst_117 {dimension_numbers = #tpu.dot_dimension_numbers<[1], [0], [0], [1], [0, 0, 1, 1], [], []>} : vector<16x32xf32>, vector<32x8xf32>, vector<16x8xf32> -> vector<16x8xf32>
    %c3_118 = arith.constant 3 : index
    %c0_119 = arith.constant 0 : index
    %c0_120 = arith.constant 0 : index
    %154 = vector.load %arg7[%c3_118, %c0_119, %c0_120] : memref<4x1x8xf32, #tpu.memory_space<vmem>>, vector<1x1x8xf32>
    %155 = vector.shape_cast %154 : vector<1x1x8xf32> to vector<1x8xf32>
    %156 = vector.broadcast %155 : vector<1x8xf32> to vector<16x8xf32>
    %157 = arith.addf %153, %156 : vector<16x8xf32>
    %158 = vector.shape_cast %157 : vector<16x8xf32> to vector<2x8x8xf32>
    "tpu.trace_start"() <{level = 10 : i32, message = "btd,bsd->bts"}> : () -> ()
    %cst_121 = arith.constant dense<0.000000e+00> : vector<2x8x8xf32>
    %159 = tpu.matmul %142, %150, %cst_121 {dimension_numbers = #tpu.dot_dimension_numbers<[2], [2], [1], [1], [0, 0, 0, 1, 1, 1], [0], [0]>} : vector<2x8x8xf32>, vector<2x8x8xf32>, vector<2x8x8xf32> -> vector<2x8x8xf32>
    "tpu.trace_stop"() : () -> ()
    %cst_122 = arith.constant dense<0xFF800000> : vector<2x8xf32>
    %160 = vector.multi_reduction <maximumf>, %159, %cst_122 [2] : vector<2x8x8xf32> to vector<2x8xf32>
    %161 = vector.shape_cast %160 : vector<2x8xf32> to vector<2x8x1xf32>
    %162 = vector.broadcast %161 : vector<2x8x1xf32> to vector<2x8x8xf32>
    %163 = arith.subf %159, %162 : vector<2x8x8xf32>
    %164 = math.exp %163 : vector<2x8x8xf32>
    %cst_123 = arith.constant dense<0.000000e+00> : vector<2x8xf32>
    %165 = vector.multi_reduction <add>, %164, %cst_123 [2] : vector<2x8x8xf32> to vector<2x8xf32>
    %166 = vector.shape_cast %165 : vector<2x8xf32> to vector<2x8x1xf32>
    %167 = tpu.reciprocal %166 : vector<2x8x1xf32> -> vector<2x8x1xf32>
    %168 = vector.broadcast %167 : vector<2x8x1xf32> to vector<2x8x8xf32>
    %169 = arith.mulf %164, %168 : vector<2x8x8xf32>
    %c3_124 = arith.constant 3 : index
    %c0_125 = arith.constant 0 : index
    %c0_126 = arith.constant 0 : index
    %c0_127 = arith.constant 0 : index
    %170 = vector.load %arg29[%c3_124, %c0_125, %c0_126, %c0_127] : memref<4x2x8x8xf32, #tpu.memory_space<vmem>>, vector<1x2x8x8xf32>
    %171 = vector.shape_cast %170 : vector<1x2x8x8xf32> to vector<2x8x8xf32>
    %172 = vector.shape_cast %169 : vector<2x8x8xf32> to vector<1x2x8x8xf32>
    tpu.vector_store %arg29[%c3_124, %c0_125, %c0_126, %c0_127], %172 {strides = array<i32>} : memref<4x2x8x8xf32, #tpu.memory_space<vmem>>, vector<1x2x8x8xf32>,
    "tpu.trace_start"() <{level = 10 : i32, message = "bts,bsd->btd"}> : () -> ()
    %cst_128 = arith.constant dense<0.000000e+00> : vector<2x8x8xf32>
    %173 = tpu.matmul %169, %158, %cst_128 {dimension_numbers = #tpu.dot_dimension_numbers<[2], [1], [1], [2], [0, 0, 0, 1, 1, 2], [0], [0]>} : vector<2x8x8xf32>, vector<2x8x8xf32>, vector<2x8x8xf32> -> vector<2x8x8xf32>
    "tpu.trace_stop"() : () -> ()
    %174 = vector.shape_cast %173 : vector<2x8x8xf32> to vector<16x8xf32>
    %c3_129 = arith.constant 3 : index
    %c0_130 = arith.constant 0 : index
    %c0_131 = arith.constant 0 : index
    %175 = vector.load %arg8[%c3_129, %c0_130, %c0_131] : memref<4x8x32xf32, #tpu.memory_space<vmem>>, vector<1x8x32xf32>
    %176 = vector.shape_cast %175 : vector<1x8x32xf32> to vector<8x32xf32>
    %cst_132 = arith.constant dense<0.000000e+00> : vector<16x32xf32>
    %177 = tpu.matmul %174, %176, %cst_132 {dimension_numbers = #tpu.dot_dimension_numbers<[1], [0], [0], [1], [0, 0, 1, 1], [], []>} : vector<16x8xf32>, vector<8x32xf32>, vector<16x32xf32> -> vector<16x32xf32>
    %178 = arith.addf %134, %177 : vector<16x32xf32>
    %c0_133 = arith.constant 0 : index
    %c0_134 = arith.constant 0 : index
    %179 = vector.load %arg9[%c0_133, %c0_134] : memref<1x32xf32, #tpu.memory_space<vmem>>, vector<1x32xf32>
    %180 = vector.broadcast %179 : vector<1x32xf32> to vector<16x32xf32>
    %181 = arith.addf %178, %180 : vector<16x32xf32>
    %182 = arith.addf %1, %181 : vector<16x32xf32>
    %c0_135 = arith.constant 0 : index
    %c0_136 = arith.constant 0 : index
    %183 = vector.load %arg22[%c0_135, %c0_136] : memref<1x32xf32, #tpu.memory_space<vmem>>, vector<1x32xf32>
    %c0_137 = arith.constant 0 : index
    %c0_138 = arith.constant 0 : index
    %184 = vector.load %arg23[%c0_137, %c0_138] : memref<1x32xf32, #tpu.memory_space<vmem>>, vector<1x32xf32>
    %cst_139 = arith.constant dense<0.000000e+00> : vector<16xf32>
    %185 = vector.multi_reduction <add>, %182, %cst_139 [1] : vector<16x32xf32> to vector<16xf32>
    %186 = vector.shape_cast %185 : vector<16xf32> to vector<16x1xf32>
    %cst_140 = arith.constant 3.200000e+01 : f32
    %187 = vector.broadcast %cst_140 : f32 to vector<16x1xf32>
    %188 = arith.divf %186, %187 : vector<16x1xf32>
    %189 = vector.broadcast %188 : vector<16x1xf32> to vector<16x32xf32>
    %190 = arith.subf %182, %189 : vector<16x32xf32>
    %191 = arith.mulf %190, %190 : vector<16x32xf32>
    %cst_141 = arith.constant dense<0.000000e+00> : vector<16xf32>
    %192 = vector.multi_reduction <add>, %191, %cst_141 [1] : vector<16x32xf32> to vector<16xf32>
    %193 = vector.shape_cast %192 : vector<16xf32> to vector<16x1xf32>
    %cst_142 = arith.constant 3.200000e+01 : f32
    %194 = vector.broadcast %cst_142 : f32 to vector<16x1xf32>
    %195 = arith.divf %193, %194 : vector<16x1xf32>
    %cst_143 = arith.constant 9.99999974E-6 : f32
    %196 = vector.broadcast %cst_143 : f32 to vector<16x1xf32>
    %197 = arith.addf %195, %196 : vector<16x1xf32>
    %198 = math.rsqrt %197 : vector<16x1xf32>
    %199 = vector.broadcast %198 : vector<16x1xf32> to vector<16x32xf32>
    %200 = arith.mulf %190, %199 : vector<16x32xf32>
    %201 = vector.broadcast %183 : vector<1x32xf32> to vector<16x32xf32>
    %202 = arith.mulf %200, %201 : vector<16x32xf32>
    %203 = vector.broadcast %184 : vector<1x32xf32> to vector<16x32xf32>
    %204 = arith.addf %202, %203 : vector<16x32xf32>
    %c0_144 = arith.constant 0 : index
    %c0_145 = arith.constant 0 : index
    %c0_146 = arith.constant 0 : index
    %205 = vector.load %arg10[%c0_144, %c0_145, %c0_146] : memref<4x32x8xf32, #tpu.memory_space<vmem>>, vector<1x32x8xf32>
    %206 = vector.shape_cast %205 : vector<1x32x8xf32> to vector<32x8xf32>
    %cst_147 = arith.constant dense<0.000000e+00> : vector<16x8xf32>
    %207 = tpu.matmul %204, %206, %cst_147 {dimension_numbers = #tpu.dot_dimension_numbers<[1], [0], [0], [1], [0, 0, 1, 1], [], []>} : vector<16x32xf32>, vector<32x8xf32>, vector<16x8xf32> -> vector<16x8xf32>
    %c0_148 = arith.constant 0 : index
    %c0_149 = arith.constant 0 : index
    %c0_150 = arith.constant 0 : index
    %208 = vector.load %arg11[%c0_148, %c0_149, %c0_150] : memref<4x1x8xf32, #tpu.memory_space<vmem>>, vector<1x1x8xf32>
    %209 = vector.shape_cast %208 : vector<1x1x8xf32> to vector<1x8xf32>
    %210 = vector.broadcast %209 : vector<1x8xf32> to vector<16x8xf32>
    %211 = arith.addf %207, %210 : vector<16x8xf32>
    %212 = vector.shape_cast %211 : vector<16x8xf32> to vector<2x8x8xf32>
    %c0_151 = arith.constant 0 : index
    %c0_152 = arith.constant 0 : index
    %c0_153 = arith.constant 0 : index
    %213 = vector.load %arg12[%c0_151, %c0_152, %c0_153] : memref<4x32x8xf32, #tpu.memory_space<vmem>>, vector<1x32x8xf32>
    %214 = vector.shape_cast %213 : vector<1x32x8xf32> to vector<32x8xf32>
    %cst_154 = arith.constant dense<0.000000e+00> : vector<32x8xf32>
    %215 = tpu.matmul %3, %214, %cst_154 {dimension_numbers = #tpu.dot_dimension_numbers<[1], [0], [0], [1], [0, 0, 1, 1], [], []>} : vector<32x32xf32>, vector<32x8xf32>, vector<32x8xf32> -> vector<32x8xf32>
    %c0_155 = arith.constant 0 : index
    %c0_156 = arith.constant 0 : index
    %c0_157 = arith.constant 0 : index
    %216 = vector.load %arg13[%c0_155, %c0_156, %c0_157] : memref<4x1x8xf32, #tpu.memory_space<vmem>>, vector<1x1x8xf32>
    %217 = vector.shape_cast %216 : vector<1x1x8xf32> to vector<1x8xf32>
    %218 = vector.broadcast %217 : vector<1x8xf32> to vector<32x8xf32>
    %219 = arith.addf %215, %218 : vector<32x8xf32>
    %220 = vector.shape_cast %219 : vector<32x8xf32> to vector<2x16x8xf32>
    %c0_158 = arith.constant 0 : index
    %c0_159 = arith.constant 0 : index
    %c0_160 = arith.constant 0 : index
    %221 = vector.load %arg14[%c0_158, %c0_159, %c0_160] : memref<4x32x8xf32, #tpu.memory_space<vmem>>, vector<1x32x8xf32>
    %222 = vector.shape_cast %221 : vector<1x32x8xf32> to vector<32x8xf32>
    %cst_161 = arith.constant dense<0.000000e+00> : vector<32x8xf32>
    %223 = tpu.matmul %3, %222, %cst_161 {dimension_numbers = #tpu.dot_dimension_numbers<[1], [0], [0], [1], [0, 0, 1, 1], [], []>} : vector<32x32xf32>, vector<32x8xf32>, vector<32x8xf32> -> vector<32x8xf32>
    %c0_162 = arith.constant 0 : index
    %c0_163 = arith.constant 0 : index
    %c0_164 = arith.constant 0 : index
    %224 = vector.load %arg15[%c0_162, %c0_163, %c0_164] : memref<4x1x8xf32, #tpu.memory_space<vmem>>, vector<1x1x8xf32>
    %225 = vector.shape_cast %224 : vector<1x1x8xf32> to vector<1x8xf32>
    %226 = vector.broadcast %225 : vector<1x8xf32> to vector<32x8xf32>
    %227 = arith.addf %223, %226 : vector<32x8xf32>
    %228 = vector.shape_cast %227 : vector<32x8xf32> to vector<2x16x8xf32>
    "tpu.trace_start"() <{level = 10 : i32, message = "btd,bsd->bts"}> : () -> ()
    %cst_165 = arith.constant dense<0.000000e+00> : vector<2x8x16xf32>
    %229 = tpu.matmul %212, %220, %cst_165 {dimension_numbers = #tpu.dot_dimension_numbers<[2], [2], [1], [1], [0, 0, 0, 1, 1, 1], [0], [0]>} : vector<2x8x8xf32>, vector<2x16x8xf32>, vector<2x8x16xf32> -> vector<2x8x16xf32>
    "tpu.trace_stop"() : () -> ()
    %cst_166 = arith.constant dense<0xFF800000> : vector<2x8xf32>
    %230 = vector.multi_reduction <maximumf>, %229, %cst_166 [2] : vector<2x8x16xf32> to vector<2x8xf32>
    %231 = vector.shape_cast %230 : vector<2x8xf32> to vector<2x8x1xf32>
    %232 = vector.broadcast %231 : vector<2x8x1xf32> to vector<2x8x16xf32>
    %233 = arith.subf %229, %232 : vector<2x8x16xf32>
    %234 = math.exp %233 : vector<2x8x16xf32>
    %cst_167 = arith.constant dense<0.000000e+00> : vector<2x8xf32>
    %235 = vector.multi_reduction <add>, %234, %cst_167 [2] : vector<2x8x16xf32> to vector<2x8xf32>
    %236 = vector.shape_cast %235 : vector<2x8xf32> to vector<2x8x1xf32>
    %237 = tpu.reciprocal %236 : vector<2x8x1xf32> -> vector<2x8x1xf32>
    %238 = vector.broadcast %237 : vector<2x8x1xf32> to vector<2x8x16xf32>
    %239 = arith.mulf %234, %238 : vector<2x8x16xf32>
    %c0_168 = arith.constant 0 : index
    %c0_169 = arith.constant 0 : index
    %c0_170 = arith.constant 0 : index
    %c0_171 = arith.constant 0 : index
    %240 = vector.load %arg30[%c0_168, %c0_169, %c0_170, %c0_171] : memref<4x2x8x16xf32, #tpu.memory_space<vmem>>, vector<1x2x8x16xf32>
    %241 = vector.shape_cast %240 : vector<1x2x8x16xf32> to vector<2x8x16xf32>
    %242 = vector.shape_cast %239 : vector<2x8x16xf32> to vector<1x2x8x16xf32>
    tpu.vector_store %arg30[%c0_168, %c0_169, %c0_170, %c0_171], %242 {strides = array<i32>} : memref<4x2x8x16xf32, #tpu.memory_space<vmem>>, vector<1x2x8x16xf32>,
    "tpu.trace_start"() <{level = 10 : i32, message = "bts,bsd->btd"}> : () -> ()
    %cst_172 = arith.constant dense<0.000000e+00> : vector<2x8x8xf32>
    %243 = tpu.matmul %239, %228, %cst_172 {dimension_numbers = #tpu.dot_dimension_numbers<[2], [1], [1], [2], [0, 0, 0, 1, 1, 2], [0], [0]>} : vector<2x8x16xf32>, vector<2x16x8xf32>, vector<2x8x8xf32> -> vector<2x8x8xf32>
    "tpu.trace_stop"() : () -> ()
    %244 = vector.shape_cast %243 : vector<2x8x8xf32> to vector<16x8xf32>
    %c0_173 = arith.constant 0 : index
    %c0_174 = arith.constant 0 : index
    %c0_175 = arith.constant 0 : index
    %245 = vector.load %arg16[%c0_173, %c0_174, %c0_175] : memref<4x8x32xf32, #tpu.memory_space<vmem>>, vector<1x8x32xf32>
    %246 = vector.shape_cast %245 : vector<1x8x32xf32> to vector<8x32xf32>
    %cst_176 = arith.constant dense<0.000000e+00> : vector<16x32xf32>
    %247 = tpu.matmul %244, %246, %cst_176 {dimension_numbers = #tpu.dot_dimension_numbers<[1], [0], [0], [1], [0, 0, 1, 1], [], []>} : vector<16x8xf32>, vector<8x32xf32>, vector<16x32xf32> -> vector<16x32xf32>
    %c1_177 = arith.constant 1 : index
    %c0_178 = arith.constant 0 : index
    %c0_179 = arith.constant 0 : index
    %248 = vector.load %arg10[%c1_177, %c0_178, %c0_179] : memref<4x32x8xf32, #tpu.memory_space<vmem>>, vector<1x32x8xf32>
    %249 = vector.shape_cast %248 : vector<1x32x8xf32> to vector<32x8xf32>
    %cst_180 = arith.constant dense<0.000000e+00> : vector<16x8xf32>
    %250 = tpu.matmul %204, %249, %cst_180 {dimension_numbers = #tpu.dot_dimension_numbers<[1], [0], [0], [1], [0, 0, 1, 1], [], []>} : vector<16x32xf32>, vector<32x8xf32>, vector<16x8xf32> -> vector<16x8xf32>
    %c1_181 = arith.constant 1 : index
    %c0_182 = arith.constant 0 : index
    %c0_183 = arith.constant 0 : index
    %251 = vector.load %arg11[%c1_181, %c0_182, %c0_183] : memref<4x1x8xf32, #tpu.memory_space<vmem>>, vector<1x1x8xf32>
    %252 = vector.shape_cast %251 : vector<1x1x8xf32> to vector<1x8xf32>
    %253 = vector.broadcast %252 : vector<1x8xf32> to vector<16x8xf32>
    %254 = arith.addf %250, %253 : vector<16x8xf32>
    %255 = vector.shape_cast %254 : vector<16x8xf32> to vector<2x8x8xf32>
    %c1_184 = arith.constant 1 : index
    %c0_185 = arith.constant 0 : index
    %c0_186 = arith.constant 0 : index
    %256 = vector.load %arg12[%c1_184, %c0_185, %c0_186] : memref<4x32x8xf32, #tpu.memory_space<vmem>>, vector<1x32x8xf32>
    %257 = vector.shape_cast %256 : vector<1x32x8xf32> to vector<32x8xf32>
    %cst_187 = arith.constant dense<0.000000e+00> : vector<32x8xf32>
    %258 = tpu.matmul %3, %257, %cst_187 {dimension_numbers = #tpu.dot_dimension_numbers<[1], [0], [0], [1], [0, 0, 1, 1], [], []>} : vector<32x32xf32>, vector<32x8xf32>, vector<32x8xf32> -> vector<32x8xf32>
    %c1_188 = arith.constant 1 : index
    %c0_189 = arith.constant 0 : index
    %c0_190 = arith.constant 0 : index
    %259 = vector.load %arg13[%c1_188, %c0_189, %c0_190] : memref<4x1x8xf32, #tpu.memory_space<vmem>>, vector<1x1x8xf32>
    %260 = vector.shape_cast %259 : vector<1x1x8xf32> to vector<1x8xf32>
    %261 = vector.broadcast %260 : vector<1x8xf32> to vector<32x8xf32>
    %262 = arith.addf %258, %261 : vector<32x8xf32>
    %263 = vector.shape_cast %262 : vector<32x8xf32> to vector<2x16x8xf32>
    %c1_191 = arith.constant 1 : index
    %c0_192 = arith.constant 0 : index
    %c0_193 = arith.constant 0 : index
    %264 = vector.load %arg14[%c1_191, %c0_192, %c0_193] : memref<4x32x8xf32, #tpu.memory_space<vmem>>, vector<1x32x8xf32>
    %265 = vector.shape_cast %264 : vector<1x32x8xf32> to vector<32x8xf32>
    %cst_194 = arith.constant dense<0.000000e+00> : vector<32x8xf32>
    %266 = tpu.matmul %3, %265, %cst_194 {dimension_numbers = #tpu.dot_dimension_numbers<[1], [0], [0], [1], [0, 0, 1, 1], [], []>} : vector<32x32xf32>, vector<32x8xf32>, vector<32x8xf32> -> vector<32x8xf32>
    %c1_195 = arith.constant 1 : index
    %c0_196 = arith.constant 0 : index
    %c0_197 = arith.constant 0 : index
    %267 = vector.load %arg15[%c1_195, %c0_196, %c0_197] : memref<4x1x8xf32, #tpu.memory_space<vmem>>, vector<1x1x8xf32>
    %268 = vector.shape_cast %267 : vector<1x1x8xf32> to vector<1x8xf32>
    %269 = vector.broadcast %268 : vector<1x8xf32> to vector<32x8xf32>
    %270 = arith.addf %266, %269 : vector<32x8xf32>
    %271 = vector.shape_cast %270 : vector<32x8xf32> to vector<2x16x8xf32>
    "tpu.trace_start"() <{level = 10 : i32, message = "btd,bsd->bts"}> : () -> ()
    %cst_198 = arith.constant dense<0.000000e+00> : vector<2x8x16xf32>
    %272 = tpu.matmul %255, %263, %cst_198 {dimension_numbers = #tpu.dot_dimension_numbers<[2], [2], [1], [1], [0, 0, 0, 1, 1, 1], [0], [0]>} : vector<2x8x8xf32>, vector<2x16x8xf32>, vector<2x8x16xf32> -> vector<2x8x16xf32>
    "tpu.trace_stop"() : () -> ()
    %cst_199 = arith.constant dense<0xFF800000> : vector<2x8xf32>
    %273 = vector.multi_reduction <maximumf>, %272, %cst_199 [2] : vector<2x8x16xf32> to vector<2x8xf32>
    %274 = vector.shape_cast %273 : vector<2x8xf32> to vector<2x8x1xf32>
    %275 = vector.broadcast %274 : vector<2x8x1xf32> to vector<2x8x16xf32>
    %276 = arith.subf %272, %275 : vector<2x8x16xf32>
    %277 = math.exp %276 : vector<2x8x16xf32>
    %cst_200 = arith.constant dense<0.000000e+00> : vector<2x8xf32>
    %278 = vector.multi_reduction <add>, %277, %cst_200 [2] : vector<2x8x16xf32> to vector<2x8xf32>
    %279 = vector.shape_cast %278 : vector<2x8xf32> to vector<2x8x1xf32>
    %280 = tpu.reciprocal %279 : vector<2x8x1xf32> -> vector<2x8x1xf32>
    %281 = vector.broadcast %280 : vector<2x8x1xf32> to vector<2x8x16xf32>
    %282 = arith.mulf %277, %281 : vector<2x8x16xf32>
    %c1_201 = arith.constant 1 : index
    %c0_202 = arith.constant 0 : index
    %c0_203 = arith.constant 0 : index
    %c0_204 = arith.constant 0 : index
    %283 = vector.load %arg30[%c1_201, %c0_202, %c0_203, %c0_204] : memref<4x2x8x16xf32, #tpu.memory_space<vmem>>, vector<1x2x8x16xf32>
    %284 = vector.shape_cast %283 : vector<1x2x8x16xf32> to vector<2x8x16xf32>
    %285 = vector.shape_cast %282 : vector<2x8x16xf32> to vector<1x2x8x16xf32>
    tpu.vector_store %arg30[%c1_201, %c0_202, %c0_203, %c0_204], %285 {strides = array<i32>} : memref<4x2x8x16xf32, #tpu.memory_space<vmem>>, vector<1x2x8x16xf32>,
    "tpu.trace_start"() <{level = 10 : i32, message = "bts,bsd->btd"}> : () -> ()
    %cst_205 = arith.constant dense<0.000000e+00> : vector<2x8x8xf32>
    %286 = tpu.matmul %282, %271, %cst_205 {dimension_numbers = #tpu.dot_dimension_numbers<[2], [1], [1], [2], [0, 0, 0, 1, 1, 2], [0], [0]>} : vector<2x8x16xf32>, vector<2x16x8xf32>, vector<2x8x8xf32> -> vector<2x8x8xf32>
    "tpu.trace_stop"() : () -> ()
    %287 = vector.shape_cast %286 : vector<2x8x8xf32> to vector<16x8xf32>
    %c1_206 = arith.constant 1 : index
    %c0_207 = arith.constant 0 : index
    %c0_208 = arith.constant 0 : index
    %288 = vector.load %arg16[%c1_206, %c0_207, %c0_208] : memref<4x8x32xf32, #tpu.memory_space<vmem>>, vector<1x8x32xf32>
    %289 = vector.shape_cast %288 : vector<1x8x32xf32> to vector<8x32xf32>
    %cst_209 = arith.constant dense<0.000000e+00> : vector<16x32xf32>
    %290 = tpu.matmul %287, %289, %cst_209 {dimension_numbers = #tpu.dot_dimension_numbers<[1], [0], [0], [1], [0, 0, 1, 1], [], []>} : vector<16x8xf32>, vector<8x32xf32>, vector<16x32xf32> -> vector<16x32xf32>
    %291 = arith.addf %247, %290 : vector<16x32xf32>
    %c2_210 = arith.constant 2 : index
    %c0_211 = arith.constant 0 : index
    %c0_212 = arith.constant 0 : index
    %292 = vector.load %arg10[%c2_210, %c0_211, %c0_212] : memref<4x32x8xf32, #tpu.memory_space<vmem>>, vector<1x32x8xf32>
    %293 = vector.shape_cast %292 : vector<1x32x8xf32> to vector<32x8xf32>
    %cst_213 = arith.constant dense<0.000000e+00> : vector<16x8xf32>
    %294 = tpu.matmul %204, %293, %cst_213 {dimension_numbers = #tpu.dot_dimension_numbers<[1], [0], [0], [1], [0, 0, 1, 1], [], []>} : vector<16x32xf32>, vector<32x8xf32>, vector<16x8xf32> -> vector<16x8xf32>
    %c2_214 = arith.constant 2 : index
    %c0_215 = arith.constant 0 : index
    %c0_216 = arith.constant 0 : index
    %295 = vector.load %arg11[%c2_214, %c0_215, %c0_216] : memref<4x1x8xf32, #tpu.memory_space<vmem>>, vector<1x1x8xf32>
    %296 = vector.shape_cast %295 : vector<1x1x8xf32> to vector<1x8xf32>
    %297 = vector.broadcast %296 : vector<1x8xf32> to vector<16x8xf32>
    %298 = arith.addf %294, %297 : vector<16x8xf32>
    %299 = vector.shape_cast %298 : vector<16x8xf32> to vector<2x8x8xf32>
    %c2_217 = arith.constant 2 : index
    %c0_218 = arith.constant 0 : index
    %c0_219 = arith.constant 0 : index
    %300 = vector.load %arg12[%c2_217, %c0_218, %c0_219] : memref<4x32x8xf32, #tpu.memory_space<vmem>>, vector<1x32x8xf32>
    %301 = vector.shape_cast %300 : vector<1x32x8xf32> to vector<32x8xf32>
    %cst_220 = arith.constant dense<0.000000e+00> : vector<32x8xf32>
    %302 = tpu.matmul %3, %301, %cst_220 {dimension_numbers = #tpu.dot_dimension_numbers<[1], [0], [0], [1], [0, 0, 1, 1], [], []>} : vector<32x32xf32>, vector<32x8xf32>, vector<32x8xf32> -> vector<32x8xf32>
    %c2_221 = arith.constant 2 : index
    %c0_222 = arith.constant 0 : index
    %c0_223 = arith.constant 0 : index
    %303 = vector.load %arg13[%c2_221, %c0_222, %c0_223] : memref<4x1x8xf32, #tpu.memory_space<vmem>>, vector<1x1x8xf32>
    %304 = vector.shape_cast %303 : vector<1x1x8xf32> to vector<1x8xf32>
    %305 = vector.broadcast %304 : vector<1x8xf32> to vector<32x8xf32>
    %306 = arith.addf %302, %305 : vector<32x8xf32>
    %307 = vector.shape_cast %306 : vector<32x8xf32> to vector<2x16x8xf32>
    %c2_224 = arith.constant 2 : index
    %c0_225 = arith.constant 0 : index
    %c0_226 = arith.constant 0 : index
    %308 = vector.load %arg14[%c2_224, %c0_225, %c0_226] : memref<4x32x8xf32, #tpu.memory_space<vmem>>, vector<1x32x8xf32>
    %309 = vector.shape_cast %308 : vector<1x32x8xf32> to vector<32x8xf32>
    %cst_227 = arith.constant dense<0.000000e+00> : vector<32x8xf32>
    %310 = tpu.matmul %3, %309, %cst_227 {dimension_numbers = #tpu.dot_dimension_numbers<[1], [0], [0], [1], [0, 0, 1, 1], [], []>} : vector<32x32xf32>, vector<32x8xf32>, vector<32x8xf32> -> vector<32x8xf32>
    %c2_228 = arith.constant 2 : index
    %c0_229 = arith.constant 0 : index
    %c0_230 = arith.constant 0 : index
    %311 = vector.load %arg15[%c2_228, %c0_229, %c0_230] : memref<4x1x8xf32, #tpu.memory_space<vmem>>, vector<1x1x8xf32>
    %312 = vector.shape_cast %311 : vector<1x1x8xf32> to vector<1x8xf32>
    %313 = vector.broadcast %312 : vector<1x8xf32> to vector<32x8xf32>
    %314 = arith.addf %310, %313 : vector<32x8xf32>
    %315 = vector.shape_cast %314 : vector<32x8xf32> to vector<2x16x8xf32>
    "tpu.trace_start"() <{level = 10 : i32, message = "btd,bsd->bts"}> : () -> ()
    %cst_231 = arith.constant dense<0.000000e+00> : vector<2x8x16xf32>
    %316 = tpu.matmul %299, %307, %cst_231 {dimension_numbers = #tpu.dot_dimension_numbers<[2], [2], [1], [1], [0, 0, 0, 1, 1, 1], [0], [0]>} : vector<2x8x8xf32>, vector<2x16x8xf32>, vector<2x8x16xf32> -> vector<2x8x16xf32>
    "tpu.trace_stop"() : () -> ()
    %cst_232 = arith.constant dense<0xFF800000> : vector<2x8xf32>
    %317 = vector.multi_reduction <maximumf>, %316, %cst_232 [2] : vector<2x8x16xf32> to vector<2x8xf32>
    %318 = vector.shape_cast %317 : vector<2x8xf32> to vector<2x8x1xf32>
    %319 = vector.broadcast %318 : vector<2x8x1xf32> to vector<2x8x16xf32>
    %320 = arith.subf %316, %319 : vector<2x8x16xf32>
    %321 = math.exp %320 : vector<2x8x16xf32>
    %cst_233 = arith.constant dense<0.000000e+00> : vector<2x8xf32>
    %322 = vector.multi_reduction <add>, %321, %cst_233 [2] : vector<2x8x16xf32> to vector<2x8xf32>
    %323 = vector.shape_cast %322 : vector<2x8xf32> to vector<2x8x1xf32>
    %324 = tpu.reciprocal %323 : vector<2x8x1xf32> -> vector<2x8x1xf32>
    %325 = vector.broadcast %324 : vector<2x8x1xf32> to vector<2x8x16xf32>
    %326 = arith.mulf %321, %325 : vector<2x8x16xf32>
    %c2_234 = arith.constant 2 : index
    %c0_235 = arith.constant 0 : index
    %c0_236 = arith.constant 0 : index
    %c0_237 = arith.constant 0 : index
    %327 = vector.load %arg30[%c2_234, %c0_235, %c0_236, %c0_237] : memref<4x2x8x16xf32, #tpu.memory_space<vmem>>, vector<1x2x8x16xf32>
    %328 = vector.shape_cast %327 : vector<1x2x8x16xf32> to vector<2x8x16xf32>
    %329 = vector.shape_cast %326 : vector<2x8x16xf32> to vector<1x2x8x16xf32>
    tpu.vector_store %arg30[%c2_234, %c0_235, %c0_236, %c0_237], %329 {strides = array<i32>} : memref<4x2x8x16xf32, #tpu.memory_space<vmem>>, vector<1x2x8x16xf32>,
    "tpu.trace_start"() <{level = 10 : i32, message = "bts,bsd->btd"}> : () -> ()
    %cst_238 = arith.constant dense<0.000000e+00> : vector<2x8x8xf32>
    %330 = tpu.matmul %326, %315, %cst_238 {dimension_numbers = #tpu.dot_dimension_numbers<[2], [1], [1], [2], [0, 0, 0, 1, 1, 2], [0], [0]>} : vector<2x8x16xf32>, vector<2x16x8xf32>, vector<2x8x8xf32> -> vector<2x8x8xf32>
    "tpu.trace_stop"() : () -> ()
    %331 = vector.shape_cast %330 : vector<2x8x8xf32> to vector<16x8xf32>
    %c2_239 = arith.constant 2 : index
    %c0_240 = arith.constant 0 : index
    %c0_241 = arith.constant 0 : index
    %332 = vector.load %arg16[%c2_239, %c0_240, %c0_241] : memref<4x8x32xf32, #tpu.memory_space<vmem>>, vector<1x8x32xf32>
    %333 = vector.shape_cast %332 : vector<1x8x32xf32> to vector<8x32xf32>
    %cst_242 = arith.constant dense<0.000000e+00> : vector<16x32xf32>
    %334 = tpu.matmul %331, %333, %cst_242 {dimension_numbers = #tpu.dot_dimension_numbers<[1], [0], [0], [1], [0, 0, 1, 1], [], []>} : vector<16x8xf32>, vector<8x32xf32>, vector<16x32xf32> -> vector<16x32xf32>
    %335 = arith.addf %291, %334 : vector<16x32xf32>
    %c3_243 = arith.constant 3 : index
    %c0_244 = arith.constant 0 : index
    %c0_245 = arith.constant 0 : index
    %336 = vector.load %arg10[%c3_243, %c0_244, %c0_245] : memref<4x32x8xf32, #tpu.memory_space<vmem>>, vector<1x32x8xf32>
    %337 = vector.shape_cast %336 : vector<1x32x8xf32> to vector<32x8xf32>
    %cst_246 = arith.constant dense<0.000000e+00> : vector<16x8xf32>
    %338 = tpu.matmul %204, %337, %cst_246 {dimension_numbers = #tpu.dot_dimension_numbers<[1], [0], [0], [1], [0, 0, 1, 1], [], []>} : vector<16x32xf32>, vector<32x8xf32>, vector<16x8xf32> -> vector<16x8xf32>
    %c3_247 = arith.constant 3 : index
    %c0_248 = arith.constant 0 : index
    %c0_249 = arith.constant 0 : index
    %339 = vector.load %arg11[%c3_247, %c0_248, %c0_249] : memref<4x1x8xf32, #tpu.memory_space<vmem>>, vector<1x1x8xf32>
    %340 = vector.shape_cast %339 : vector<1x1x8xf32> to vector<1x8xf32>
    %341 = vector.broadcast %340 : vector<1x8xf32> to vector<16x8xf32>
    %342 = arith.addf %338, %341 : vector<16x8xf32>
    %343 = vector.shape_cast %342 : vector<16x8xf32> to vector<2x8x8xf32>
    %c3_250 = arith.constant 3 : index
    %c0_251 = arith.constant 0 : index
    %c0_252 = arith.constant 0 : index
    %344 = vector.load %arg12[%c3_250, %c0_251, %c0_252] : memref<4x32x8xf32, #tpu.memory_space<vmem>>, vector<1x32x8xf32>
    %345 = vector.shape_cast %344 : vector<1x32x8xf32> to vector<32x8xf32>
    %cst_253 = arith.constant dense<0.000000e+00> : vector<32x8xf32>
    %346 = tpu.matmul %3, %345, %cst_253 {dimension_numbers = #tpu.dot_dimension_numbers<[1], [0], [0], [1], [0, 0, 1, 1], [], []>} : vector<32x32xf32>, vector<32x8xf32>, vector<32x8xf32> -> vector<32x8xf32>
    %c3_254 = arith.constant 3 : index
    %c0_255 = arith.constant 0 : index
    %c0_256 = arith.constant 0 : index
    %347 = vector.load %arg13[%c3_254, %c0_255, %c0_256] : memref<4x1x8xf32, #tpu.memory_space<vmem>>, vector<1x1x8xf32>
    %348 = vector.shape_cast %347 : vector<1x1x8xf32> to vector<1x8xf32>
    %349 = vector.broadcast %348 : vector<1x8xf32> to vector<32x8xf32>
    %350 = arith.addf %346, %349 : vector<32x8xf32>
    %351 = vector.shape_cast %350 : vector<32x8xf32> to vector<2x16x8xf32>
    %c3_257 = arith.constant 3 : index
    %c0_258 = arith.constant 0 : index
    %c0_259 = arith.constant 0 : index
    %352 = vector.load %arg14[%c3_257, %c0_258, %c0_259] : memref<4x32x8xf32, #tpu.memory_space<vmem>>, vector<1x32x8xf32>
    %353 = vector.shape_cast %352 : vector<1x32x8xf32> to vector<32x8xf32>
    %cst_260 = arith.constant dense<0.000000e+00> : vector<32x8xf32>
    %354 = tpu.matmul %3, %353, %cst_260 {dimension_numbers = #tpu.dot_dimension_numbers<[1], [0], [0], [1], [0, 0, 1, 1], [], []>} : vector<32x32xf32>, vector<32x8xf32>, vector<32x8xf32> -> vector<32x8xf32>
    %c3_261 = arith.constant 3 : index
    %c0_262 = arith.constant 0 : index
    %c0_263 = arith.constant 0 : index
    %355 = vector.load %arg15[%c3_261, %c0_262, %c0_263] : memref<4x1x8xf32, #tpu.memory_space<vmem>>, vector<1x1x8xf32>
    %356 = vector.shape_cast %355 : vector<1x1x8xf32> to vector<1x8xf32>
    %357 = vector.broadcast %356 : vector<1x8xf32> to vector<32x8xf32>
    %358 = arith.addf %354, %357 : vector<32x8xf32>
    %359 = vector.shape_cast %358 : vector<32x8xf32> to vector<2x16x8xf32>
    "tpu.trace_start"() <{level = 10 : i32, message = "btd,bsd->bts"}> : () -> ()
    %cst_264 = arith.constant dense<0.000000e+00> : vector<2x8x16xf32>
    %360 = tpu.matmul %343, %351, %cst_264 {dimension_numbers = #tpu.dot_dimension_numbers<[2], [2], [1], [1], [0, 0, 0, 1, 1, 1], [0], [0]>} : vector<2x8x8xf32>, vector<2x16x8xf32>, vector<2x8x16xf32> -> vector<2x8x16xf32>
    "tpu.trace_stop"() : () -> ()
    %cst_265 = arith.constant dense<0xFF800000> : vector<2x8xf32>
    %361 = vector.multi_reduction <maximumf>, %360, %cst_265 [2] : vector<2x8x16xf32> to vector<2x8xf32>
    %362 = vector.shape_cast %361 : vector<2x8xf32> to vector<2x8x1xf32>
    %363 = vector.broadcast %362 : vector<2x8x1xf32> to vector<2x8x16xf32>
    %364 = arith.subf %360, %363 : vector<2x8x16xf32>
    %365 = math.exp %364 : vector<2x8x16xf32>
    %cst_266 = arith.constant dense<0.000000e+00> : vector<2x8xf32>
    %366 = vector.multi_reduction <add>, %365, %cst_266 [2] : vector<2x8x16xf32> to vector<2x8xf32>
    %367 = vector.shape_cast %366 : vector<2x8xf32> to vector<2x8x1xf32>
    %368 = tpu.reciprocal %367 : vector<2x8x1xf32> -> vector<2x8x1xf32>
    %369 = vector.broadcast %368 : vector<2x8x1xf32> to vector<2x8x16xf32>
    %370 = arith.mulf %365, %369 : vector<2x8x16xf32>
    %c3_267 = arith.constant 3 : index
    %c0_268 = arith.constant 0 : index
    %c0_269 = arith.constant 0 : index
    %c0_270 = arith.constant 0 : index
    %371 = vector.load %arg30[%c3_267, %c0_268, %c0_269, %c0_270] : memref<4x2x8x16xf32, #tpu.memory_space<vmem>>, vector<1x2x8x16xf32>
    %372 = vector.shape_cast %371 : vector<1x2x8x16xf32> to vector<2x8x16xf32>
    %373 = vector.shape_cast %370 : vector<2x8x16xf32> to vector<1x2x8x16xf32>
    tpu.vector_store %arg30[%c3_267, %c0_268, %c0_269, %c0_270], %373 {strides = array<i32>} : memref<4x2x8x16xf32, #tpu.memory_space<vmem>>, vector<1x2x8x16xf32>,
    "tpu.trace_start"() <{level = 10 : i32, message = "bts,bsd->btd"}> : () -> ()
    %cst_271 = arith.constant dense<0.000000e+00> : vector<2x8x8xf32>
    %374 = tpu.matmul %370, %359, %cst_271 {dimension_numbers = #tpu.dot_dimension_numbers<[2], [1], [1], [2], [0, 0, 0, 1, 1, 2], [0], [0]>} : vector<2x8x16xf32>, vector<2x16x8xf32>, vector<2x8x8xf32> -> vector<2x8x8xf32>
    "tpu.trace_stop"() : () -> ()
    %375 = vector.shape_cast %374 : vector<2x8x8xf32> to vector<16x8xf32>
    %c3_272 = arith.constant 3 : index
    %c0_273 = arith.constant 0 : index
    %c0_274 = arith.constant 0 : index
    %376 = vector.load %arg16[%c3_272, %c0_273, %c0_274] : memref<4x8x32xf32, #tpu.memory_space<vmem>>, vector<1x8x32xf32>
    %377 = vector.shape_cast %376 : vector<1x8x32xf32> to vector<8x32xf32>
    %cst_275 = arith.constant dense<0.000000e+00> : vector<16x32xf32>
    %378 = tpu.matmul %375, %377, %cst_275 {dimension_numbers = #tpu.dot_dimension_numbers<[1], [0], [0], [1], [0, 0, 1, 1], [], []>} : vector<16x8xf32>, vector<8x32xf32>, vector<16x32xf32> -> vector<16x32xf32>
    %379 = arith.addf %335, %378 : vector<16x32xf32>
    %c0_276 = arith.constant 0 : index
    %c0_277 = arith.constant 0 : index
    %380 = vector.load %arg17[%c0_276, %c0_277] : memref<1x32xf32, #tpu.memory_space<vmem>>, vector<1x32xf32>
    %381 = vector.broadcast %380 : vector<1x32xf32> to vector<16x32xf32>
    %382 = arith.addf %379, %381 : vector<16x32xf32>
    %383 = arith.addf %204, %382 : vector<16x32xf32>
    %c0_278 = arith.constant 0 : index
    %c0_279 = arith.constant 0 : index
    %384 = vector.load %arg24[%c0_278, %c0_279] : memref<1x32xf32, #tpu.memory_space<vmem>>, vector<1x32xf32>
    %c0_280 = arith.constant 0 : index
    %c0_281 = arith.constant 0 : index
    %385 = vector.load %arg25[%c0_280, %c0_281] : memref<1x32xf32, #tpu.memory_space<vmem>>, vector<1x32xf32>
    %cst_282 = arith.constant dense<0.000000e+00> : vector<16xf32>
    %386 = vector.multi_reduction <add>, %383, %cst_282 [1] : vector<16x32xf32> to vector<16xf32>
    %387 = vector.shape_cast %386 : vector<16xf32> to vector<16x1xf32>
    %cst_283 = arith.constant 3.200000e+01 : f32
    %388 = vector.broadcast %cst_283 : f32 to vector<16x1xf32>
    %389 = arith.divf %387, %388 : vector<16x1xf32>
    %390 = vector.broadcast %389 : vector<16x1xf32> to vector<16x32xf32>
    %391 = arith.subf %383, %390 : vector<16x32xf32>
    %392 = arith.mulf %391, %391 : vector<16x32xf32>
    %cst_284 = arith.constant dense<0.000000e+00> : vector<16xf32>
    %393 = vector.multi_reduction <add>, %392, %cst_284 [1] : vector<16x32xf32> to vector<16xf32>
    %394 = vector.shape_cast %393 : vector<16xf32> to vector<16x1xf32>
    %cst_285 = arith.constant 3.200000e+01 : f32
    %395 = vector.broadcast %cst_285 : f32 to vector<16x1xf32>
    %396 = arith.divf %394, %395 : vector<16x1xf32>
    %cst_286 = arith.constant 9.99999974E-6 : f32
    %397 = vector.broadcast %cst_286 : f32 to vector<16x1xf32>
    %398 = arith.addf %396, %397 : vector<16x1xf32>
    %399 = math.rsqrt %398 : vector<16x1xf32>
    %400 = vector.broadcast %399 : vector<16x1xf32> to vector<16x32xf32>
    %401 = arith.mulf %391, %400 : vector<16x32xf32>
    %402 = vector.broadcast %384 : vector<1x32xf32> to vector<16x32xf32>
    %403 = arith.mulf %401, %402 : vector<16x32xf32>
    %404 = vector.broadcast %385 : vector<1x32xf32> to vector<16x32xf32>
    %405 = arith.addf %403, %404 : vector<16x32xf32>
    %c0_287 = arith.constant 0 : index
    %c0_288 = arith.constant 0 : index
    %406 = vector.load %arg18[%c0_287, %c0_288] : memref<32x64xf32, #tpu.memory_space<vmem>>, vector<32x64xf32>
    %cst_289 = arith.constant dense<0.000000e+00> : vector<16x64xf32>
    %407 = tpu.matmul %405, %406, %cst_289 {dimension_numbers = #tpu.dot_dimension_numbers<[1], [0], [0], [1], [0, 0, 1, 1], [], []>} : vector<16x32xf32>, vector<32x64xf32>, vector<16x64xf32> -> vector<16x64xf32>
    %c0_290 = arith.constant 0 : index
    %c0_291 = arith.constant 0 : index
    %408 = vector.load %arg19[%c0_290, %c0_291] : memref<1x64xf32, #tpu.memory_space<vmem>>, vector<1x64xf32>
    %409 = vector.broadcast %408 : vector<1x64xf32> to vector<16x64xf32>
    %410 = arith.addf %407, %409 : vector<16x64xf32>
    %cst_292 = arith.constant 0.000000e+00 : f32
    %411 = vector.broadcast %cst_292 : f32 to vector<16x64xf32>
    %412 = arith.maximumf %410, %411 : vector<16x64xf32>
    %c0_293 = arith.constant 0 : index
    %c0_294 = arith.constant 0 : index
    %413 = vector.load %arg20[%c0_293, %c0_294] : memref<64x32xf32, #tpu.memory_space<vmem>>, vector<64x32xf32>
    %cst_295 = arith.constant dense<0.000000e+00> : vector<16x32xf32>
    %414 = tpu.matmul %412, %413, %cst_295 {dimension_numbers = #tpu.dot_dimension_numbers<[1], [0], [0], [1], [0, 0, 1, 1], [], []>} : vector<16x64xf32>, vector<64x32xf32>, vector<16x32xf32> -> vector<16x32xf32>
    %c0_296 = arith.constant 0 : index
    %c0_297 = arith.constant 0 : index
    %415 = vector.load %arg21[%c0_296, %c0_297] : memref<1x32xf32, #tpu.memory_space<vmem>>, vector<1x32xf32>
    %416 = vector.broadcast %415 : vector<1x32xf32> to vector<16x32xf32>
    %417 = arith.addf %414, %416 : vector<16x32xf32>
    %418 = arith.addf %405, %417 : vector<16x32xf32>
    %c0_298 = arith.constant 0 : index
    %c0_299 = arith.constant 0 : index
    %419 = vector.load %arg26[%c0_298, %c0_299] : memref<1x32xf32, #tpu.memory_space<vmem>>, vector<1x32xf32>
    %c0_300 = arith.constant 0 : index
    %c0_301 = arith.constant 0 : index
    %420 = vector.load %arg27[%c0_300, %c0_301] : memref<1x32xf32, #tpu.memory_space<vmem>>, vector<1x32xf32>
    %cst_302 = arith.constant dense<0.000000e+00> : vector<16xf32>
    %421 = vector.multi_reduction <add>, %418, %cst_302 [1] : vector<16x32xf32> to vector<16xf32>
    %422 = vector.shape_cast %421 : vector<16xf32> to vector<16x1xf32>
    %cst_303 = arith.constant 3.200000e+01 : f32
    %423 = vector.broadcast %cst_303 : f32 to vector<16x1xf32>
    %424 = arith.divf %422, %423 : vector<16x1xf32>
    %425 = vector.broadcast %424 : vector<16x1xf32> to vector<16x32xf32>
    %426 = arith.subf %418, %425 : vector<16x32xf32>
    %427 = arith.mulf %426, %426 : vector<16x32xf32>
    %cst_304 = arith.constant dense<0.000000e+00> : vector<16xf32>
    %428 = vector.multi_reduction <add>, %427, %cst_304 [1] : vector<16x32xf32> to vector<16xf32>
    %429 = vector.shape_cast %428 : vector<16xf32> to vector<16x1xf32>
    %cst_305 = arith.constant 3.200000e+01 : f32
    %430 = vector.broadcast %cst_305 : f32 to vector<16x1xf32>
    %431 = arith.divf %429, %430 : vector<16x1xf32>
    %cst_306 = arith.constant 9.99999974E-6 : f32
    %432 = vector.broadcast %cst_306 : f32 to vector<16x1xf32>
    %433 = arith.addf %431, %432 : vector<16x1xf32>
    %434 = math.rsqrt %433 : vector<16x1xf32>
    %435 = vector.broadcast %434 : vector<16x1xf32> to vector<16x32xf32>
    %436 = arith.mulf %426, %435 : vector<16x32xf32>
    %437 = vector.broadcast %419 : vector<1x32xf32> to vector<16x32xf32>
    %438 = arith.mulf %436, %437 : vector<16x32xf32>
    %439 = vector.broadcast %420 : vector<1x32xf32> to vector<16x32xf32>
    %440 = arith.addf %438, %439 : vector<16x32xf32>
    %441 = vector.shape_cast %440 : vector<16x32xf32> to vector<2x8x32xf32>
    %c0_307 = arith.constant 0 : index
    %c0_308 = arith.constant 0 : index
    %c0_309 = arith.constant 0 : index
    %442 = vector.load %arg28[%c0_307, %c0_308, %c0_309] : memref<2x8x32xf32, #tpu.memory_space<vmem>>, vector<2x8x32xf32>
    tpu.vector_store %arg28[%c0_307, %c0_308, %c0_309], %441 {strides = array<i32>} : memref<2x8x32xf32, #tpu.memory_space<vmem>>, vector<2x8x32xf32>,
    return
  }
}

</mosaic_0001>

<bundles_post_ra>
// kernel: transformer_decoder_layer.1
= control target key start
LH: loop header
LB: loop body
LE: loop exit
PB: predicated region body
PF: predicated region fallthrough
CT: control target
= control target key end

     0   :  { %s7509_s3 = smov 2   ;;  %s7510_s10 = smov 4   ;;  %vm140_vm0 = vcmask 261120   ;;  %v7511_v14 = vmov 0.0   ;;  %vm7512_vm1 = vmmov 0   ;;  %vm394_vm2 = vcmask 64512   ;;  %s8234_s0 = inlined_call_operand.smem [shape: u32[31], index: -1, kind: input, shape index: {}] }
   0x1   :  { %s7550_s6 = sld [smem:[%s8234_s0 + %s7509_s3]]   ;;  %s7513_s14 = smov 5   ;;  %vm7925_vm3 = vmpackc.low %vm394_vm2, %vm394_vm2  ;;  %vm3323_vm4 = vcmask 130048   ;;  %vm5832_vm5 = vcmask 523264  }
   0x2   :  { %s1_s9 = sld [smem:[%s8234_s0]]   ;;  %s7514_s18 = smov 3  }
   0x3   :  { %s7558_s13 = sld [smem:[%s8234_s0 + %s7510_s10]]   ;;  %s7515_s22 = smov 6  }
   0x4   :  { %s7588_s17 = sld [smem:[%s8234_s0 + %s7513_s14]]   ;;  %s7516_s26 = smov 7  }
   0x5   :  { %s7593_s21 = sld [smem:[%s8234_s0 + %s7514_s18]]   ;;  %s7517_s30 = smov 29  }
   0x6   :  { %s7610_s25 = sld [smem:[%s8234_s0 + %s7515_s22]]   ;;  %s7518_s4 = smov 8  }
   0x7   :  { %v129_v0 = vld [vmem:[%s7550_s6] sm:$0xff]  ;;  %v130_v1 = vld [vmem:[%s7550_s6 + $0x8] sm:$0xff]  ;;  %v131_v2 = vld [vmem:[%s7550_s6 + $0x10] sm:$0xff]  ;;  %s7628_s29 = sld [smem:[%s8234_s0 + %s7516_s26]]   ;;  %s7520_s12 = smov 12  }
   0x8   :  { %v7116_v3 = vpack.c.bf16 %v130_v1, %v129_v0  ;;  %v132_v4 = vld [vmem:[%s7550_s6 + $0x18] sm:$0xff]  ;;  %v7564_v5 = vld [vmem:[%s1_s9] sm:$0xff]  ;;  %v7574_v12 = vld [vmem:[%s1_s9 + $0x8] sm:$0xff]  ;;  %s7638_s3 = sld [smem:[%s8234_s0 + %s7517_s30]]   ;;  %s7521_s16 = smov 1  }
   0x9   :  { %v7120_v6 = vpack.c.bf16 %v132_v4, %v131_v2  ;;  %6574 = vmatprep.mubr.msk.f32.mxu1 %vm140_vm0, %v7564_v5  ;;  %v222_v7 = vld [vmem:[%s7558_s13] sm:$0xff]  ;;  %v223_v8 = vld [vmem:[%s7558_s13 + $0x8] sm:$0xff]  ;;  %6596 = vmatprep.mubr.msk.f32.mxu0 %vm140_vm0, %v7564_v5  ;;  %v224_v10 = vld [vmem:[%s7558_s13 + $0x10] sm:$0xff]  ;;  %s7704_s8 = sld [smem:[%s8234_s0 + %s7518_s4]]   ;;  %s7522_s20 = smov 10  }
   0xa   :  { %7117 = vmatprep.subr.bf16.mxu1 %v7116_v3  ;;  %v7124_v9 = vpack.c.bf16 %v223_v8, %v222_v7  ;;  %v225_v11 = vld [vmem:[%s7558_s13 + $0x18] sm:$0xff]  ;;  %v6007_v17 = vld [vmem:[%s7588_s17] ss:$0 sm:$0xff]  ;;  %v6028_v52 = vld [vmem:[%s7558_s13 + $0x28] sm:$0xff]  ;;  %s7844_s15 = sld [smem:[%s8234_s0 + %s7520_s12]]   ;;  %s7523_s24 = smov 14  }
   0xb   :  { %7119 = vmatpush3.bf16.msra.mxu1 %v7116_v3  ;;  %v7128_v13 = vpack.c.bf16 %v225_v11, %v224_v10  ;;  %v6004_v20 = vld [vmem:[%s7593_s21] ss:$0 sm:$0xff]  ;;  %v6020_v56 = vld [vmem:[%s7550_s6 + $0x28] sm:$0xff]  ;;  %v6029_v60 = vld [vmem:[%s7558_s13 + $0x30] sm:$0xff]  ;;  %s5974_s19 = sld [smem:[%s8234_s0 + %s7521_s16]]   ;;  %s7525_s28 = smov 22  }
   0xc   :  { %7121 = vmatprep.subr.bf16.mxu1 %v7120_v6  ;;  %v308_v25 = vld [vmem:[%s7610_s25] sm:$0xff]  ;;  %v309_v26 = vld [vmem:[%s7610_s25 + $0x8] sm:$0xff]  ;;  %v310_v27 = vld [vmem:[%s7610_s25 + $0x10] sm:$0xff]  ;;  %s7858_s23 = sld [smem:[%s8234_s0 + %s7522_s20]]   ;;  %s7526_s2 = smov 23  }
   0xd   :  { %v7132_v28 = vpack.c.bf16 %v309_v26, %v308_v25  ;;  %v311_v29 = vld [vmem:[%s7610_s25 + $0x18] sm:$0xff]  ;;  %v6010_v48 = vld [vmem:[%s7628_s29] ss:$0 sm:$0xff]  ;;  %v6021_v1 = vld [vmem:[%s7550_s6 + $0x30] sm:$0xff]  ;;  %s7883_s27 = sld [smem:[%s8234_s0 + %s7523_s24]]   ;;  %s7527_s7 = smov 13  }
   0xe   :  { %v7136_v30 = vpack.c.bf16 %v311_v29, %v310_v27  ;;  %v6027_v51 = vld [vmem:[%s7558_s13 + $0x20] sm:$0xff]  ;;  %v6030_v61 = vld [vmem:[%s7558_s13 + $0x38] sm:$0xff]  ;;  %v6037_v25 = vld [vmem:[%s7610_s25 + $0x30] sm:$0xff]  ;;  %s5995_s1 = sld [smem:[%s8234_s0 + %s7525_s28]]   ;;  %s7528_s10 = smov 11  }
   0xf   :  { %7123 = vmatpush3.bf16.msra.mxu1 %v7120_v6  ;;  %7133 = vmatprep.subr.bf16.mxu0 %v7132_v28  ;;  %v7148_v54 = vpack.c.bf16 %v6028_v52, %v6027_v51  ;;  %v6019_v55 = vld [vmem:[%s7550_s6 + $0x20] sm:$0xff]  ;;  %v7152_v0 = vpack.c.bf16 %v6030_v61, %v6029_v60  ;;  %v6022_v2 = vld [vmem:[%s7550_s6 + $0x38] sm:$0xff]  ;;  %v6058_v61 = vld [vmem:[%s7550_s6 + $0x50] sm:$0xff]  ;;  %s5996_s5 = sld [smem:[%s8234_s0 + %s7526_s2]]   ;;  %s7529_s14 = smov 15  }
  0x10   :  { %7125 = vmatprep.subr.bf16.mxu1 %v7124_v9  ;;  %7135 = vmatpush3.bf16.msra.mxu0 %v7132_v28  ;;  %v7140_v57 = vpack.c.bf16 %v6020_v56, %v6019_v55  ;;  %v7144_v6 = vpack.c.bf16 %v6022_v2, %v6021_v1  ;;  %v6032_v11 = vld [vmem:[%s7588_s17 + $0x1] ss:$0 sm:$0xff]  ;;  %v6038_v27 = vld [vmem:[%s7610_s25 + $0x38] sm:$0xff]  ;;  %v6051_v56 = vld [vmem:[%s7704_s8 + $0x8] sm:$0xff]  ;;  %s7920_s9 = sld [smem:[%s8234_s0 + %s7527_s7]]   ;;  %s7531_s24 = smov 16  }
  0x11   :  { %7137 = vmatprep.subr.bf16.mxu0 %v7136_v30  ;;  %v7160_v28 = vpack.c.bf16 %v6038_v27, %v6037_v25  ;;  %v6073_v1 = vld [vmem:[%s7610_s25 + $0x48] sm:$0xff]  ;;  %v6074_v2 = vld [vmem:[%s7610_s25 + $0x50] sm:$0xff]  ;;  %s7944_s18 = sld [smem:[%s8234_s0 + %s7529_s14]]   ;;  %s7533_s30 = smov 18  }
  0x12   :  { %6575 = vmatmul.mubr.msk.f32.vlgmr.msra.gmra.mrb[0].mxu1 %vm140_vm0, %v7574_v12  ;;  %s8048_s28 = sld [smem:[%s8234_s0 + %s7531_s24]]   ;;  %s7534_s4 = smov 20  }
  0x13   :  { %7127 = vmatpush3.bf16.msra.mxu1 %v7124_v9  ;;  %6585 = vmatprep.mubr.msk.f32.mxu1 %vm140_vm0, %v7564_v5  ;;  %s7536_s12 = smov 25   ;;  %s7539_s26 = smov 26  }
  0x14   :  { %7129 = vmatprep.subr.bf16.mxu1 %v7128_v13  ;;  %7139 = vmatpush3.bf16.msra.mxu0 %v7136_v30  ;;  %s5998_s16 = sld [smem:[%s8234_s0 + %s7536_s12]]   ;;  %s7541_s2 = smov 28  }
  0x15   :  { %6609 = vmatprep.subr.mxu0 %v7511_v14 }
  0x17   :  { %7131 = vmatpush3.bf16.msra.mxu1 %v7128_v13  ;;  %6597 = vmatmul.mubr.msk.f32.vlgmr.msra.gmra.mrb[0].mxu0 %vm140_vm0, %v7574_v12 }
  0x18   :  { %6599 = vmatprep.subr.mxu1 %v7511_v14  ;;  %6611 = vmatprep.mubr.msk.f32.mxu0 %vm7512_vm1, %v7511_v14 }
  0x1a   :  { %6586 = vmatmul.mubr.msk.f32.vlgmr.msra.gmra.mrb[2].mxu1 %vm140_vm0, %v7574_v12 }
  0x1b   :  { %6601 = vmatprep.mubr.msk.f32.mxu1 %vm7512_vm1, %v7511_v14 }
  0xe5   :  { %v6576_v15 = vpop.f32.mrb[0].mxu1 }
  0xe6   :  { %v213_v16 = vpop.f32.mrb[1].mxu1  ;;  %v219_v24 = vadd.f32 %v6576_v15, %v6004_v20 }
  0xe7   :  { %v214_v22 = vadd.f32 %v6004_v20, %v213_v16 }
  0xea   :  { %v6598_v47 = vpop.f32.mrb[0].mxu0 }
  0xeb   :  { %v391_v49 = vadd.f32 %v6598_v47, %v6010_v48  ;;  %v385_v50 = vpop.f32.mrb[1].mxu0 }
  0xec   :  { %v386_v53 = vadd.f32 %v6010_v48, %v385_v50 }
  0xed   :  { %v6587_v18 = vpop.f32.mrb[2].mxu1 }
  0xee   :  { %v299_v19 = vpop.f32.mrb[3].mxu1  ;;  %v305_v23 = vadd.f32 %v6587_v18, %v6007_v17  ;;  %6610 = vmatpush3.msra.mxu0 %v386_v53 }
  0xef   :  { %v300_v21 = vadd.f32 %v6007_v17, %v299_v19  ;;  %7141 = vmatprep.subr.bf16.mxu0 %v7140_v57  ;;  %v6024_v17 = vld [vmem:[%s7593_s21 + $0x1] ss:$0 sm:$0xff] }
  0xf1   :  { %6600 = vmatpush3.xpose.msk.msra.mxu1 %vm394_vm2, %v300_v21 }
  0xf2   :  { %6604 = vmatprep.subr.mxu1 %v7511_v14 }
  0xf4   :  { %6602 = vmatmul.mubr.msk.f32.vlgmr.msra.gmra.mrb[4].mxu1 %vm394_vm2, %v214_v22 }
  0xf5   :  { %6605 = vmatpush3.xpose.msk.msra.mxu1 %vm394_vm2, %v305_v23  ;;  %6606 = vmatprep.mubr.msk.f32.mxu1 %vm7512_vm1, %v7511_v14  ;;  %v6035_v23 = vld [vmem:[%s7610_s25 + $0x20] sm:$0xff] }
  0xf6   :  { %6614 = vmatprep.subr.mxu1 %v7511_v14 }
  0xf8   :  { %6607 = vmatmul.mubr.msk.f32.vlgmr.msra.gmra.mrb[6].mxu1 %vm394_vm2, %v219_v24  ;;  %v6036_v24 = vld [vmem:[%s7610_s25 + $0x28] sm:$0xff] }
  0xf9   :  { %6616 = vmatprep.mubr.msk.f32.mxu1 %vm7512_vm1, %v7511_v14  ;;  %6615 = vmatpush3.msra.mxu1 %v391_v49  ;;  %v7156_v26 = vpack.c.bf16 %v6036_v24, %v6035_v23  ;;  %v6069_v24 = vld [vmem:[%s7588_s17 + $0x2] ss:$0 sm:$0xff] }
  0xfa   :  { %7149 = vmatprep.subr.bf16.mxu1 %v7148_v54 }
 0x1c7   :  { %v467_v31 = vpop.f32.mrb[4].mxu1 }
 0x1c8   :  { %v6603_v32 = vpop.f32.mrb[5].mxu1  ;;  %v547_v36 = vsel %vm394_vm2, %v467_v31, -inf }
 0x1cb   :  { %v543_v33 = vpop.f32.mrb[6].mxu1 }
 0x1cc   :  { %v6608_v34 = vpop.f32.mrb[7].mxu1  ;;  %v550_v35 = vsel %vm394_vm2, %v543_v33, -inf }
 0x1cd   :  { %551 = vmax.xlane.f32.xlu0 %v550_v35 }
 0x1d1   :  { %548 = vmax.xlane.f32.xlu0 %v547_v36 }
 0x25a   :  { %v552_v37 = vpop.xlane.xlu0 %551 }
 0x25b   :  { %v554_v38 = vsub.f32 %v543_v33, %v552_v37 }
 0x25d   :  { %v557_v39 = vmul.f32 1.442695, %v554_v38 }
 0x25e   :  { %v549_v40 = vpop.xlane.xlu0 %548 }
 0x25f   :  { %7433 = vpow2.f32 %v557_v39  ;;  %v553_v41 = vsub.f32 %v467_v31, %v549_v40 }
 0x261   :  { %v555_v42 = vmul.f32 1.442695, %v553_v41 }
 0x263   :  { %7435 = vpow2.f32 %v555_v42 }
 0x269   :  { %v7434_v43 = vpop.eup %7433 }
 0x26a   :  { %v562_v44 = vsel %vm394_vm2, %v7434_v43, 0.0 }
 0x26b   :  { %563 = vadd.xlane.f32.xlu1 %v562_v44 }
 0x26d   :  { %v7436_v45 = vpop.eup %7435 }
 0x26e   :  { %v559_v46 = vsel %vm394_vm2, %v7436_v45, 0.0 }
 0x26f   :  { %560 = vadd.xlane.f32.xlu1 %v559_v46  ;;  %v6040_v46 = vld [vmem:[%s7628_s29 + $0x1] ss:$0 sm:$0xff] }
 0x2f8   :  { %v564_v58 = vpop.xlane.xlu1 %563 }
 0x2f9   :  { %7437 = vrcp.f32 %v564_v58  ;;  %v6056_v58 = vld [vmem:[%s7550_s6 + $0x40] sm:$0xff] }
 0x2fc   :  { %v561_v59 = vpop.xlane.xlu1 %560 }
 0x2fd   :  { %7439 = vrcp.f32 %v561_v59  ;;  %v6057_v59 = vld [vmem:[%s7550_s6 + $0x48] sm:$0xff] }
 0x2fe   :  { %v7164_v60 = vpack.c.bf16 %v6057_v59, %v6056_v58  ;;  %v6100_v58 = vld [vmem:[%s7558_s13 + $0x68] sm:$0xff] }
 0x303   :  { %v7438_v62 = vpop.eup %7437 }
 0x304   :  { %v568_v63 = vmul.f32 %v7438_v62, %v7434_v43  ;;  %v6059_v62 = vld [vmem:[%s7550_s6 + $0x58] sm:$0xff] }
 0x306   :  { %570 = vst.msk [vmem:[%s7638_s3 + $0x8] sm:$0xff] %vm394_vm2, %v568_v63  ;;  %6617 = vmatmul.mubr.msk.f32.vlgmr.msra.gmra.mrb[8].mxu1 %vm394_vm2, %v568_v63  ;;  %v7168_v63 = vpack.c.bf16 %v6059_v62, %v6058_v61  ;;  %v6092_v61 = vld [vmem:[%s7550_s6 + $0x68] sm:$0xff] }
 0x307   :  { %v7440_v3 = vpop.eup %7439  ;;  %7151 = vmatpush3.bf16.msra.mxu1 %v7148_v54  ;;  %6638 = vmatprep.mubr.msk.f32.mxu1 %vm140_vm0, %v7564_v5 }
 0x308   :  { %v567_v4 = vmul.f32 %v7440_v3, %v7436_v45  ;;  %7153 = vmatprep.subr.bf16.mxu1 %v7152_v0 }
 0x30a   :  { %569 = vst.msk [vmem:[%s7638_s3] sm:$0xff] %vm394_vm2, %v567_v4  ;;  %6612 = vmatmul.mubr.msk.f32.vlgmr.msra.gmra.mrb[2].mxu0 %vm394_vm2, %v567_v4  ;;  %v6075_v4 = vld [vmem:[%s7610_s25 + $0x58] sm:$0xff] }
 0x30b   :  { %7143 = vmatpush3.bf16.msra.mxu0 %v7140_v57  ;;  %7155 = vmatpush3.bf16.msra.mxu1 %v7152_v0  ;;  %v717_v57 = vld [vmem:[%s7704_s8] sm:$0xff] }
 0x30c   :  { %7145 = vmatprep.subr.bf16.mxu0 %v7144_v6  ;;  %6627 = vmatprep.mubr.msk.f32.mxu0 %vm140_vm0, %v7564_v5  ;;  %v6072_v0 = vld [vmem:[%s7610_s25 + $0x40] sm:$0xff] }
 0x30d   :  { %6652 = vmatprep.subr.mxu1 %v7511_v14  ;;  %v7180_v3 = vpack.c.bf16 %v6073_v1, %v6072_v0  ;;  %v6094_v0 = vld [vmem:[%s7550_s6 + $0x78] sm:$0xff] }
 0x30e   :  { %6639 = vmatmul.mubr.msk.f32.vlgmr.msra.gmra.mrb[10].mxu1 %vm140_vm0, %v7574_v12 }
 0x30f   :  { %7147 = vmatpush3.bf16.msra.mxu0 %v7144_v6  ;;  %6654 = vmatprep.mubr.msk.f32.mxu1 %vm7512_vm1, %v7511_v14  ;;  %v7184_v6 = vpack.c.bf16 %v6075_v4, %v6074_v2  ;;  %v6101_v2 = vld [vmem:[%s7558_s13 + $0x70] sm:$0xff] }
 0x310   :  { %7157 = vmatprep.subr.bf16.mxu0 %v7156_v26 }
 0x312   :  { %6628 = vmatmul.mubr.msk.f32.vlgmr.msra.gmra.mrb[4].mxu0 %vm140_vm0, %v7574_v12 }
 0x313   :  { %6649 = vmatprep.mubr.msk.f32.mxu0 %vm140_vm0, %v7564_v5  ;;  %7159 = vmatpush3.bf16.msra.mxu0 %v7156_v26  ;;  %v6077_v26 = vld [vmem:[%s7628_s29 + $0x2] ss:$0 sm:$0xff] }
 0x314   :  { %7161 = vmatprep.subr.bf16.mxu0 %v7160_v28 }
 0x317   :  { %7163 = vmatpush3.bf16.msra.mxu0 %v7160_v28 }
 0x318   :  { %6662 = vmatprep.subr.mxu0 %v7511_v14 }
 0x31a   :  { %6650 = vmatmul.mubr.msk.f32.vlgmr.msra.gmra.mrb[6].mxu0 %vm140_vm0, %v7574_v12 }
 0x31b   :  { %6664 = vmatprep.mubr.msk.f32.mxu0 %vm7512_vm1, %v7511_v14 }
 0x3d9   :  { %v7663_v7 = vpop.f32.mrb[8].mxu1 }
 0x3da   :  { %v6618_v8 = vpop.f32.mrb[9].mxu1 }
 0x3dd   :  { %v7665_v9 = vpop.f32.mrb[2].mxu0 }
 0x3de   :  { %v6613_v10 = vpop.f32.mrb[3].mxu0 }
 0x3df   :  { %v6064_v10 = vld [vmem:[%s7558_s13 + $0x40] sm:$0xff] }
 0x3e1   :  { %v6640_v13 = vpop.f32.mrb[10].mxu1 }
 0x3e2   :  { %v885_v15 = vpop.f32.mrb[11].mxu1  ;;  %v891_v21 = vadd.f32 %v6640_v13, %v6032_v11 }
 0x3e3   :  { %v886_v16 = vadd.f32 %v6032_v11, %v885_v15  ;;  %v6065_v11 = vld [vmem:[%s7558_s13 + $0x48] sm:$0xff] }
 0x3e4   :  { %v7172_v15 = vpack.c.bf16 %v6065_v11, %v6064_v10 }
 0x3e5   :  { %v6629_v18 = vpop.f32.mrb[4].mxu0  ;;  %6653 = vmatpush3.xpose.msk.msra.mxu1 %vm394_vm2, %v886_v16 }
 0x3e6   :  { %v797_v19 = vpop.f32.mrb[5].mxu0  ;;  %6657 = vmatprep.subr.mxu1 %v7511_v14  ;;  %v803_v22 = vadd.f32 %v6629_v18, %v6024_v17  ;;  %v6066_v18 = vld [vmem:[%s7558_s13 + $0x50] sm:$0xff] }
 0x3e7   :  { %v798_v20 = vadd.f32 %v6024_v17, %v797_v19  ;;  %v6067_v19 = vld [vmem:[%s7558_s13 + $0x58] sm:$0xff] }
 0x3e9   :  { %6655 = vmatmul.mubr.msk.f32.vlgmr.msra.gmra.mrb[12].mxu1 %vm394_vm2, %v798_v20  ;;  %v7176_v20 = vpack.c.bf16 %v6067_v19, %v6066_v18  ;;  %v6096_v18 = vld [vmem:[%s7593_s21 + $0x3] ss:$0 sm:$0xff] }
 0x3ea   :  { %6658 = vmatpush3.xpose.msk.msra.mxu1 %vm394_vm2, %v891_v21  ;;  %6659 = vmatprep.mubr.msk.f32.mxu1 %vm7512_vm1, %v7511_v14 }
 0x3eb   :  { %6667 = vmatprep.subr.mxu1 %v7511_v14 }
 0x3ed   :  { %6660 = vmatmul.mubr.msk.f32.vlgmr.msra.gmra.mrb[14].mxu1 %vm394_vm2, %v803_v22  ;;  %v6651_v45 = vpop.f32.mrb[6].mxu0 }
 0x3ee   :  { %6669 = vmatprep.mubr.msk.f32.mxu1 %vm7512_vm1, %v7511_v14  ;;  %v973_v47 = vpop.f32.mrb[7].mxu0  ;;  %v979_v49 = vadd.f32 %v6651_v45, %v6040_v46 }
 0x3ef   :  { %v974_v48 = vadd.f32 %v6040_v46, %v973_v47 }
 0x3f0   :  { %6668 = vmatpush3.msra.mxu1 %v979_v49 }
 0x3f1   :  { %6663 = vmatpush3.msra.mxu0 %v974_v48  ;;  %7165 = vmatprep.subr.bf16.mxu1 %v7164_v60 }
 0x3f2   :  { %6672 = vmatprep.subr.mxu0 %v6051_v56 }
 0x4bc   :  { %v1054_v29 = vpop.f32.mrb[12].mxu1 }
 0x4bd   :  { %v6656_v30 = vpop.f32.mrb[13].mxu1  ;;  %v1134_v31 = vsel %vm394_vm2, %v1054_v29, -inf }
 0x4be   :  { %1135 = vmax.xlane.f32.xlu0 %v1134_v31 }
 0x4c0   :  { %v1130_v32 = vpop.f32.mrb[14].mxu1 }
 0x4c1   :  { %v6661_v33 = vpop.f32.mrb[15].mxu1  ;;  %v1137_v34 = vsel %vm394_vm2, %v1130_v32, -inf }
 0x4c2   :  { %1138 = vmax.xlane.f32.xlu1 %v1137_v34 }
 0x54b   :  { %v1136_v35 = vpop.xlane.xlu0 %1135 }
 0x54c   :  { %v1140_v36 = vsub.f32 %v1054_v29, %v1136_v35 }
 0x54e   :  { %v1142_v37 = vmul.f32 1.442695, %v1140_v36 }
 0x54f   :  { %v1139_v38 = vpop.xlane.xlu1 %1138 }
 0x550   :  { %7441 = vpow2.f32 %v1142_v37  ;;  %v1141_v39 = vsub.f32 %v1130_v32, %v1139_v38 }
 0x552   :  { %v1144_v40 = vmul.f32 1.442695, %v1141_v39 }
 0x554   :  { %7443 = vpow2.f32 %v1144_v40 }
 0x55a   :  { %v7442_v41 = vpop.eup %7441 }
 0x55b   :  { %v1146_v42 = vsel %vm394_vm2, %v7442_v41, 0.0 }
 0x55c   :  { %1147 = vadd.xlane.f32.xlu0 %v1146_v42 }
 0x55e   :  { %v7444_v43 = vpop.eup %7443 }
 0x55f   :  { %v1149_v44 = vsel %vm394_vm2, %v7444_v43, 0.0 }
 0x560   :  { %1150 = vadd.xlane.f32.xlu1 %v1149_v44 }
 0x5e9   :  { %v1148_v50 = vpop.xlane.xlu0 %1147 }
 0x5ea   :  { %7445 = vrcp.f32 %v1148_v50  ;;  %v6088_v50 = vld [vmem:[%s7704_s8 + $0x10] sm:$0xff] }
 0x5ed   :  { %v1151_v51 = vpop.xlane.xlu1 %1150 }
 0x5ee   :  { %7447 = vrcp.f32 %v1151_v51 }
 0x5f4   :  { %v7446_v52 = vpop.eup %7445 }
 0x5f5   :  { %v1154_v53 = vmul.f32 %v7446_v52, %v7442_v41 }
 0x5f7   :  { %6047 = vst.msk [vmem:[%s7638_s3 + $0x10] sm:$0xff] %vm394_vm2, %v1154_v53  ;;  %6665 = vmatmul.mubr.msk.f32.vlgmr.msra.gmra.mrb[8].mxu0 %vm394_vm2, %v1154_v53 }
 0x5f8   :  { %v7448_v54 = vpop.eup %7447  ;;  %6673 = vmatpush3.msra.mxu0 %v6051_v56 }
 0x5f9   :  { %v1155_v55 = vmul.f32 %v7448_v54, %v7444_v43  ;;  %6677 = vmatprep.subr.mxu0 %v717_v57 }
 0x5fb   :  { %6048 = vst.msk [vmem:[%s7638_s3 + $0x18] sm:$0xff] %vm394_vm2, %v1155_v55  ;;  %6670 = vmatmul.mubr.msk.f32.vlgmr.msra.gmra.mrb[16].mxu1 %vm394_vm2, %v1155_v55 }
 0x5fc   :  { %6690 = vmatprep.mubr.msk.f32.mxu1 %vm140_vm0, %v7564_v5  ;;  %7167 = vmatpush3.bf16.msra.mxu1 %v7164_v60  ;;  %v6091_v60 = vld [vmem:[%s7550_s6 + $0x60] sm:$0xff] }
 0x5fd   :  { %7169 = vmatprep.subr.bf16.mxu1 %v7168_v63  ;;  %v7188_v62 = vpack.c.bf16 %v6092_v61, %v6091_v60 }
 0x600   :  { %7171 = vmatpush3.bf16.msra.mxu1 %v7168_v63  ;;  %v6093_v63 = vld [vmem:[%s7550_s6 + $0x70] sm:$0xff]  ;;  %s7519_s6 = smov 9  }
 0x601   :  { %7181 = vmatprep.subr.bf16.mxu1 %v7180_v3  ;;  %v7192_v1 = vpack.c.bf16 %v6094_v0, %v6093_v63  ;;  %s5982_s11 = sld [smem:[%s8234_s0 + %s7519_s6]]   ;;  %s7535_s6 = smov 24  }
 0x603   :  { %6691 = vmatmul.mubr.msk.f32.vlgmr.msra.gmra.mrb[18].mxu1 %vm140_vm0, %v7574_v12 }
 0x604   :  { %6712 = vmatprep.mubr.msk.f32.mxu1 %vm140_vm0, %v7564_v5  ;;  %7183 = vmatpush3.bf16.msra.mxu1 %v7180_v3  ;;  %v6102_v3 = vld [vmem:[%s7558_s13 + $0x78] sm:$0xff] }
 0x605   :  { %7185 = vmatprep.subr.bf16.mxu1 %v7184_v6  ;;  %v7200_v10 = vpack.c.bf16 %v6102_v3, %v6101_v2 }
 0x607   :  { %v6126_v60 = vld [vmem:[%s5982_s11] ss:$0 sm:$0xff]  ;;  %s5997_s11 = sld [smem:[%s8234_s0 + %s7535_s6]]  }
 0x608   :  { %7187 = vmatpush3.bf16.msra.mxu1 %v7184_v6 }
 0x609   :  { %6720 = vmatprep.subr.mxu1 %v7511_v14 }
 0x60b   :  { %6713 = vmatmul.mubr.msk.f32.vlgmr.msra.gmra.mrb[20].mxu1 %vm140_vm0, %v7574_v12 }
 0x60c   :  { %6722 = vmatprep.mubr.msk.f32.mxu1 %vm7512_vm1, %v7511_v14 }
 0x6ca   :  { %v1228_v8 = vpop.f32.mrb[8].mxu0 }
 0x6cb   :  { %v6666_v13 = vpop.f32.mrb[9].mxu0  ;;  %6674 = vmatprep.mubr.msk.f32.mxu0 %vm394_vm2, %v1228_v8 }
 0x6ce   :  { %v1301_v16 = vpop.f32.mrb[16].mxu1 }
 0x6cf   :  { %v6671_v17 = vpop.f32.mrb[17].mxu1  ;;  %6675 = vmatmul.mubr.msk.f32.vlgmr.msra.gmra.mrb[10].mxu0 %vm394_vm2, %v1301_v16  ;;  %v6104_v16 = vld [vmem:[%s7588_s17 + $0x3] ss:$0 sm:$0xff]  ;;  %s7537_s17 = smov 19  }
 0x6d0   :  { %6678 = vmatpush3.msra.mxu0 %v717_v57  ;;  %6679 = vmatprep.mubr.msk.f32.mxu0 %vm394_vm2, %v7665_v9  ;;  %v6099_v57 = vld [vmem:[%s7558_s13 + $0x60] sm:$0xff]  ;;  %s7938_s13 = sld [smem:[%s8234_s0 + %s7528_s10]]  }
 0x6d1   :  { %7173 = vmatprep.subr.bf16.mxu0 %v7172_v15  ;;  %v7196_v59 = vpack.c.bf16 %v6100_v58, %v6099_v57  ;;  %s5992_s20 = sld [smem:[%s8234_s0 + %s7537_s17]]  }
 0x6d6   :  { %v6692_v9 = vpop.f32.mrb[18].mxu1 }
 0x6d7   :  { %6680 = vmatmul.mubr.msk.f32.vlgmr.msra.gmra.mrb[10].mxu0 %vm394_vm2, %v7663_v7  ;;  %v1548_v21 = vpop.f32.mrb[19].mxu1  ;;  %v6061_v7 = vld [vmem:[%s7593_s21 + $0x2] ss:$0 sm:$0xff]  ;;  %s7538_s21 = smov 21  }
 0x6d8   :  { %7175 = vmatpush3.bf16.msra.mxu0 %v7172_v15  ;;  %6701 = vmatprep.mubr.msk.f32.mxu0 %vm140_vm0, %v7564_v5  ;;  %v1554_v30 = vadd.f32 %v6692_v9, %v6061_v7  ;;  %v1549_v31 = vadd.f32 %v6061_v7, %v1548_v21  ;;  %v6109_v7 = vld [vmem:[%s7610_s25 + $0x70] sm:$0xff] }
 0x6d9   :  { %7177 = vmatprep.subr.bf16.mxu0 %v7176_v20 }
 0x6dc   :  { %7179 = vmatpush3.bf16.msra.mxu0 %v7176_v20 }
 0x6dd   :  { %6715 = vmatprep.subr.mxu0 %v7511_v14 }
 0x6de   :  { %v6714_v22 = vpop.f32.mrb[20].mxu1 }
 0x6df   :  { %6702 = vmatmul.mubr.msk.f32.vlgmr.msra.gmra.mrb[12].mxu0 %vm140_vm0, %v7574_v12  ;;  %v1724_v23 = vpop.f32.mrb[21].mxu1  ;;  %v1730_v32 = vadd.f32 %v6714_v22, %v6077_v26 }
 0x6e0   :  { %6717 = vmatprep.mubr.msk.f32.mxu0 %vm7512_vm1, %v7511_v14  ;;  %v1725_v33 = vadd.f32 %v6077_v26, %v1724_v23  ;;  %v6107_v23 = vld [vmem:[%s7610_s25 + $0x60] sm:$0xff]  ;;  %v6110_v26 = vld [vmem:[%s7610_s25 + $0x78] sm:$0xff] }
 0x7b2   :  { %v6703_v25 = vpop.f32.mrb[12].mxu0 }
 0x7b3   :  { %v1642_v27 = vadd.f32 %v6703_v25, %v6069_v24  ;;  %v1636_v28 = vpop.f32.mrb[13].mxu0 }
 0x7b4   :  { %v1637_v29 = vadd.f32 %v6069_v24, %v1636_v28  ;;  %v6108_v24 = vld [vmem:[%s7610_s25 + $0x68] sm:$0xff]  ;;  %s5994_s25 = sld [smem:[%s8234_s0 + %s7538_s21]]  }
 0x7b5   :  { %6721 = vmatpush3.xpose.msk.msra.mxu1 %vm394_vm2, %v1642_v27  ;;  %v7204_v25 = vpack.c.bf16 %v6108_v24, %v6107_v23  ;;  %v7208_v27 = vpack.c.bf16 %v6110_v26, %v6109_v7  ;;  %v7853_v23 = vld [vmem:[%s5974_s19] sm:$0xff]  ;;  %v7862_v24 = vld [vmem:[%s5974_s19 + $0x8] sm:$0xff]  ;;  %v7866_v7 = vld [vmem:[%s5974_s19 + $0x10] sm:$0xff] }
 0x7b6   :  { %6716 = vmatpush3.xpose.msk.msra.mxu0 %vm394_vm2, %v1637_v29  ;;  %6730 = vmatprep.subr.mxu1 %v7511_v14  ;;  %v2869_v26 = vld [vmem:[%s7858_s23] sm:$0xff] }
 0x7b7   :  { %6725 = vmatprep.subr.mxu0 %v7511_v14 }
 0x7b8   :  { %6723 = vmatmul.mubr.msk.f32.vlgmr.msra.gmra.mrb[22].mxu1 %vm394_vm2, %v1554_v30 }
 0x7b9   :  { %6718 = vmatmul.mubr.msk.f32.vlgmr.msra.gmra.mrb[14].mxu0 %vm394_vm2, %v1549_v31  ;;  %6731 = vmatpush3.msra.mxu1 %v1730_v32 }
 0x7ba   :  { %6726 = vmatpush3.msra.mxu0 %v1725_v33  ;;  %6732 = vmatprep.mubr.msk.f32.mxu1 %vm7512_vm1, %v7511_v14 }
 0x7bb   :  { %6727 = vmatprep.mubr.msk.f32.mxu0 %vm7512_vm1, %v7511_v14  ;;  %6735 = vmatprep.subr.mxu0 %v6088_v50 }
 0x7bc   :  { %7189 = vmatprep.subr.bf16.mxu1 %v7188_v62 }
 0x88b   :  { %v1881_v34 = vpop.f32.mrb[22].mxu1 }
 0x88c   :  { %v1805_v35 = vpop.f32.mrb[14].mxu0  ;;  %v6724_v36 = vpop.f32.mrb[23].mxu1  ;;  %v1888_v37 = vsel %vm394_vm2, %v1881_v34, -inf }
 0x88d   :  { %1889 = vmax.xlane.f32.xlu1 %v1888_v37  ;;  %v6719_v38 = vpop.f32.mrb[15].mxu0  ;;  %v1885_v39 = vsel %vm394_vm2, %v1805_v35, -inf }
 0x88e   :  { %1886 = vmax.xlane.f32.xlu0 %v1885_v39 }
 0x91a   :  { %v1890_v40 = vpop.xlane.xlu1 %1889 }
 0x91b   :  { %v1892_v41 = vsub.f32 %v1881_v34, %v1890_v40  ;;  %v1887_v42 = vpop.xlane.xlu0 %1886 }
 0x91c   :  { %v1891_v43 = vsub.f32 %v1805_v35, %v1887_v42 }
 0x91d   :  { %v1895_v44 = vmul.f32 1.442695, %v1892_v41 }
 0x91e   :  { %v1893_v45 = vmul.f32 1.442695, %v1891_v43 }
 0x91f   :  { %7449 = vpow2.f32 %v1895_v44 }
 0x920   :  { %7451 = vpow2.f32 %v1893_v45  ;;  %v6112_v45 = vld [vmem:[%s7628_s29 + $0x3] ss:$0 sm:$0xff] }
 0x929   :  { %v7450_v46 = vpop.eup %7449 }
 0x92a   :  { %v7452_v47 = vpop.eup %7451  ;;  %v1900_v48 = vsel %vm394_vm2, %v7450_v46, 0.0 }
 0x92b   :  { %1901 = vadd.xlane.f32.xlu1 %v1900_v48  ;;  %v1897_v49 = vsel %vm394_vm2, %v7452_v47, 0.0 }
 0x92c   :  { %1898 = vadd.xlane.f32.xlu0 %v1897_v49 }
 0x9b8   :  { %v1902_v51 = vpop.xlane.xlu1 %1901 }
 0x9b9   :  { %7453 = vrcp.f32 %v1902_v51  ;;  %v1899_v52 = vpop.xlane.xlu0 %1898 }
 0x9ba   :  { %7455 = vrcp.f32 %v1899_v52 }
 0x9c3   :  { %v7454_v53 = vpop.eup %7453 }
 0x9c4   :  { %v7456_v54 = vpop.eup %7455  ;;  %v1906_v55 = vmul.f32 %v7454_v53, %v7450_v46 }
 0x9c5   :  { %v1905_v56 = vmul.f32 %v7456_v54, %v7452_v47 }
 0x9c6   :  { %6085 = vst.msk [vmem:[%s7638_s3 + $0x28] sm:$0xff] %vm394_vm2, %v1906_v55  ;;  %6733 = vmatmul.mubr.msk.f32.vlgmr.msra.gmra.mrb[24].mxu1 %vm394_vm2, %v1906_v55  ;;  %v6123_v55 = vld [vmem:[%s7704_s8 + $0x18] sm:$0xff]  ;;  %s8195_s8 = sld [smem:[%s8234_s0 + %s7534_s4]]  }
 0x9c7   :  { %6084 = vst.msk [vmem:[%s7638_s3 + $0x20] sm:$0xff] %vm394_vm2, %v1905_v56  ;;  %6728 = vmatmul.mubr.msk.f32.vlgmr.msra.gmra.mrb[16].mxu0 %vm394_vm2, %v1905_v56  ;;  %6748 = vmatprep.mubr.msk.f32.mxu1 %vm140_vm0, %v7564_v5 }
 0x9c8   :  { %6736 = vmatpush3.msra.mxu0 %v6088_v50  ;;  %7191 = vmatpush3.bf16.msra.mxu1 %v7188_v62 }
 0x9c9   :  { %7197 = vmatprep.subr.bf16.mxu0 %v7196_v59  ;;  %7193 = vmatprep.subr.bf16.mxu1 %v7192_v1 }
 0x9cc   :  { %7195 = vmatpush3.bf16.msra.mxu1 %v7192_v1 }
 0x9cd   :  { %7205 = vmatprep.subr.bf16.mxu1 %v7204_v25 }
 0x9cf   :  { %6749 = vmatmul.mubr.msk.f32.vlgmr.msra.gmra.mrb[26].mxu1 %vm140_vm0, %v7574_v12 }
 0x9d0   :  { %6770 = vmatprep.mubr.msk.f32.mxu1 %vm140_vm0, %v7564_v5  ;;  %7207 = vmatpush3.bf16.msra.mxu1 %v7204_v25  ;;  %v7870_v25 = vld [vmem:[%s5974_s19 + $0x18] sm:$0xff]  ;;  %s7530_s19 = smov 30  }
 0x9d1   :  { %7209 = vmatprep.subr.bf16.mxu1 %v7208_v27  ;;  %s7964_s22 = sld [smem:[%s8234_s0 + %s7530_s19]]  }
 0x9d4   :  { %7211 = vmatpush3.bf16.msra.mxu1 %v7208_v27  ;;  %v2870_v27 = vld [vmem:[%s7858_s23 + $0x8] sm:$0xff] }
 0x9d5   :  { %6783 = vmatprep.subr.mxu1 %v7511_v14 }
 0x9d7   :  { %6771 = vmatmul.mubr.msk.f32.vlgmr.msra.gmra.mrb[28].mxu1 %vm140_vm0, %v7574_v12 }
 0x9d8   :  { %6785 = vmatprep.mubr.msk.f32.mxu1 %vm7512_vm1, %v7511_v14 }
 0xa99   :  { %v2052_v4 = vpop.f32.mrb[24].mxu1 }
 0xa9a   :  { %v1979_v6 = vpop.f32.mrb[16].mxu0  ;;  %v6734_v8 = vpop.f32.mrb[25].mxu1 }
 0xa9b   :  { %v6729_v11 = vpop.f32.mrb[17].mxu0  ;;  %6737 = vmatprep.mubr.msk.f32.mxu0 %vm394_vm2, %v1979_v6 }
 0xa9c   :  { %6738 = vmatmul.mubr.msk.f32.vlgmr.msra.gmra.mrb[10].mxu0 %vm394_vm2, %v2052_v4 }
 0xa9d   :  { %7199 = vmatpush3.bf16.msra.mxu0 %v7196_v59  ;;  %6759 = vmatprep.mubr.msk.f32.mxu0 %vm140_vm0, %v7564_v5 }
 0xa9e   :  { %7201 = vmatprep.subr.bf16.mxu0 %v7200_v10 }
 0xaa1   :  { %7203 = vmatpush3.bf16.msra.mxu0 %v7200_v10 }
 0xaa2   :  { %6773 = vmatprep.subr.mxu0 %v7511_v14  ;;  %v6750_v13 = vpop.f32.mrb[26].mxu1 }
 0xaa3   :  { %v2220_v15 = vpop.f32.mrb[27].mxu1  ;;  %v2226_v22 = vadd.f32 %v6750_v13, %v6096_v18 }
 0xaa4   :  { %6760 = vmatmul.mubr.msk.f32.vlgmr.msra.gmra.mrb[18].mxu0 %vm140_vm0, %v7574_v12  ;;  %v2221_v9 = vadd.f32 %v6096_v18, %v2220_v15  ;;  %v2961_v18 = vld [vmem:[%s7844_s15] sm:$0xff] }
 0xaa5   :  { %6775 = vmatprep.mubr.msk.f32.mxu0 %vm7512_vm1, %v7511_v14 }
 0xaaa   :  { %v6772_v44 = vpop.f32.mrb[28].mxu1 }
 0xaab   :  { %v2396_v46 = vpop.f32.mrb[29].mxu1  ;;  %v2402_v48 = vadd.f32 %v6772_v44, %v6112_v45 }
 0xaac   :  { %v2397_v47 = vadd.f32 %v6112_v45, %v2396_v46 }
 0xaae   :  { %6784 = vmatpush3.msra.mxu1 %v2397_v47  ;;  %v6128_v47 = vld [vmem:[%s5996_s5] ss:$0 sm:$0xff]  ;;  %s6001_s5 = sld [smem:[%s8234_s0 + %s7541_s2]]  }
 0xb77   :  { %v6761_v17 = vpop.f32.mrb[18].mxu0 }
 0xb78   :  { %v2308_v19 = vpop.f32.mrb[19].mxu0  ;;  %v2314_v21 = vadd.f32 %v6761_v17, %v6104_v16 }
 0xb79   :  { %v2309_v20 = vadd.f32 %v6104_v16, %v2308_v19  ;;  %v2962_v19 = vld [vmem:[%s7844_s15 + $0x8] sm:$0xff] }
 0xb7b   :  { %6774 = vmatpush3.xpose.msk.msra.mxu0 %vm394_vm2, %v2309_v20  ;;  %v7220_v20 = vpack.c.bf16 %v2962_v19, %v2961_v18 }
 0xb7c   :  { %6778 = vmatprep.subr.mxu0 %v7511_v14 }
 0xb7e   :  { %6776 = vmatmul.mubr.msk.f32.vlgmr.msra.gmra.mrb[20].mxu0 %vm394_vm2, %v2221_v9  ;;  %v2963_v9 = vld [vmem:[%s7844_s15 + $0x10] sm:$0xff] }
 0xb7f   :  { %6779 = vmatpush3.xpose.msk.msra.mxu0 %vm394_vm2, %v2314_v21  ;;  %6780 = vmatprep.mubr.msk.f32.mxu0 %vm7512_vm1, %v7511_v14  ;;  %v2964_v21 = vld [vmem:[%s7844_s15 + $0x18] sm:$0xff] }
 0xb80   :  { %6788 = vmatprep.subr.mxu0 %v7511_v14 }
 0xb82   :  { %6781 = vmatmul.mubr.msk.f32.vlgmr.msra.gmra.mrb[22].mxu0 %vm394_vm2, %v2226_v22  ;;  %v7224_v22 = vpack.c.bf16 %v2964_v21, %v2963_v9 }
 0xb83   :  { %6790 = vmatprep.mubr.msk.f32.mxu0 %vm7512_vm1, %v7511_v14  ;;  %6789 = vmatpush3.msra.mxu0 %v2402_v48 }
 0xb84   :  { %6793 = vmatprep.subr.mxu0 %v6123_v55 }
 0xc51   :  { %v2477_v28 = vpop.f32.mrb[20].mxu0 }
 0xc52   :  { %v6777_v29 = vpop.f32.mrb[21].mxu0  ;;  %v2557_v30 = vsel %vm394_vm2, %v2477_v28, -inf }
 0xc53   :  { %2558 = vmax.xlane.f32.xlu0 %v2557_v30  ;;  %v2871_v29 = vld [vmem:[%s7858_s23 + $0x10] sm:$0xff]  ;;  %v2872_v30 = vld [vmem:[%s7858_s23 + $0x18] sm:$0xff] }
 0xc55   :  { %v2553_v31 = vpop.f32.mrb[22].mxu0 }
 0xc56   :  { %v6782_v32 = vpop.f32.mrb[23].mxu0  ;;  %v2560_v33 = vsel %vm394_vm2, %v2553_v31, -inf }
 0xc57   :  { %2561 = vmax.xlane.f32.xlu1 %v2560_v33  ;;  %v3069_v32 = vld [vmem:[%s7883_s27] sm:$0xff]  ;;  %v3070_v33 = vld [vmem:[%s7883_s27 + $0x8] sm:$0xff] }
 0xce0   :  { %v2559_v34 = vpop.xlane.xlu0 %2558 }
 0xce1   :  { %v2563_v35 = vsub.f32 %v2477_v28, %v2559_v34  ;;  %v7212_v28 = vpack.c.bf16 %v2870_v27, %v2869_v26  ;;  %v7228_v34 = vpack.c.bf16 %v3070_v33, %v3069_v32 }
 0xce3   :  { %v2565_v36 = vmul.f32 1.442695, %v2563_v35  ;;  %7213 = vmatprep.subr.bf16.mxu1 %v7212_v28  ;;  %v7524_v35 = vmov 0.0|0.0  }
 0xce4   :  { %v2562_v37 = vpop.xlane.xlu1 %2561 }
 0xce5   :  { %7457 = vpow2.f32 %v2565_v36  ;;  %v2564_v38 = vsub.f32 %v2553_v31, %v2562_v37  ;;  %v7216_v31 = vpack.c.bf16 %v2872_v30, %v2871_v29 }
 0xce7   :  { %v2567_v39 = vmul.f32 1.442695, %v2564_v38 }
 0xce9   :  { %7459 = vpow2.f32 %v2567_v39 }
 0xcef   :  { %v7458_v40 = vpop.eup %7457 }
 0xcf0   :  { %v2569_v41 = vsel %vm394_vm2, %v7458_v40, 0.0 }
 0xcf1   :  { %2570 = vadd.xlane.f32.xlu0 %v2569_v41 }
 0xcf3   :  { %v7460_v42 = vpop.eup %7459 }
 0xcf4   :  { %v2572_v43 = vsel %vm394_vm2, %v7460_v42, 0.0 }
 0xcf5   :  { %2573 = vadd.xlane.f32.xlu1 %v2572_v43  ;;  %v6127_v43 = vld [vmem:[%s5995_s1] ss:$0 sm:$0xff] }
 0xd7e   :  { %v2571_v49 = vpop.xlane.xlu0 %2570 }
 0xd7f   :  { %7461 = vrcp.f32 %v2571_v49 }
 0xd82   :  { %v2574_v50 = vpop.xlane.xlu1 %2573 }
 0xd83   :  { %7463 = vrcp.f32 %v2574_v50  ;;  %v3071_v50 = vld [vmem:[%s7883_s27 + $0x10] sm:$0xff] }
 0xd89   :  { %v7462_v51 = vpop.eup %7461 }
 0xd8a   :  { %v2577_v52 = vmul.f32 %v7462_v51, %v7458_v40  ;;  %v3072_v51 = vld [vmem:[%s7883_s27 + $0x18] sm:$0xff] }
 0xd8c   :  { %6119 = vst.msk [vmem:[%s7638_s3 + $0x30] sm:$0xff] %vm394_vm2, %v2577_v52  ;;  %6786 = vmatmul.mubr.msk.f32.vlgmr.msra.gmra.mrb[30].mxu1 %vm394_vm2, %v2577_v52 }
 0xd8d   :  { %v7464_v53 = vpop.eup %7463  ;;  %7215 = vmatpush3.bf16.msra.mxu1 %v7212_v28 }
 0xd8e   :  { %v2578_v54 = vmul.f32 %v7464_v53, %v7460_v42  ;;  %7217 = vmatprep.subr.bf16.mxu1 %v7216_v31 }
 0xd90   :  { %6120 = vst.msk [vmem:[%s7638_s3 + $0x38] sm:$0xff] %vm394_vm2, %v2578_v54  ;;  %6791 = vmatmul.mubr.msk.f32.vlgmr.msra.gmra.mrb[24].mxu0 %vm394_vm2, %v2578_v54  ;;  %v7232_v54 = vpack.c.bf16 %v3072_v51, %v3071_v50  ;;  %v6161_v50 = vld [vmem:[%s7844_s15 + $0x38] sm:$0xff]  ;;  %v6152_v51 = vld [vmem:[%s7858_s23 + $0x30] sm:$0xff]  ;;  %s5991_s3 = sld [smem:[%s8234_s0 + %s7533_s30]]  }
 0xd91   :  { %6794 = vmatpush3.msra.mxu0 %v6123_v55  ;;  %7219 = vmatpush3.bf16.msra.mxu1 %v7216_v31  ;;  %v6132_v55 = vld [vmem:[%s7920_s9] ss:$0 sm:$0xff] }
 0xd92   :  { %7221 = vmatprep.subr.bf16.mxu0 %v7220_v20  ;;  %7229 = vmatprep.subr.bf16.mxu1 %v7228_v34 }
 0xe5f   :  { %v2651_v56 = vpop.f32.mrb[30].mxu1 }
 0xe60   :  { %v6787_v57 = vpop.f32.mrb[31].mxu1  ;;  %6795 = vmatprep.mubr.msk.f32.mxu0 %vm394_vm2, %v2651_v56 }
 0xe63   :  { %v2724_v58 = vpop.f32.mrb[24].mxu0 }
 0xe64   :  { %v6792_v59 = vpop.f32.mrb[25].mxu0  ;;  %6796 = vmatmul.mubr.msk.f32.vlgmr.msra.gmra.mrb[10].mxu0 %vm394_vm2, %v2724_v58 }
 0xe65   :  { %7223 = vmatpush3.bf16.msra.mxu0 %v7220_v20  ;;  %6817 = vmatprep.mubr.msk.f32.mxu0 %vm140_vm0, %v7853_v23 }
 0xe66   :  { %7225 = vmatprep.subr.bf16.mxu0 %v7224_v22 }
 0xe69   :  { %7227 = vmatpush3.bf16.msra.mxu0 %v7224_v22 }
 0xe6a   :  { %7236 = vmatprep.subr.bf16.mxu0 %v7524_v35 }
 0xe6c   :  { %6818 = vmatmul.mubr.msk.f32.vlgmr.msra.gmra.mrb[26].mxu0 %vm140_vm0, %v7862_v24 }
 0xe6d   :  { %6820 = vmatprep.mubr.msk.f32.mxu0 %vm140_vm0, %v7866_v7 }
 0xe70   :  { %6821 = vmatmul.mubr.msk.f32.gmra.mrb[28].mxu0 %vm140_vm0, %v7870_v25 }
 0xe71   :  { %6841 = vmatprep.mubr.msk.f32.mxu0 %vm7512_vm1, %v7511_v14 }
 0xf37   :  { %v6797_v61 = vpop.f32.mrb[10].mxu0 }
 0xf38   :  { %v2821_v62 = vadd.f32 %v6797_v61, %v6126_v60  ;;  %v2802_v63 = vpop.f32.mrb[11].mxu0 }
 0xf39   :  { %v2820_v0 = vadd.f32 %v6126_v60, %v2802_v63 }
 0xf3a   :  { %v2823_v1 = vadd.f32 %v2821_v62, %v7574_v12 }
 0xf3b   :  { %v2822_v2 = vadd.f32 %v2820_v0, %v7564_v5 }
 0xf3c   :  { %v2829_v3 = vsel %vm140_vm0, %v2823_v1, 0.0 }
 0xf3d   :  { %2830 = vadd.xlane.f32.xlu1 %v2829_v3  ;;  %v2826_v4 = vsel %vm140_vm0, %v2822_v2, 0.0  ;;  %v6129_v3 = vld [vmem:[%s7938_s13] ss:$0 sm:$0xff] }
 0xf3e   :  { %2827 = vadd.xlane.f32.xlu0 %v2826_v4 }
 0xf3f   :  { %v6819_v56 = vpop.f32.mrb[26].mxu0 }
 0xf40   :  { %v3056_v57 = vadd.f32 %v6819_v56, %v6132_v55  ;;  %v3050_v58 = vpop.f32.mrb[27].mxu0 }
 0xf41   :  { %v3051_v59 = vadd.f32 %v6132_v55, %v3050_v58 }
 0xf43   :  { %v7237_v61 = vpack.c.bf16 %v3056_v57, %v3051_v59  ;;  %v6822_v62 = vpop.f32.mrb[28].mxu0 }
 0xf44   :  { %v3066_v63 = vadd.f32 %v6822_v62, %v6132_v55  ;;  %v3060_v0 = vpop.f32.mrb[29].mxu0  ;;  %v6168_v62 = vld [vmem:[%s7883_s27 + $0x20] sm:$0xff] }
 0xf45   :  { %7239 = vmatpush3.bf16.xpose.msk.msra.mxu0 %vm7925_vm3, %v7237_v61 }
 0xf46   :  { %7244 = vmatprep.subr.bf16.mxu0 %v7524_v35 }
 0xfca   :  { %v2831_v6 = vpop.xlane.xlu1 %2830 }
 0xfcb   :  { %v2834_v8 = vmul.f32 0.03125, %v2831_v6  ;;  %v2828_v10 = vpop.xlane.xlu0 %2827 }
 0xfcc   :  { %v2833_v11 = vmul.f32 0.03125, %v2828_v10 }
 0xfcd   :  { %v7831_v13 = vsub.f32 %v2823_v1, %v2834_v8  ;;  %v3061_v1 = vadd.f32 %v6132_v55, %v3060_v0 }
 0xfce   :  { %v7833_v15 = vsub.f32 %v2822_v2, %v2833_v11  ;;  %v6137_v11 = vld [vmem:[%s7944_s18] ss:$0 sm:$0xff] }
 0xfcf   :  { %v2838_v16 = vmul.f32 %v7831_v13, %v7831_v13  ;;  %v7241_v2 = vpack.c.bf16 %v3066_v63, %v3061_v1  ;;  %v6169_v63 = vld [vmem:[%s7883_s27 + $0x28] sm:$0xff]  ;;  %v6170_v1 = vld [vmem:[%s7883_s27 + $0x30] sm:$0xff] }
 0xfd0   :  { %v2837_v5 = vmul.f32 %v7833_v15, %v7833_v15  ;;  %v7266_v0 = vpack.c.bf16 %v6169_v63, %v6168_v62  ;;  %v6193_v62 = vld [vmem:[%s7858_s23 + $0x40] sm:$0xff]  ;;  %v6194_v63 = vld [vmem:[%s7858_s23 + $0x48] sm:$0xff] }
 0xfd1   :  { %v2842_v12 = vsel %vm140_vm0, %v2838_v16, 0.0 }
 0xfd2   :  { %2843 = vadd.xlane.f32.xlu1 %v2842_v12  ;;  %v2839_v17 = vsel %vm140_vm0, %v2837_v5, 0.0 }
 0xfd3   :  { %2840 = vadd.xlane.f32.xlu0 %v2839_v17 }
0x105f   :  { %v2844_v36 = vpop.xlane.xlu1 %2843 }
0x1060   :  { %v2846_v37 = vmul.f32 0.03125, %v2844_v36  ;;  %v2841_v38 = vpop.xlane.xlu0 %2840 }
0x1061   :  { %v2845_v39 = vmul.f32 0.03125, %v2841_v38 }
0x1062   :  { %v2848_v40 = vadd.f32 1e-05, %v2846_v37 }
0x1063   :  { %v2847_v41 = vadd.f32 1e-05, %v2845_v39 }
0x1064   :  { %7465 = vrsqrt.f32 %v2848_v40 }
0x1065   :  { %7467 = vrsqrt.f32 %v2847_v41  ;;  %v6158_v41 = vld [vmem:[%s7844_s15 + $0x20] sm:$0xff] }
0x106e   :  { %v7466_v42 = vpop.eup %7465 }
0x106f   :  { %v7468_v44 = vpop.eup %7467  ;;  %v2852_v45 = vmul.f32 %v7466_v42, %v7831_v13  ;;  %v6159_v42 = vld [vmem:[%s7844_s15 + $0x28] sm:$0xff] }
0x1070   :  { %v2851_v46 = vmul.f32 %v7468_v44, %v7833_v15  ;;  %v6150_v44 = vld [vmem:[%s7858_s23 + $0x20] sm:$0xff] }
0x1071   :  { %v2860_v48 = vmul.f32 %v6127_v43, %v2852_v45  ;;  %v6151_v45 = vld [vmem:[%s7858_s23 + $0x28] sm:$0xff] }
0x1072   :  { %v2859_v49 = vmul.f32 %v6127_v43, %v2851_v46  ;;  %v7258_v43 = vpack.c.bf16 %v6159_v42, %v6158_v41  ;;  %v7250_v46 = vpack.c.bf16 %v6151_v45, %v6150_v44 }
0x1073   :  { %v7900_v53 = vadd.f32 %v6128_v47, %v2860_v48 }
0x1074   :  { %v7898_v52 = vadd.f32 %v6128_v47, %v2859_v49  ;;  %v6160_v49 = vld [vmem:[%s7844_s15 + $0x30] sm:$0xff] }
0x1075   :  { %v7262_v59 = vpack.c.bf16 %v6161_v50, %v6160_v49 }
0x1076   :  { %6806 = vmatprep.mubr.msk.f32.mxu1 %vm140_vm0, %v7898_v52 }
0x1077   :  { %6807 = vmatmul.mubr.msk.f32.vlgmr.msra.gmra.mrb[32].mxu1 %vm140_vm0, %v7900_v53 }
0x1078   :  { %7231 = vmatpush3.bf16.msra.mxu1 %v7228_v34  ;;  %6831 = vmatprep.mubr.msk.f32.mxu1 %vm140_vm0, %v7853_v23 }
0x1079   :  { %7233 = vmatprep.subr.bf16.mxu1 %v7232_v54 }
0x107c   :  { %7235 = vmatpush3.bf16.msra.mxu1 %v7232_v54  ;;  %v6153_v54 = vld [vmem:[%s7858_s23 + $0x38] sm:$0xff] }
0x107d   :  { %7240 = vmatprep.subr.bf16.mxu1 %v7524_v35  ;;  %v7254_v61 = vpack.c.bf16 %v6153_v54, %v6152_v51 }
0x107f   :  { %6832 = vmatmul.mubr.msk.f32.vlgmr.msra.gmra.mrb[34].mxu1 %vm140_vm0, %v7862_v24 }
0x1080   :  { %6834 = vmatprep.mubr.msk.f32.mxu1 %vm140_vm0, %v7866_v7 }
0x1083   :  { %6835 = vmatmul.mubr.msk.f32.gmra.mrb[36].mxu1 %vm140_vm0, %v7870_v25 }
0x1084   :  { %6848 = vmatprep.mubr.msk.f32.mxu1 %vm7512_vm1, %v7511_v14 }
0x1085   :  { %7243 = vmatpush3.bf16.xpose.msk.msra.mxu1 %vm7925_vm3, %v7241_v2  ;;  %v6171_v2 = vld [vmem:[%s7883_s27 + $0x38] sm:$0xff] }
0x1086   :  { %7247 = vmatprep.subr.bf16.mxu1 %v7524_v35 }
0x114a   :  { %v6808_v4 = vpop.f32.mrb[32].mxu1 }
0x114b   :  { %v2958_v6 = vadd.f32 %v6808_v4, %v6129_v3  ;;  %v2952_v8 = vpop.f32.mrb[33].mxu1 }
0x114c   :  { %v2953_v10 = vadd.f32 %v6129_v3, %v2952_v8  ;;  %v7270_v3 = vpack.c.bf16 %v6171_v2, %v6170_v1  ;;  %v7288_v2 = vpack.c.bf16 %v6194_v63, %v6193_v62 }
0x114d   :  { %6849 = vmatmul.mubr.msk.f32.vlgmr.msra.gmra.mrb[38].mxu1 %vm394_vm2, %v2958_v6 }
0x114e   :  { %6842 = vmatmul.mubr.msk.f32.vlgmr.msra.gmra.mrb[30].mxu0 %vm394_vm2, %v2953_v10  ;;  %6862 = vmatprep.mubr.msk.f32.mxu1 %vm7512_vm1, %v7511_v14 }
0x114f   :  { %6855 = vmatprep.mubr.msk.f32.mxu0 %vm7512_vm1, %v7511_v14 }
0x1152   :  { %v6833_v13 = vpop.f32.mrb[34].mxu1 }
0x1153   :  { %v3152_v15 = vadd.f32 %v6833_v13, %v6137_v11  ;;  %v3146_v16 = vpop.f32.mrb[35].mxu1 }
0x1154   :  { %v3147_v5 = vadd.f32 %v6137_v11, %v3146_v16 }
0x1156   :  { %v7245_v12 = vpack.c.bf16 %v3152_v15, %v3147_v5  ;;  %v6836_v17 = vpop.f32.mrb[36].mxu1 }
0x1157   :  { %v3162_v18 = vadd.f32 %v6836_v17, %v6137_v11  ;;  %v3156_v19 = vpop.f32.mrb[37].mxu1 }
0x1158   :  { %v3157_v20 = vadd.f32 %v6137_v11, %v3156_v19  ;;  %7246 = vmatpush3.bf16.msra.mxu0 %v7245_v12  ;;  %v6163_v11 = vld [vmem:[%s7920_s9 + $0x1] ss:$0 sm:$0xff] }
0x1159   :  { %7251 = vmatprep.subr.bf16.mxu0 %v7250_v46 }
0x115a   :  { %v7248_v9 = vpack.c.bf16 %v3162_v18, %v3157_v20 }
0x115c   :  { %7249 = vmatpush3.bf16.msra.mxu1 %v7248_v9 }
0x115d   :  { %7259 = vmatprep.subr.bf16.mxu1 %v7258_v43 }
0x1220   :  { %v3319_v21 = vpop.f32.mrb[38].mxu1 }
0x1221   :  { %v3240_v22 = vpop.f32.mrb[30].mxu0  ;;  %v6850_v26 = vpop.f32.mrb[39].mxu1  ;;  %v3327_v27 = vsel %vm3323_vm4, %v3319_v21, -inf }
0x1222   :  { %3328 = vmax.xlane.f32.xlu0 %v3327_v27  ;;  %v6843_v28 = vpop.f32.mrb[31].mxu0  ;;  %v3324_v29 = vsel %vm3323_vm4, %v3240_v22, -inf }
0x1223   :  { %3325 = vmax.xlane.f32.xlu1 %v3324_v29  ;;  %v6173_v29 = vld [vmem:[%s7944_s18 + $0x1] ss:$0 sm:$0xff] }
0x12af   :  { %v3329_v30 = vpop.xlane.xlu0 %3328 }
0x12b0   :  { %v3331_v31 = vsub.f32 %v3319_v21, %v3329_v30  ;;  %v3326_v32 = vpop.xlane.xlu1 %3325 }
0x12b1   :  { %v3330_v33 = vsub.f32 %v3240_v22, %v3326_v32  ;;  %v6155_v22 = vld [vmem:[%s7938_s13 + $0x1] ss:$0 sm:$0xff] }
0x12b2   :  { %v3334_v34 = vmul.f32 1.442695, %v3331_v31 }
0x12b3   :  { %v3332_v36 = vmul.f32 1.442695, %v3330_v33 }
0x12b4   :  { %7469 = vpow2.f32 %v3334_v34 }
0x12b5   :  { %7471 = vpow2.f32 %v3332_v36 }
0x12be   :  { %v7470_v37 = vpop.eup %7469 }
0x12bf   :  { %v7472_v38 = vpop.eup %7471  ;;  %v3339_v39 = vsel %vm3323_vm4, %v7470_v37, 0.0 }
0x12c0   :  { %3340 = vadd.xlane.f32.xlu0 %v3339_v39  ;;  %v3336_v40 = vsel %vm3323_vm4, %v7472_v38, 0.0 }
0x12c1   :  { %3337 = vadd.xlane.f32.xlu1 %v3336_v40 }
0x134d   :  { %v3341_v47 = vpop.xlane.xlu0 %3340 }
0x134e   :  { %7473 = vrcp.f32 %v3341_v47  ;;  %v3338_v48 = vpop.xlane.xlu1 %3337 }
0x134f   :  { %7475 = vrcp.f32 %v3338_v48 }
0x1358   :  { %v7474_v55 = vpop.eup %7473 }
0x1359   :  { %v7476_v56 = vpop.eup %7475  ;;  %v3345_v57 = vmul.f32 %v7474_v55, %v7470_v37 }
0x135a   :  { %v3344_v58 = vmul.f32 %v7476_v56, %v7472_v38 }
0x135b   :  { %3347 = vst.msk [vmem:[%s7964_s22 + $0x8] sm:$0xff] %vm3323_vm4, %v3345_v57  ;;  %6863 = vmatmul.mubr.msk.f32.vlgmr.msra.gmra.mrb[40].mxu1 %vm3323_vm4, %v3345_v57 }
0x135c   :  { %3346 = vst.msk [vmem:[%s7964_s22] sm:$0xff] %vm3323_vm4, %v3344_v58  ;;  %7261 = vmatpush3.bf16.msra.mxu1 %v7258_v43  ;;  %6856 = vmatmul.mubr.msk.f32.vlgmr.msra.gmra.mrb[32].mxu0 %vm3323_vm4, %v3344_v58 }
0x135d   :  { %7253 = vmatpush3.bf16.msra.mxu0 %v7250_v46  ;;  %6873 = vmatprep.mubr.msk.f32.mxu0 %vm140_vm0, %v7898_v52 }
0x135e   :  { %7263 = vmatprep.subr.bf16.mxu1 %v7262_v59  ;;  %7255 = vmatprep.subr.bf16.mxu0 %v7254_v61 }
0x135f   :  { %6884 = vmatprep.mubr.msk.f32.mxu1 %vm140_vm0, %v7853_v23 }
0x1360   :  { %7265 = vmatpush3.bf16.msra.mxu1 %v7262_v59 }
0x1361   :  { %7257 = vmatpush3.bf16.msra.mxu0 %v7254_v61  ;;  %7274 = vmatprep.subr.bf16.mxu1 %v7524_v35 }
0x1362   :  { %7267 = vmatprep.subr.bf16.mxu0 %v7266_v0 }
0x1363   :  { %6885 = vmatmul.mubr.msk.f32.vlgmr.msra.gmra.mrb[42].mxu1 %vm140_vm0, %v7862_v24 }
0x1364   :  { %6874 = vmatmul.mubr.msk.f32.vlgmr.msra.gmra.mrb[34].mxu0 %vm140_vm0, %v7900_v53  ;;  %6887 = vmatprep.mubr.msk.f32.mxu1 %vm140_vm0, %v7866_v7 }
0x1365   :  { %6898 = vmatprep.mubr.msk.f32.mxu0 %vm140_vm0, %v7853_v23  ;;  %7269 = vmatpush3.bf16.msra.mxu0 %v7266_v0 }
0x1366   :  { %7271 = vmatprep.subr.bf16.mxu0 %v7270_v3 }
0x1367   :  { %6888 = vmatmul.mubr.msk.f32.gmra.mrb[44].mxu1 %vm140_vm0, %v7870_v25 }
0x1368   :  { %6908 = vmatprep.mubr.msk.f32.mxu1 %vm7512_vm1, %v7511_v14 }
0x1369   :  { %7273 = vmatpush3.bf16.msra.mxu0 %v7270_v3  ;;  %v6195_v3 = vld [vmem:[%s7858_s23 + $0x50] sm:$0xff] }
0x136a   :  { %7278 = vmatprep.subr.bf16.mxu0 %v7524_v35 }
0x136c   :  { %6899 = vmatmul.mubr.msk.f32.vlgmr.msra.gmra.mrb[36].mxu0 %vm140_vm0, %v7862_v24 }
0x136d   :  { %6901 = vmatprep.mubr.msk.f32.mxu0 %vm140_vm0, %v7866_v7 }
0x1370   :  { %6902 = vmatmul.mubr.msk.f32.gmra.mrb[38].mxu0 %vm140_vm0, %v7870_v25 }
0x1371   :  { %6915 = vmatprep.mubr.msk.f32.mxu0 %vm7512_vm1, %v7511_v14 }
0x142e   :  { %v8006_v4 = vpop.f32.mrb[40].mxu1 }
0x142f   :  { %v8008_v6 = vpop.f32.mrb[32].mxu0  ;;  %v6864_v8 = vpop.f32.mrb[41].mxu1 }
0x1430   :  { %v6857_v10 = vpop.f32.mrb[33].mxu0  ;;  %v6196_v8 = vld [vmem:[%s7858_s23 + $0x58] sm:$0xff] }
0x1436   :  { %v6886_v13 = vpop.f32.mrb[42].mxu1 }
0x1437   :  { %v3668_v15 = vadd.f32 %v6886_v13, %v6163_v11  ;;  %v6875_v16 = vpop.f32.mrb[34].mxu0  ;;  %v3662_v5 = vpop.f32.mrb[43].mxu1  ;;  %v7292_v13 = vpack.c.bf16 %v6196_v8, %v6195_v3 }
0x1438   :  { %v3663_v12 = vadd.f32 %v6163_v11, %v3662_v5  ;;  %v3574_v17 = vpop.f32.mrb[35].mxu0  ;;  %v3580_v28 = vadd.f32 %v6875_v16, %v6155_v22  ;;  %v3494_v16 = vld [vmem:[%s8048_s28] sm:$0xff] }
0x1439   :  { %v3575_v27 = vadd.f32 %v6155_v22, %v3574_v17  ;;  %v6211_v5 = vld [vmem:[%s7883_s27 + $0x40] sm:$0xff] }
0x143a   :  { %v7275_v18 = vpack.c.bf16 %v3668_v15, %v3663_v12  ;;  %v6889_v19 = vpop.f32.mrb[44].mxu1  ;;  %v6188_v15 = vld [vmem:[%s8048_s28 + $0x8] sm:$0xff] }
0x143b   :  { %v3678_v20 = vadd.f32 %v6889_v19, %v6163_v11  ;;  %v3672_v9 = vpop.f32.mrb[45].mxu1  ;;  %v6212_v12 = vld [vmem:[%s7883_s27 + $0x48] sm:$0xff]  ;;  %v6201_v19 = vld [vmem:[%s7844_s15 + $0x40] sm:$0xff] }
0x143c   :  { %v3673_v21 = vadd.f32 %v6163_v11, %v3672_v9  ;;  %7277 = vmatpush3.bf16.xpose.msk.msra.mxu1 %vm7925_vm3, %v7275_v18  ;;  %v7304_v17 = vpack.c.bf16 %v6212_v12, %v6211_v5 }
0x143d   :  { %7282 = vmatprep.subr.bf16.mxu1 %v7524_v35 }
0x143e   :  { %v7279_v26 = vpack.c.bf16 %v3678_v20, %v3673_v21  ;;  %v6202_v20 = vld [vmem:[%s7844_s15 + $0x48] sm:$0xff] }
0x143f   :  { %v6900_v30 = vpop.f32.mrb[36].mxu0  ;;  %v7296_v21 = vpack.c.bf16 %v6202_v20, %v6201_v19  ;;  %v6234_v19 = vld [vmem:[%s7858_s23 + $0x60] sm:$0xff]  ;;  %v6235_v20 = vld [vmem:[%s7858_s23 + $0x68] sm:$0xff] }
0x1440   :  { %7281 = vmatpush3.bf16.xpose.msk.msra.mxu0 %vm7925_vm3, %v7279_v26  ;;  %v3766_v31 = vadd.f32 %v6900_v30, %v6173_v29  ;;  %v3760_v32 = vpop.f32.mrb[37].mxu0 }
0x1441   :  { %v3761_v33 = vadd.f32 %v6173_v29, %v3760_v32  ;;  %6932 = vmatprep.subr.mxu0 %v6188_v15 }
0x1443   :  { %6909 = vmatmul.mubr.msk.f32.vlgmr.msra.gmra.mrb[46].mxu1 %vm394_vm2, %v3575_v27  ;;  %v7283_v34 = vpack.c.bf16 %v3766_v31, %v3761_v33  ;;  %v6903_v36 = vpop.f32.mrb[38].mxu0  ;;  %v6203_v27 = vld [vmem:[%s7844_s15 + $0x50] sm:$0xff]  ;;  %v6206_v33 = vld [vmem:[%s7920_s9 + $0x2] ss:$0 sm:$0xff] }
0x1444   :  { %6922 = vmatprep.mubr.msk.f32.mxu1 %vm7512_vm1, %v7511_v14  ;;  %v3776_v37 = vadd.f32 %v6903_v36, %v6173_v29  ;;  %v3770_v38 = vpop.f32.mrb[39].mxu0 }
0x1445   :  { %v3771_v39 = vadd.f32 %v6173_v29, %v3770_v38  ;;  %7284 = vmatpush3.bf16.msra.mxu1 %v7283_v34 }
0x1446   :  { %7285 = vmatprep.subr.bf16.mxu1 %v7524_v35 }
0x1447   :  { %6916 = vmatmul.mubr.msk.f32.vlgmr.msra.gmra.mrb[40].mxu0 %vm394_vm2, %v3580_v28  ;;  %v7286_v40 = vpack.c.bf16 %v3776_v37, %v3771_v39  ;;  %v6204_v28 = vld [vmem:[%s7844_s15 + $0x58] sm:$0xff] }
0x1448   :  { %6933 = vmatpush3.msra.mxu0 %v6188_v15  ;;  %v7300_v29 = vpack.c.bf16 %v6204_v28, %v6203_v27  ;;  %v6236_v28 = vld [vmem:[%s7858_s23 + $0x70] sm:$0xff] }
0x1449   :  { %6937 = vmatprep.subr.mxu0 %v3494_v16 }
0x1516   :  { %v3854_v41 = vpop.f32.mrb[46].mxu1 }
0x1517   :  { %v6910_v42 = vpop.f32.mrb[47].mxu1  ;;  %v3937_v43 = vsel %vm3323_vm4, %v3854_v41, -inf }
0x1518   :  { %3938 = vmax.xlane.f32.xlu0 %v3937_v43 }
0x151a   :  { %v3933_v44 = vpop.f32.mrb[40].mxu0 }
0x151b   :  { %v6917_v45 = vpop.f32.mrb[41].mxu0  ;;  %v3940_v46 = vsel %vm3323_vm4, %v3933_v44, -inf }
0x151c   :  { %3941 = vmax.xlane.f32.xlu1 %v3940_v46 }
0x15a5   :  { %v3939_v47 = vpop.xlane.xlu0 %3938 }
0x15a6   :  { %v3943_v48 = vsub.f32 %v3854_v41, %v3939_v47 }
0x15a8   :  { %v3945_v49 = vmul.f32 1.442695, %v3943_v48  ;;  %v6216_v48 = vld [vmem:[%s7944_s18 + $0x2] ss:$0 sm:$0xff] }
0x15a9   :  { %v3942_v50 = vpop.xlane.xlu1 %3941 }
0x15aa   :  { %7477 = vpow2.f32 %v3945_v49  ;;  %v3944_v51 = vsub.f32 %v3933_v44, %v3942_v50  ;;  %v6198_v44 = vld [vmem:[%s7938_s13 + $0x2] ss:$0 sm:$0xff] }
0x15ac   :  { %v3947_v54 = vmul.f32 1.442695, %v3944_v51 }
0x15ae   :  { %7479 = vpow2.f32 %v3947_v54 }
0x15b4   :  { %v7478_v55 = vpop.eup %7477 }
0x15b5   :  { %v3949_v56 = vsel %vm3323_vm4, %v7478_v55, 0.0 }
0x15b6   :  { %3950 = vadd.xlane.f32.xlu0 %v3949_v56 }
0x15b8   :  { %v7480_v57 = vpop.eup %7479 }
0x15b9   :  { %v3952_v58 = vsel %vm3323_vm4, %v7480_v57, 0.0 }
0x15ba   :  { %3953 = vadd.xlane.f32.xlu1 %v3952_v58 }
0x1643   :  { %v3951_v59 = vpop.xlane.xlu0 %3950 }
0x1644   :  { %7481 = vrcp.f32 %v3951_v59 }
0x1647   :  { %v3954_v61 = vpop.xlane.xlu1 %3953 }
0x1648   :  { %7483 = vrcp.f32 %v3954_v61 }
0x164e   :  { %v7482_v0 = vpop.eup %7481 }
0x164f   :  { %v3957_v1 = vmul.f32 %v7482_v0, %v7478_v55 }
0x1651   :  { %6184 = vst.msk [vmem:[%s7964_s22 + $0x10] sm:$0xff] %vm3323_vm4, %v3957_v1  ;;  %6923 = vmatmul.mubr.msk.f32.vlgmr.msra.gmra.mrb[48].mxu1 %vm3323_vm4, %v3957_v1 }
0x1652   :  { %v7484_v10 = vpop.eup %7483  ;;  %7287 = vmatpush3.bf16.msra.mxu1 %v7286_v40  ;;  %6929 = vmatprep.mubr.msk.f32.mxu1 %vm7512_vm1, %v7511_v14 }
0x1653   :  { %v3958_v11 = vmul.f32 %v7484_v10, %v7480_v57  ;;  %7289 = vmatprep.subr.bf16.mxu1 %v7288_v2 }
0x1655   :  { %6185 = vst.msk [vmem:[%s7964_s22 + $0x18] sm:$0xff] %vm3323_vm4, %v3958_v11  ;;  %6930 = vmatmul.mubr.msk.f32.vlgmr.msra.gmra.mrb[50].mxu1 %vm3323_vm4, %v3958_v11 }
0x1656   :  { %7291 = vmatpush3.bf16.msra.mxu1 %v7288_v2  ;;  %6950 = vmatprep.mubr.msk.f32.mxu1 %vm140_vm0, %v7898_v52 }
0x1657   :  { %7293 = vmatprep.subr.bf16.mxu1 %v7292_v13 }
0x165a   :  { %7295 = vmatpush3.bf16.msra.mxu1 %v7292_v13 }
0x165b   :  { %7305 = vmatprep.subr.bf16.mxu1 %v7304_v17 }
0x165d   :  { %6951 = vmatmul.mubr.msk.f32.vlgmr.msra.gmra.mrb[52].mxu1 %vm140_vm0, %v7900_v53 }
0x165e   :  { %6975 = vmatprep.mubr.msk.f32.mxu1 %vm140_vm0, %v7853_v23  ;;  %7307 = vmatpush3.bf16.msra.mxu1 %v7304_v17 }
0x1724   :  { %v4031_v18 = vpop.f32.mrb[48].mxu1 }
0x1725   :  { %v6924_v9 = vpop.f32.mrb[49].mxu1  ;;  %6934 = vmatprep.mubr.msk.f32.mxu0 %vm394_vm2, %v4031_v18 }
0x1726   :  { %v7326_v9 = vpack.c.bf16 %v6235_v20, %v6234_v19 }
0x1728   :  { %v4104_v22 = vpop.f32.mrb[50].mxu1 }
0x1729   :  { %v6931_v26 = vpop.f32.mrb[51].mxu1  ;;  %6935 = vmatmul.mubr.msk.f32.vlgmr.msra.gmra.mrb[42].mxu0 %vm394_vm2, %v4104_v22 }
0x172a   :  { %6938 = vmatpush3.msra.mxu0 %v3494_v16  ;;  %6939 = vmatprep.mubr.msk.f32.mxu0 %vm394_vm2, %v8008_v6  ;;  %v6214_v6 = vld [vmem:[%s7883_s27 + $0x58] sm:$0xff] }
0x172b   :  { %7297 = vmatprep.subr.bf16.mxu0 %v7296_v21 }
0x1730   :  { %v6952_v30 = vpop.f32.mrb[52].mxu1 }
0x1731   :  { %v4351_v31 = vpop.f32.mrb[53].mxu1  ;;  %6940 = vmatmul.mubr.msk.f32.vlgmr.msra.gmra.mrb[42].mxu0 %vm394_vm2, %v8006_v4  ;;  %v6213_v4 = vld [vmem:[%s7883_s27 + $0x50] sm:$0xff]  ;;  %v4357_v47 = vadd.f32 %v6952_v30, %v6198_v44 }
0x1732   :  { %7299 = vmatpush3.bf16.msra.mxu0 %v7296_v21  ;;  %6961 = vmatprep.mubr.msk.f32.mxu0 %vm140_vm0, %v7853_v23  ;;  %v7308_v32 = vpack.c.bf16 %v6214_v6, %v6213_v4  ;;  %v4352_v46 = vadd.f32 %v6198_v44, %v4351_v31  ;;  %v6231_v6 = vld [vmem:[%s8048_s28 + $0x10] sm:$0xff] }
0x1733   :  { %7301 = vmatprep.subr.bf16.mxu0 %v7300_v29 }
0x1734   :  { %7309 = vmatprep.subr.bf16.mxu1 %v7308_v32 }
0x1735   :  { %7311 = vmatpush3.bf16.msra.mxu1 %v7308_v32  ;;  %v6242_v32 = vld [vmem:[%s7844_s15 + $0x60] sm:$0xff] }
0x1736   :  { %7303 = vmatpush3.bf16.msra.mxu0 %v7300_v29  ;;  %7316 = vmatprep.subr.bf16.mxu1 %v7524_v35  ;;  %v6237_v29 = vld [vmem:[%s7858_s23 + $0x78] sm:$0xff]  ;;  %s5999_s23 = sld [smem:[%s8234_s0 + %s7539_s26]]  }
0x1737   :  { %7312 = vmatprep.subr.bf16.mxu0 %v7524_v35  ;;  %v7330_v4 = vpack.c.bf16 %v6237_v29, %v6236_v28 }
0x1738   :  { %6976 = vmatmul.mubr.msk.f32.vlgmr.msra.gmra.mrb[54].mxu1 %vm140_vm0, %v7862_v24 }
0x1739   :  { %6962 = vmatmul.mubr.msk.f32.vlgmr.msra.gmra.mrb[44].mxu0 %vm140_vm0, %v7862_v24  ;;  %6978 = vmatprep.mubr.msk.f32.mxu1 %vm140_vm0, %v7866_v7 }
0x173a   :  { %6964 = vmatprep.mubr.msk.f32.mxu0 %vm140_vm0, %v7866_v7 }
0x173c   :  { %6979 = vmatmul.mubr.msk.f32.gmra.mrb[56].mxu1 %vm140_vm0, %v7870_v25 }
0x173d   :  { %6965 = vmatmul.mubr.msk.f32.gmra.mrb[46].mxu0 %vm140_vm0, %v7870_v25  ;;  %6992 = vmatprep.mubr.msk.f32.mxu1 %vm7512_vm1, %v7511_v14 }
0x173e   :  { %6985 = vmatprep.mubr.msk.f32.mxu0 %vm7512_vm1, %v7511_v14 }
0x180b   :  { %v6977_v49 = vpop.f32.mrb[54].mxu1 }
0x180c   :  { %v6963_v34 = vpop.f32.mrb[44].mxu0  ;;  %v4543_v50 = vadd.f32 %v6977_v49, %v6216_v48  ;;  %v4537_v51 = vpop.f32.mrb[55].mxu1 }
0x180d   :  { %v4445_v36 = vadd.f32 %v6963_v34, %v6206_v33  ;;  %v4439_v37 = vpop.f32.mrb[45].mxu0  ;;  %v4538_v54 = vadd.f32 %v6216_v48, %v4537_v51 }
0x180e   :  { %v4440_v38 = vadd.f32 %v6206_v33, %v4439_v37  ;;  %v6253_v37 = vld [vmem:[%s7883_s27 + $0x68] sm:$0xff] }
0x180f   :  { %v7321_v55 = vpack.c.bf16 %v4543_v50, %v4538_v54  ;;  %v6980_v56 = vpop.f32.mrb[56].mxu1  ;;  %v6247_v50 = vld [vmem:[%s7920_s9 + $0x3] ss:$0 sm:$0xff] }
0x1810   :  { %v7313_v39 = vpack.c.bf16 %v4445_v36, %v4440_v38  ;;  %v6966_v40 = vpop.f32.mrb[46].mxu0  ;;  %v4553_v57 = vadd.f32 %v6980_v56, %v6216_v48  ;;  %v4547_v58 = vpop.f32.mrb[57].mxu1  ;;  %v6252_v36 = vld [vmem:[%s7883_s27 + $0x60] sm:$0xff] }
0x1811   :  { %v4455_v41 = vadd.f32 %v6966_v40, %v6206_v33  ;;  %v4449_v42 = vpop.f32.mrb[47].mxu0  ;;  %v4548_v59 = vadd.f32 %v6216_v48, %v4547_v58  ;;  %v7342_v38 = vpack.c.bf16 %v6253_v37, %v6252_v36  ;;  %v6244_v40 = vld [vmem:[%s7844_s15 + $0x70] sm:$0xff]  ;;  %v6255_v48 = vld [vmem:[%s7883_s27 + $0x78] sm:$0xff] }
0x1812   :  { %v4450_v43 = vadd.f32 %v6206_v33, %v4449_v42  ;;  %7315 = vmatpush3.bf16.xpose.msk.msra.mxu0 %vm7925_vm3, %v7313_v39  ;;  %v6243_v33 = vld [vmem:[%s7844_s15 + $0x68] sm:$0xff]  ;;  %v6272_v37 = vld [vmem:[%s8048_s28 + $0x18] sm:$0xff] }
0x1813   :  { %7320 = vmatprep.subr.bf16.mxu0 %v7524_v35  ;;  %v7324_v61 = vpack.c.bf16 %v4553_v57, %v4548_v59  ;;  %v7334_v34 = vpack.c.bf16 %v6243_v33, %v6242_v32 }
0x1814   :  { %v7317_v45 = vpack.c.bf16 %v4455_v41, %v4450_v43  ;;  %v6245_v41 = vld [vmem:[%s7844_s15 + $0x78] sm:$0xff]  ;;  %s7532_s15 = smov 17  }
0x1815   :  { %v7338_v43 = vpack.c.bf16 %v6245_v41, %v6244_v40  ;;  %s5990_s29 = sld [smem:[%s8234_s0 + %s7532_s15]]  }
0x1816   :  { %7319 = vmatpush3.bf16.xpose.msk.msra.mxu1 %vm7925_vm3, %v7317_v45 }
0x1817   :  { %7323 = vmatprep.subr.bf16.mxu1 %v7524_v35 }
0x1819   :  { %6986 = vmatmul.mubr.msk.f32.vlgmr.msra.gmra.mrb[48].mxu0 %vm394_vm2, %v4352_v46 }
0x181a   :  { %6999 = vmatprep.mubr.msk.f32.mxu0 %vm7512_vm1, %v7511_v14  ;;  %7322 = vmatpush3.bf16.msra.mxu0 %v7321_v55 }
0x181b   :  { %7009 = vmatprep.subr.mxu0 %v6231_v6 }
0x181d   :  { %6993 = vmatmul.mubr.msk.f32.vlgmr.msra.gmra.mrb[58].mxu1 %vm394_vm2, %v4357_v47 }
0x181e   :  { %7006 = vmatprep.mubr.msk.f32.mxu1 %vm7512_vm1, %v7511_v14  ;;  %7325 = vmatpush3.bf16.msra.mxu1 %v7324_v61 }
0x181f   :  { %7327 = vmatprep.subr.bf16.mxu1 %v7326_v9 }
0x18ec   :  { %v4631_v62 = vpop.f32.mrb[48].mxu0 }
0x18ed   :  { %v6987_v63 = vpop.f32.mrb[49].mxu0  ;;  %v4714_v0 = vsel %vm3323_vm4, %v4631_v62, -inf }
0x18ee   :  { %4715 = vmax.xlane.f32.xlu0 %v4714_v0  ;;  %v6257_v0 = vld [vmem:[%s7944_s18 + $0x3] ss:$0 sm:$0xff] }
0x18f0   :  { %v4710_v1 = vpop.f32.mrb[58].mxu1 }
0x18f1   :  { %v6994_v2 = vpop.f32.mrb[59].mxu1  ;;  %v4717_v3 = vsel %vm3323_vm4, %v4710_v1, -inf }
0x18f2   :  { %4718 = vmax.xlane.f32.xlu1 %v4717_v3 }
0x197b   :  { %v4716_v8 = vpop.xlane.xlu0 %4715 }
0x197c   :  { %v4720_v10 = vsub.f32 %v4631_v62, %v4716_v8 }
0x197e   :  { %v4722_v11 = vmul.f32 1.442695, %v4720_v10 }
0x197f   :  { %v4719_v13 = vpop.xlane.xlu1 %4718 }
0x1980   :  { %7485 = vpow2.f32 %v4722_v11  ;;  %v4721_v15 = vsub.f32 %v4710_v1, %v4719_v13 }
0x1982   :  { %v4724_v16 = vmul.f32 1.442695, %v4721_v15 }
0x1984   :  { %7487 = vpow2.f32 %v4724_v16 }
0x198a   :  { %v7486_v5 = vpop.eup %7485 }
0x198b   :  { %v4726_v12 = vsel %vm3323_vm4, %v7486_v5, 0.0 }
0x198c   :  { %4727 = vadd.xlane.f32.xlu0 %v4726_v12 }
0x198e   :  { %v7488_v17 = vpop.eup %7487 }
0x198f   :  { %v4729_v18 = vsel %vm3323_vm4, %v7488_v17, 0.0 }
0x1990   :  { %4730 = vadd.xlane.f32.xlu1 %v4729_v18 }
0x1a19   :  { %v4728_v21 = vpop.xlane.xlu0 %4727 }
0x1a1a   :  { %7489 = vrcp.f32 %v4728_v21 }
0x1a1d   :  { %v4731_v22 = vpop.xlane.xlu1 %4730 }
0x1a1e   :  { %7491 = vrcp.f32 %v4731_v22 }
0x1a24   :  { %v7490_v26 = vpop.eup %7489 }
0x1a25   :  { %v4734_v27 = vmul.f32 %v7490_v26, %v7486_v5 }
0x1a27   :  { %6227 = vst.msk [vmem:[%s7964_s22 + $0x20] sm:$0xff] %vm3323_vm4, %v4734_v27  ;;  %7000 = vmatmul.mubr.msk.f32.vlgmr.msra.gmra.mrb[50].mxu0 %vm3323_vm4, %v4734_v27 }
0x1a28   :  { %v7492_v30 = vpop.eup %7491  ;;  %7010 = vmatpush3.msra.mxu0 %v6231_v6 }
0x1a29   :  { %v4735_v31 = vmul.f32 %v7492_v30, %v7488_v17  ;;  %7335 = vmatprep.subr.bf16.mxu0 %v7334_v34 }
0x1a2b   :  { %6228 = vst.msk [vmem:[%s7964_s22 + $0x28] sm:$0xff] %vm3323_vm4, %v4735_v31  ;;  %7007 = vmatmul.mubr.msk.f32.vlgmr.msra.gmra.mrb[60].mxu1 %vm3323_vm4, %v4735_v31 }
0x1a2c   :  { %7329 = vmatpush3.bf16.msra.mxu1 %v7326_v9  ;;  %7022 = vmatprep.mubr.msk.f32.mxu1 %vm140_vm0, %v7898_v52 }
0x1a2d   :  { %7331 = vmatprep.subr.bf16.mxu1 %v7330_v4 }
0x1a30   :  { %7333 = vmatpush3.bf16.msra.mxu1 %v7330_v4 }
0x1a31   :  { %7343 = vmatprep.subr.bf16.mxu1 %v7342_v38 }
0x1a33   :  { %7023 = vmatmul.mubr.msk.f32.vlgmr.msra.gmra.mrb[62].mxu1 %vm140_vm0, %v7900_v53 }
0x1a34   :  { %7047 = vmatprep.mubr.msk.f32.mxu1 %vm140_vm0, %v7853_v23  ;;  %7345 = vmatpush3.bf16.msra.mxu1 %v7342_v38 }
0x1afa   :  { %v4808_v39 = vpop.f32.mrb[50].mxu0 }
0x1afb   :  { %v7001_v42 = vpop.f32.mrb[51].mxu0  ;;  %7011 = vmatprep.mubr.msk.f32.mxu0 %vm394_vm2, %v4808_v39 }
0x1afe   :  { %v4881_v44 = vpop.f32.mrb[60].mxu1 }
0x1aff   :  { %v7008_v45 = vpop.f32.mrb[61].mxu1  ;;  %7012 = vmatmul.mubr.msk.f32.vlgmr.msra.gmra.mrb[42].mxu0 %vm394_vm2, %v4881_v44 }
0x1b00   :  { %7337 = vmatpush3.bf16.msra.mxu0 %v7334_v34  ;;  %7033 = vmatprep.mubr.msk.f32.mxu0 %vm140_vm0, %v7853_v23  ;;  %v6254_v23 = vld [vmem:[%s7883_s27 + $0x70] sm:$0xff]  ;;  %s7540_s27 = smov 27  }
0x1b01   :  { %7339 = vmatprep.subr.bf16.mxu0 %v7338_v43  ;;  %v7346_v49 = vpack.c.bf16 %v6255_v48, %v6254_v23  ;;  %s6000_s1 = sld [smem:[%s8234_s0 + %s7540_s27]]  }
0x1b03   :  { %7347 = vmatprep.subr.bf16.mxu1 %v7346_v49 }
0x1b04   :  { %7341 = vmatpush3.bf16.msra.mxu0 %v7338_v43  ;;  %7349 = vmatpush3.bf16.msra.mxu1 %v7346_v49 }
0x1b05   :  { %7350 = vmatprep.subr.bf16.mxu0 %v7524_v35  ;;  %7354 = vmatprep.subr.bf16.mxu1 %v7524_v35 }
0x1b06   :  { %v7024_v46 = vpop.f32.mrb[62].mxu1 }
0x1b07   :  { %v5049_v47 = vpop.f32.mrb[63].mxu1  ;;  %7034 = vmatmul.mubr.msk.f32.vlgmr.msra.gmra.mrb[52].mxu0 %vm140_vm0, %v7862_v24  ;;  %7048 = vmatmul.mubr.msk.f32.vlgmr.msra.gmra.mrb[64].mxu1 %vm140_vm0, %v7862_v24 }
0x1b08   :  { %7036 = vmatprep.mubr.msk.f32.mxu0 %vm140_vm0, %v7866_v7  ;;  %7050 = vmatprep.mubr.msk.f32.mxu1 %vm140_vm0, %v7866_v7  ;;  %v6239_v7 = vld [vmem:[%s7938_s13 + $0x3] ss:$0 sm:$0xff] }
0x1b09   :  { %v5050_v62 = vadd.f32 %v6239_v7, %v5049_v47  ;;  %v5055_v63 = vadd.f32 %v7024_v46, %v6239_v7  ;;  %v5725_v7 = vld [vmem:[%s5991_s3 + $0x10] sm:$0xff] }
0x1b0b   :  { %7037 = vmatmul.mubr.msk.f32.gmra.mrb[54].mxu0 %vm140_vm0, %v7870_v25  ;;  %7051 = vmatmul.mubr.msk.f32.gmra.mrb[66].mxu1 %vm140_vm0, %v7870_v25 }
0x1b0c   :  { %7057 = vmatprep.mubr.msk.f32.mxu0 %vm7512_vm1, %v7511_v14  ;;  %7064 = vmatprep.mubr.msk.f32.mxu1 %vm7512_vm1, %v7511_v14 }
0x1bda   :  { %v7035_v51 = vpop.f32.mrb[52].mxu0  ;;  %v7049_v1 = vpop.f32.mrb[64].mxu1 }
0x1bdb   :  { %v5143_v54 = vadd.f32 %v7035_v51, %v6247_v50  ;;  %v5137_v55 = vpop.f32.mrb[53].mxu0  ;;  %v5241_v2 = vadd.f32 %v7049_v1, %v6257_v0  ;;  %v5235_v3 = vpop.f32.mrb[65].mxu1  ;;  %v5819_v1 = vld [vmem:[%s8195_s8 + $0x10] sm:$0xff] }
0x1bdc   :  { %v5138_v56 = vadd.f32 %v6247_v50, %v5137_v55  ;;  %v5236_v8 = vadd.f32 %v6257_v0, %v5235_v3  ;;  %v5820_v3 = vld [vmem:[%s8195_s8 + $0x18] sm:$0xff] }
0x1bde   :  { %v7351_v57 = vpack.c.bf16 %v5143_v54, %v5138_v56  ;;  %v7038_v58 = vpop.f32.mrb[54].mxu0  ;;  %v7359_v10 = vpack.c.bf16 %v5241_v2, %v5236_v8  ;;  %v7052_v11 = vpop.f32.mrb[66].mxu1  ;;  %v7376_v8 = vpack.c.bf16 %v5820_v3, %v5819_v1 }
0x1bdf   :  { %v5153_v59 = vadd.f32 %v7038_v58, %v6247_v50  ;;  %v5147_v24 = vpop.f32.mrb[55].mxu0  ;;  %v5251_v13 = vadd.f32 %v7052_v11, %v6257_v0  ;;  %v5245_v60 = vpop.f32.mrb[67].mxu1  ;;  %v5822_v11 = vld [vmem:[%s8195_s8 + $0x28] sm:$0xff] }
0x1be0   :  { %v5148_v61 = vadd.f32 %v6247_v50, %v5147_v24  ;;  %7353 = vmatpush3.bf16.xpose.msk.msra.mxu0 %vm7925_vm3, %v7351_v57  ;;  %v5246_v15 = vadd.f32 %v6257_v0, %v5245_v60  ;;  %v5724_v24 = vld [vmem:[%s5991_s3 + $0x8] sm:$0xff] }
0x1be1   :  { %7358 = vmatprep.subr.bf16.mxu0 %v7524_v35  ;;  %v5818_v0 = vld [vmem:[%s8195_s8 + $0x8] sm:$0xff] }
0x1be2   :  { %v7355_v25 = vpack.c.bf16 %v5153_v59, %v5148_v61  ;;  %v7362_v16 = vpack.c.bf16 %v5251_v13, %v5246_v15 }
0x1be4   :  { %7357 = vmatpush3.bf16.xpose.msk.msra.mxu1 %vm7925_vm3, %v7355_v25  ;;  %v5726_v25 = vld [vmem:[%s5991_s3 + $0x18] sm:$0xff] }
0x1be7   :  { %7058 = vmatmul.mubr.msk.f32.vlgmr.msra.gmra.mrb[56].mxu0 %vm394_vm2, %v5050_v62  ;;  %v7368_v62 = vpack.c.bf16 %v5726_v25, %v5725_v7  ;;  %v6284_v7 = vld [vmem:[%s5999_s23] ss:$0 sm:$0xff] }
0x1be8   :  { %7071 = vmatprep.mubr.msk.f32.mxu0 %vm7512_vm1, %v7511_v14  ;;  %7360 = vmatpush3.bf16.msra.mxu0 %v7359_v10  ;;  %v5821_v10 = vld [vmem:[%s8195_s8 + $0x20] sm:$0xff] }
0x1be9   :  { %7361 = vmatprep.subr.bf16.mxu0 %v7524_v35  ;;  %v7380_v13 = vpack.c.bf16 %v5822_v11, %v5821_v10 }
0x1beb   :  { %7065 = vmatmul.mubr.msk.f32.vlgmr.msra.gmra.mrb[68].mxu1 %vm394_vm2, %v5055_v63  ;;  %v5817_v63 = vld [vmem:[%s8195_s8] sm:$0xff] }
0x1bec   :  { %v7372_v2 = vpack.c.bf16 %v5818_v0, %v5817_v63  ;;  %v6285_v63 = vld [vmem:[%s6000_s1] ss:$0 sm:$0xff] }
0x1cba   :  { %v5329_v5 = vpop.f32.mrb[56].mxu0 }
0x1cbb   :  { %v7059_v12 = vpop.f32.mrb[57].mxu0  ;;  %v5412_v17 = vsel %vm3323_vm4, %v5329_v5, -inf }
0x1cbc   :  { %5413 = vmax.xlane.f32.xlu0 %v5412_v17 }
0x1cbe   :  { %v5408_v18 = vpop.f32.mrb[68].mxu1 }
0x1cbf   :  { %v7066_v19 = vpop.f32.mrb[69].mxu1  ;;  %v5415_v20 = vsel %vm3323_vm4, %v5408_v18, -inf }
0x1cc0   :  { %5416 = vmax.xlane.f32.xlu1 %v5415_v20  ;;  %v6276_v19 = vld [vmem:[%s5997_s11] ss:$0 sm:$0xff] }
0x1d49   :  { %v5414_v9 = vpop.xlane.xlu0 %5413 }
0x1d4a   :  { %v5418_v21 = vsub.f32 %v5329_v5, %v5414_v9 }
0x1d4c   :  { %v5420_v22 = vmul.f32 1.442695, %v5418_v21 }
0x1d4d   :  { %v5417_v26 = vpop.xlane.xlu1 %5416 }
0x1d4e   :  { %7493 = vpow2.f32 %v5420_v22  ;;  %v5419_v35 = vsub.f32 %v5408_v18, %v5417_v26  ;;  %v6277_v22 = vld [vmem:[%s5998_s16] ss:$0 sm:$0xff] }
0x1d50   :  { %v5422_v27 = vmul.f32 1.442695, %v5419_v35 }
0x1d52   :  { %7495 = vpow2.f32 %v5422_v27 }
0x1d58   :  { %v7494_v28 = vpop.eup %7493 }
0x1d59   :  { %v5424_v29 = vsel %vm3323_vm4, %v7494_v28, 0.0 }
0x1d5a   :  { %5425 = vadd.xlane.f32.xlu0 %v5424_v29  ;;  %v5823_v29 = vld [vmem:[%s8195_s8 + $0x30] sm:$0xff] }
0x1d5c   :  { %v7496_v30 = vpop.eup %7495 }
0x1d5d   :  { %v5427_v31 = vsel %vm3323_vm4, %v7496_v30, 0.0 }
0x1d5e   :  { %5428 = vadd.xlane.f32.xlu1 %v5427_v31 }
0x1de7   :  { %v5426_v4 = vpop.xlane.xlu0 %5425 }
0x1de8   :  { %7497 = vrcp.f32 %v5426_v4  ;;  %v6278_v4 = vld [vmem:[%s5992_s20] ss:$0 sm:$0xff] }
0x1deb   :  { %v5429_v6 = vpop.xlane.xlu1 %5428 }
0x1dec   :  { %7499 = vrcp.f32 %v5429_v6 }
0x1df2   :  { %v7498_v32 = vpop.eup %7497 }
0x1df3   :  { %v5432_v33 = vmul.f32 %v7498_v32, %v7494_v28 }
0x1df5   :  { %6268 = vst.msk [vmem:[%s7964_s22 + $0x30] sm:$0xff] %vm3323_vm4, %v5432_v33  ;;  %7072 = vmatmul.mubr.msk.f32.vlgmr.msra.gmra.mrb[58].mxu0 %vm3323_vm4, %v5432_v33 }
0x1df6   :  { %v7500_v34 = vpop.eup %7499  ;;  %7363 = vmatpush3.bf16.msra.mxu0 %v7362_v16  ;;  %7078 = vmatprep.mubr.msk.f32.mxu0 %vm7512_vm1, %v7511_v14  ;;  %v6275_v14 = vld [vmem:[%s5990_s29] ss:$0 sm:$0xff] }
0x1df7   :  { %v5433_v36 = vmul.f32 %v7500_v34, %v7496_v30  ;;  %7081 = vmatprep.subr.mxu0 %v6272_v37  ;;  %v5824_v30 = vld [vmem:[%s8195_s8 + $0x38] sm:$0xff] }
0x1df8   :  { %v7384_v31 = vpack.c.bf16 %v5824_v30, %v5823_v29 }
0x1df9   :  { %6269 = vst.msk [vmem:[%s7964_s22 + $0x38] sm:$0xff] %vm3323_vm4, %v5433_v36  ;;  %7079 = vmatmul.mubr.msk.f32.vlgmr.msra.gmra.mrb[60].mxu0 %vm3323_vm4, %v5433_v36 }
0x1dfa   :  { %7082 = vmatpush3.msra.mxu0 %v6272_v37 }
0x1dfb   :  { %7373 = vmatprep.subr.bf16.mxu0 %v7372_v2 }
0x1ec8   :  { %v5506_v38 = vpop.f32.mrb[58].mxu0 }
0x1ec9   :  { %v7073_v39 = vpop.f32.mrb[59].mxu0  ;;  %7083 = vmatprep.mubr.msk.f32.mxu0 %vm394_vm2, %v5506_v38  ;;  %v6281_v38 = vld [vmem:[%s5994_s25] ss:$0 sm:$0xff] }
0x1ecc   :  { %v5579_v40 = vpop.f32.mrb[60].mxu0 }
0x1ecd   :  { %v7080_v41 = vpop.f32.mrb[61].mxu0  ;;  %7084 = vmatmul.mubr.msk.f32.vlgmr.msra.gmra.mrb[42].mxu0 %vm394_vm2, %v5579_v40 }
0x1ece   :  { %7375 = vmatpush3.bf16.msra.mxu0 %v7372_v2 }
0x1ecf   :  { %7377 = vmatprep.subr.bf16.mxu0 %v7376_v8 }
0x1ed2   :  { %7379 = vmatpush3.bf16.msra.mxu0 %v7376_v8 }
0x1ed3   :  { %7381 = vmatprep.subr.bf16.mxu0 %v7380_v13 }
0x1ed6   :  { %7383 = vmatpush3.bf16.msra.mxu0 %v7380_v13 }
0x1ed7   :  { %7385 = vmatprep.subr.bf16.mxu0 %v7384_v31 }
0x1eda   :  { %7387 = vmatpush3.bf16.msra.mxu0 %v7384_v31 }
0x1fa0   :  { %v7085_v42 = vpop.f32.mrb[42].mxu0 }
0x1fa1   :  { %v5676_v43 = vadd.f32 %v7085_v42, %v6275_v14  ;;  %v5657_v44 = vpop.f32.mrb[43].mxu0 }
0x1fa2   :  { %v5675_v45 = vadd.f32 %v6275_v14, %v5657_v44 }
0x1fa3   :  { %v5678_v46 = vadd.f32 %v5676_v43, %v7900_v53 }
0x1fa4   :  { %v5677_v47 = vadd.f32 %v5675_v45, %v7898_v52  ;;  %v5723_v52 = vld [vmem:[%s5991_s3] sm:$0xff] }
0x1fa5   :  { %v5684_v23 = vsel %vm140_vm0, %v5678_v46, 0.0  ;;  %v7364_v61 = vpack.c.bf16 %v5724_v24, %v5723_v52 }
0x1fa6   :  { %5685 = vadd.xlane.f32.xlu1 %v5684_v23  ;;  %v5681_v48 = vsel %vm140_vm0, %v5677_v47, 0.0 }
0x1fa7   :  { %5682 = vadd.xlane.f32.xlu0 %v5681_v48  ;;  %7365 = vmatprep.subr.bf16.mxu1 %v7364_v61 }
0x1fa8   :  { %7367 = vmatpush3.bf16.msra.mxu1 %v7364_v61 }
0x1fa9   :  { %7369 = vmatprep.subr.bf16.mxu1 %v7368_v62 }
0x1fac   :  { %7371 = vmatpush3.bf16.msra.mxu1 %v7368_v62 }
0x2033   :  { %v5686_v49 = vpop.xlane.xlu1 %5685 }
0x2034   :  { %v5688_v50 = vmul.f32 0.03125, %v5686_v49  ;;  %v5683_v51 = vpop.xlane.xlu0 %5682 }
0x2035   :  { %v5687_v54 = vmul.f32 0.03125, %v5683_v51 }
0x2036   :  { %v5690_v55 = vsub.f32 %v5678_v46, %v5688_v50 }
0x2037   :  { %v5689_v56 = vsub.f32 %v5677_v47, %v5687_v54 }
0x2038   :  { %v5692_v57 = vmul.f32 %v5690_v55, %v5690_v55 }
0x2039   :  { %v5691_v58 = vmul.f32 %v5689_v56, %v5689_v56 }
0x203a   :  { %v5696_v59 = vsel %vm140_vm0, %v5692_v57, 0.0 }
0x203b   :  { %5697 = vadd.xlane.f32.xlu1 %v5696_v59  ;;  %v5693_v53 = vsel %vm140_vm0, %v5691_v58, 0.0 }
0x203c   :  { %5694 = vadd.xlane.f32.xlu0 %v5693_v53 }
0x20c8   :  { %v5698_v60 = vpop.xlane.xlu1 %5697 }
0x20c9   :  { %v5700_v15 = vmul.f32 0.03125, %v5698_v60  ;;  %v5695_v16 = vpop.xlane.xlu0 %5694 }
0x20ca   :  { %v5699_v5 = vmul.f32 0.03125, %v5695_v16 }
0x20cb   :  { %v5702_v12 = vadd.f32 1e-05, %v5700_v15 }
0x20cc   :  { %v5701_v17 = vadd.f32 1e-05, %v5699_v5 }
0x20cd   :  { %7501 = vrsqrt.f32 %v5702_v12 }
0x20ce   :  { %7503 = vrsqrt.f32 %v5701_v17 }
0x20d7   :  { %v7502_v18 = vpop.eup %7501 }
0x20d8   :  { %v7504_v20 = vpop.eup %7503  ;;  %v5706_v9 = vmul.f32 %v7502_v18, %v5690_v55 }
0x20d9   :  { %v5705_v21 = vmul.f32 %v7504_v20, %v5689_v56 }
0x20da   :  { %v5714_v26 = vmul.f32 %v6276_v19, %v5706_v9 }
0x20db   :  { %v5713_v35 = vmul.f32 %v6276_v19, %v5705_v21 }
0x20dc   :  { %v5722_v28 = vadd.f32 %v6277_v22, %v5714_v26 }
0x20dd   :  { %v5721_v27 = vadd.f32 %v6277_v22, %v5713_v35 }
0x20df   :  { %7094 = vmatprep.mubr.msk.f32.mxu1 %vm140_vm0, %v5721_v27 }
0x20e0   :  { %7095 = vmatmul.mubr.msk.f32.vlgmr.msra.gmra.mrb[70].mxu1 %vm140_vm0, %v5722_v28 }
0x21b3   :  { %v7096_v6 = vpop.f32.mrb[70].mxu1 }
0x21b4   :  { %v5812_v32 = vadd.f32 %v7096_v6, %v6278_v4  ;;  %v5806_v33 = vpop.f32.mrb[71].mxu1 }
0x21b5   :  { %v5807_v34 = vadd.f32 %v6278_v4, %v5806_v33 }
0x21b6   :  { %v5816_v37 = vmax.f32 %v5812_v32, 0.0 }
0x21b7   :  { %v5815_v36 = vmax.f32 %v5807_v34, 0.0 }
0x21b9   :  { %7113 = vmatprep.mubr.msk.f32.mxu0 %vm5832_vm5, %v5815_v36 }
0x21ba   :  { %7114 = vmatmul.mubr.msk.f32.vlgmr.msra.gmra.mrb[62].mxu0 %vm5832_vm5, %v5816_v37 }
0x228d   :  { %v7115_v39 = vpop.f32.mrb[62].mxu0 }
0x228e   :  { %v5911_v40 = vadd.f32 %v7115_v39, %v6281_v38  ;;  %v5905_v41 = vpop.f32.mrb[63].mxu0 }
0x228f   :  { %v5906_v14 = vadd.f32 %v6281_v38, %v5905_v41 }
0x2290   :  { %v5915_v42 = vadd.f32 %v5911_v40, %v5722_v28 }
0x2291   :  { %v5914_v43 = vadd.f32 %v5906_v14, %v5721_v27 }
0x2292   :  { %v5921_v44 = vsel %vm140_vm0, %v5915_v42, 0.0 }
0x2293   :  { %5922 = vadd.xlane.f32.xlu1 %v5921_v44  ;;  %v5918_v45 = vsel %vm140_vm0, %v5914_v43, 0.0 }
0x2294   :  { %5919 = vadd.xlane.f32.xlu0 %v5918_v45 }
0x2320   :  { %v5923_v46 = vpop.xlane.xlu1 %5922 }
0x2321   :  { %v5925_v47 = vmul.f32 0.03125, %v5923_v46  ;;  %v5920_v23 = vpop.xlane.xlu0 %5919 }
0x2322   :  { %v5924_v48 = vmul.f32 0.03125, %v5920_v23 }
0x2323   :  { %v5927_v49 = vsub.f32 %v5915_v42, %v5925_v47 }
0x2324   :  { %v5926_v50 = vsub.f32 %v5914_v43, %v5924_v48 }
0x2325   :  { %v5929_v51 = vmul.f32 %v5927_v49, %v5927_v49 }
0x2326   :  { %v5928_v54 = vmul.f32 %v5926_v50, %v5926_v50 }
0x2327   :  { %v5933_v55 = vsel %vm140_vm0, %v5929_v51, 0.0 }
0x2328   :  { %5934 = vadd.xlane.f32.xlu1 %v5933_v55  ;;  %v5930_v56 = vsel %vm140_vm0, %v5928_v54, 0.0 }
0x2329   :  { %5931 = vadd.xlane.f32.xlu0 %v5930_v56 }
0x23b5   :  { %v5935_v57 = vpop.xlane.xlu1 %5934 }
0x23b6   :  { %v5937_v58 = vmul.f32 0.03125, %v5935_v57  ;;  %v5932_v59 = vpop.xlane.xlu0 %5931 }
0x23b7   :  { %v5936_v53 = vmul.f32 0.03125, %v5932_v59 }
0x23b8   :  { %v5939_v52 = vadd.f32 1e-05, %v5937_v58 }
0x23b9   :  { %v5938_v24 = vadd.f32 1e-05, %v5936_v53 }
0x23ba   :  { %7505 = vrsqrt.f32 %v5939_v52 }
0x23bb   :  { %7507 = vrsqrt.f32 %v5938_v24 }
0x23c4   :  { %v7506_v61 = vpop.eup %7505 }
0x23c5   :  { %v7508_v25 = vpop.eup %7507  ;;  %v5943_v62 = vmul.f32 %v7506_v61, %v5927_v49 }
0x23c6   :  { %v5942_v0 = vmul.f32 %v7508_v25, %v5926_v50 }
0x23c7   :  { %v5951_v1 = vmul.f32 %v6284_v7, %v5943_v62 }
0x23c8   :  { %v5950_v2 = vmul.f32 %v6284_v7, %v5942_v0 }
0x23c9   :  { %v5959_v3 = vadd.f32 %v6285_v63, %v5951_v1 }
0x23ca   :  { %v5958_v8 = vadd.f32 %v6285_v63, %v5950_v2 }
0x23cb   :  { %5961 = vst.msk [vmem:[%s6001_s5 + $0x8] sm:$0xff] %vm140_vm0, %v5959_v3 }
0x23cc   :  { %5960 = vst.msk [vmem:[%s6001_s5] sm:$0xff] %vm140_vm0, %v5958_v8 }

</bundles_post_ra>
